<compile_context>
chip_gen: v5e
topology: v5e:2x2
jax: 0.10.0
libtpu: 0.0.40
codegen_flags: <defaults>
</compile_context>

<pallas_src>
import functools

import jax
import jax.numpy as jnp
from jax.experimental import pallas as pl
from jax.experimental.pallas import tpu as pltpu

_LPAD = 8  # sublane-aligned left pad of the depthwise halo scratch


# ----------------------------------------------------------------------------
# Fused kernel
# ----------------------------------------------------------------------------
def _detect_head_kernel(x_ref, w0_ref, b0_ref, taps_ref, bdw_ref, wproj_ref,
                        o_ref, pad_ref, feats_ref, *, H, W, num_reg):
    B = x_ref.shape[0]            # batch elements handled by this grid step
    C3 = pad_ref.shape[2]         # 3 * C (the three heads stacked channel-wise)
    Wp = pad_ref.shape[1]         # _LPAD + W + 2
    HW = H * W
    c_out = o_ref.shape[1]
    c0 = _LPAD - 2                # first read column of the 5x5 window

    # ---- halo-only zeroing (every step; interior is rewritten per element) --
    pad_ref[0:2, :, :] = jnp.zeros((2, Wp, C3), jnp.float32)
    pad_ref[2 + H:4 + H, :, :] = jnp.zeros((2, Wp, C3), jnp.float32)
    pad_ref[:, c0:_LPAD, :] = jnp.zeros((H + 4, 2, C3), jnp.float32)
    pad_ref[:, _LPAD + W:_LPAD + W + 2, :] = jnp.zeros((H + 4, 2, C3),
                                                       jnp.float32)

    taps = taps_ref[...]                                  # [25, 3C], f32 (VALU)
    bdw = bdw_ref[...].reshape(1, 1, C3)
    hc = 8 if H % 8 == 0 else H                           # strip-mine rows

    for b in range(B):
        # ---- stem 1x1 conv (BN folded into w0, output pre-replicated x3) ----
        # x_ref[b] is [C, HW]; transpose in-kernel (XLU, tiny) -> lane-dense
        # input DMA; bf16 MXU operands, f32 accumulation.
        xb = x_ref[b].T.astype(jnp.bfloat16)              # [HW, C]
        y = jnp.dot(xb, w0_ref[...],
                    preferred_element_type=jnp.float32)   # [HW, 3C]
        y = jnp.maximum(y + b0_ref[...], 0.0)

        # zero-padded copy into VMEM scratch (sublane-aligned interior store)
        pad_ref[2:2 + H, _LPAD:_LPAD + W, :] = y.reshape(H, W, C3)

        # ---- fused depthwise 5x5 for all three heads (taps carry BN scale),
        #      strip-mined over H to bound vreg pressure ----------------------
        for h0 in range(0, H, hc):
            acc = jnp.zeros((hc, W, C3), jnp.float32)
            for t in range(25):
                dy, dx = divmod(t, 5)
                acc = acc + pad_ref[h0 + dy:h0 + dy + hc,
                                    c0 + dx:c0 + dx + W, :] * taps[t]
            chunk = jnp.maximum(acc + bdw, 0.0)
            feats_ref[h0 * W:(h0 + hc) * W, :] = (
                chunk.reshape(hc * W, C3).astype(feats_ref.dtype))

        # ---- fused head projections: one bf16 matmul vs. block-diagonal
        #      weight, computed transposed so the output last dim is HW -------
        out_t = jax.lax.dot_general(
            wproj_ref[...], feats_ref[...],
            dimension_numbers=(((1,), (1,)), ((), ())),
            preferred_element_type=jnp.float32)           # [c_out, HW]

        obj = jax.nn.sigmoid(out_t[0:1, :])
        reg = out_t[1:1 + num_reg, :]
        logits = out_t[1 + num_reg:, :]
        m = jnp.max(logits, axis=0, keepdims=True)
        e = jnp.exp(logits - m)
        # NOTE: pl.reciprocal(..., approx=True) would move the divide to the
        # EUP (v5e relief) at ~1e-3 softmax tolerance; kept exact so the
        # cls-sum-to-1 check stays tight.
        cls = e * pl.reciprocal(jnp.sum(e, axis=0, keepdims=True), approx=False)

        # single fused store per batch element (lane-dense last dim = HW)
        o_ref[b] = jnp.concatenate([obj, reg, cls], axis=0)


# ----------------------------------------------------------------------------
# Forward wrapper
# ----------------------------------------------------------------------------
@functools.partial(jax.jit, static_argnames=("num_reg", "b_blk"))
def detect_head_forward(x_nchw, fp, *, num_reg, b_blk=None):
    N, C, H, W = x_nchw.shape
    C3 = fp["w0"].shape[1]
    c_out = fp["wproj"].shape[0]
    HW = H * W

    if b_blk is None:
        # >= 2 grid steps keeps both v7x TensorCores busy; bigger blocks
        # amortize the per-step overhead on single-TC v5e/v6e.
        b_blk = N // 2 if (N % 2 == 0 and N >= 4) else 1
    assert N % b_blk == 0, (N, b_blk)

    # Free reshape of NCHW (no transpose, no extra HBM traffic).
    x = x_nchw.reshape(N, C, HW)

    out = pl.pallas_call(
        functools.partial(_detect_head_kernel, H=H, W=W, num_reg=num_reg),
        out_shape=jax.ShapeDtypeStruct((N, c_out, HW), jnp.float32),
        grid=(N // b_blk,),
        in_specs=[
            pl.BlockSpec((b_blk, C, HW), lambda n: (n, 0, 0)),
            pl.BlockSpec((C, C3), lambda n: (0, 0)),
            pl.BlockSpec((1, C3), lambda n: (0, 0)),
            pl.BlockSpec((25, C3), lambda n: (0, 0)),
            pl.BlockSpec((1, C3), lambda n: (0, 0)),
            pl.BlockSpec((c_out, C3), lambda n: (0, 0)),
        ],
        out_specs=pl.BlockSpec((b_blk, c_out, HW), lambda n: (n, 0, 0)),
        scratch_shapes=[
            pltpu.VMEM((H + 4, _LPAD + W + 2, C3), jnp.float32),  # padded feats
            pltpu.VMEM((HW, C3), jnp.bfloat16),                   # depthwise out
        ],
        compiler_params=pltpu.CompilerParams(
            dimension_semantics=("parallel",)),
    )(x, fp["w0"], fp["b0"], fp["taps"], fp["bdw"], fp["wproj"])

    # [N, c_out, H*W] is already channel-major: pure reshape to NCHW.
    return out.reshape(N, c_out, H, W)


# ----------------------------------------------------------------------------
# Parameter construction and one-time BN folding / weight fusion
# ----------------------------------------------------------------------------
def make_params(key, C, category_num, landmark_num):
    ks = jax.random.split(key, 16)

    def bn(k):
        k1, k2, k3, k4 = jax.random.split(k, 4)
        gamma = 1.0 + 0.1 * jax.random.normal(k1, (C,))
        beta = 0.1 * jax.random.normal(k2, (C,))
        mean = 0.1 * jax.random.normal(k3, (C,))
        var = 0.5 + jnp.abs(jax.random.normal(k4, (C,))) * 0.5
        return (gamma, beta, mean, var)

    params = {
        "w0": 0.2 * jax.random.normal(ks[0], (C, C)),        # x @ W (1x1 conv)
        "bn0": bn(ks[1]),
        "obj_dw": 0.2 * jax.random.normal(ks[2], (25, C)),    # depthwise taps
        "obj_bn": bn(ks[3]),
        "obj_pw": 0.2 * jax.random.normal(ks[4], (C, 1)),
        "reg_dw": 0.2 * jax.random.normal(ks[5], (25, C)),
        "reg_bn": bn(ks[6]),
        "reg_pw": 0.2 * jax.random.normal(ks[7], (C, landmark_num * 2)),
        "cls_dw": 0.2 * jax.random.normal(ks[8], (25, C)),
        "cls_bn": bn(ks[9]),
        "cls_pw": 0.2 * jax.random.normal(ks[10], (C, category_num)),
    }
    return jax.tree.map(lambda a: a.astype(jnp.float32), params)


def _fold_bn(gamma, beta, mean, var, eps=1e-5):
    scale = gamma * jax.lax.rsqrt(var + eps)
    bias = beta - mean * scale
    return scale, bias


def prepare_params(p, category_num, landmark_num):
    """One-time: fold BN into conv weights; tile / stack / cast for the kernel."""
    C = p["w0"].shape[0]
    c_reg = landmark_num * 2
    c_out = 1 + c_reg + category_num

    # Stem: fold BN scale into w0 columns, replicate x3 for the three heads.
    s0, b0 = _fold_bn(*p["bn0"])
    w0s = p["w0"] * s0[None, :]
    w0_rep = jnp.tile(w0s, (1, 3)).astype(jnp.bfloat16)      # [C, 3C] MXU operand
    b0_rep = jnp.tile(b0, 3)[None, :].astype(jnp.float32)    # [1, 3C]

    # Depthwise taps: fold BN scale per channel, stack heads channel-wise.
    taps, biases = [], []
    for name in ("obj", "reg", "cls"):
        s, b = _fold_bn(*p[name + "_bn"])
        taps.append(p[name + "_dw"] * s[None, :])             # [25, C]
        biases.append(b)
    taps_cat = jnp.concatenate(taps, axis=1).astype(jnp.float32)   # [25, 3C]
    bdw_cat = jnp.concatenate(biases)[None, :].astype(jnp.float32)  # [1, 3C]

    # Head projections: block-diagonal, transposed ([c_out, 3C]), bf16 MXU operand.
    wproj = jnp.zeros((c_out, 3 * C), jnp.float32)
    wproj = wproj.at[0:1, 0:C].set(p["obj_pw"].T)
    wproj = wproj.at[1:1 + c_reg, C:2 * C].set(p["reg_pw"].T)
    wproj = wproj.at[1 + c_reg:, 2 * C:3 * C].set(p["cls_pw"].T)
    wproj = wproj.astype(jnp.bfloat16)

    return {"w0": w0_rep, "b0": b0_rep, "taps": taps_cat, "bdw": bdw_cat,
            "wproj": wproj}


# ----------------------------------------------------------------------------
# Pure-JAX reference (matches the PyTorch module semantics, full f32)
# ----------------------------------------------------------------------------
def reference_forward(x_nchw, p, eps=1e-5):
    hp = jax.lax.Precision.HIGHEST
    x = jnp.transpose(x_nchw, (0, 2, 3, 1)).astype(jnp.float32)   # NHWC

    def bn(y, bnp):
        g, b, m, v = bnp
        return (y - m) * (g * jax.lax.rsqrt(v + eps)) + b

    y = jnp.einsum("nhwc,cd->nhwd", x, p["w0"], precision=hp)
    y = jax.nn.relu(bn(y, p["bn0"]))

    def head(dw, bnp, pw):
        H, W = y.shape[1], y.shape[2]
        yp = jnp.pad(y, ((0, 0), (2, 2), (2, 2), (0, 0)))
        acc = jnp.zeros_like(y)
        for t in range(25):
            dy, dx = divmod(t, 5)
            acc = acc + yp[:, dy:dy + H, dx:dx + W, :] * dw[t]
        f = jax.nn.relu(bn(acc, bnp))
        return jnp.einsum("nhwc,cd->nhwd", f, pw, precision=hp)

    obj = jax.nn.sigmoid(head(p["obj_dw"], p["obj_bn"], p["obj_pw"]))
    reg = head(p["reg_dw"], p["reg_bn"], p["reg_pw"])
    cls = jax.nn.softmax(head(p["cls_dw"], p["cls_bn"], p["cls_pw"]), axis=-1)
    out = jnp.concatenate([obj, reg, cls], axis=-1)
    return jnp.transpose(out, (0, 3, 1, 2))                       # NCHW


# ----------------------------------------------------------------------------
if __name__ == "__main__":
    N, C, H, W = 2, 16, 16, 16
    category_num, landmark_num = 3, 4

    key = jax.random.PRNGKey(0)
    kx, kp = jax.random.split(key)
    x = jax.random.normal(kx, (N, C, H, W), dtype=jnp.float32)
    params = make_params(kp, C, category_num, landmark_num)
    folded = prepare_params(params, category_num, landmark_num)

    out = detect_head_forward(x, folded, num_reg=landmark_num * 2)
    out = jax.block_until_ready(out)

    expected_channels = 1 + landmark_num * 2 + category_num
    assert out.shape == (N, expected_channels, H, W), out.shape

    # Numerical check against the pure-f32 pure-JAX reference.  The kernel
    # uses bf16 MXU operands (f32 accumulation), so tolerance is slightly
    # looser than the f32-only variant.
    ref = reference_forward(x, params)
    max_err = float(jnp.max(jnp.abs(out - ref)))
    assert jnp.allclose(out, ref, atol=3e-2, rtol=3e-2), f"max err {max_err}"

    # Sanity: obj in (0,1); cls softmax sums to 1 over the channel dim.
    assert bool(jnp.all((out[:, 0] > 0) & (out[:, 0] < 1)))
    cls_sum = jnp.sum(out[:, 1 + landmark_num * 2:], axis=1)
    assert bool(jnp.allclose(cls_sum, 1.0, atol=1e-3))

    print("KERNEL_OK")
</pallas_src>

<mosaic_0001>
module attributes {stable_mosaic.version = 11 : i64} {
  func.func @_detect_head_kernel(%arg0: i32, %arg1: memref<1x16x256xf32, #tpu.memory_space<vmem>>, %arg2: memref<16x48xbf16, #tpu.memory_space<vmem>>, %arg3: memref<1x48xf32, #tpu.memory_space<vmem>>, %arg4: memref<25x48xf32, #tpu.memory_space<vmem>>, %arg5: memref<1x48xf32, #tpu.memory_space<vmem>>, %arg6: memref<12x48xbf16, #tpu.memory_space<vmem>>, %arg7: memref<1x12x256xf32, #tpu.memory_space<vmem>>, %arg8: memref<20x26x48xf32, #tpu.memory_space<vmem>>, %arg9: memref<256x48xbf16, #tpu.memory_space<vmem>>) attributes {dimension_semantics = [#tpu.dimension_semantics<parallel>], iteration_bounds = array<i64: 2>, scalar_prefetch = 0 : i64, scratch_operands = 2 : i64, tpu.core_type = #tpu.core_type<tc>, window_params = [{transform_indices = @transform_0, window_bounds = array<i64: 1, 16, 256>}, {pipeline_mode = #tpu.pipeline_mode<synchronous>, transform_indices = @transform_1, window_bounds = array<i64: 16, 48>}, {pipeline_mode = #tpu.pipeline_mode<synchronous>, transform_indices = @transform_2, window_bounds = array<i64: 1, 48>}, {pipeline_mode = #tpu.pipeline_mode<synchronous>, transform_indices = @transform_3, window_bounds = array<i64: 25, 48>}, {pipeline_mode = #tpu.pipeline_mode<synchronous>, transform_indices = @transform_4, window_bounds = array<i64: 1, 48>}, {pipeline_mode = #tpu.pipeline_mode<synchronous>, transform_indices = @transform_5, window_bounds = array<i64: 12, 48>}, {transform_indices = @transform_6, window_bounds = array<i64: 1, 12, 256>}]} {
    %cst = arith.constant 0.000000e+00 : f32
    %0 = vector.broadcast %cst : f32 to vector<2x26x48xf32>
    %c0 = arith.constant 0 : index
    %c0_0 = arith.constant 0 : index
    %c0_1 = arith.constant 0 : index
    %1 = vector.load %arg8[%c0, %c0_0, %c0_1] : memref<20x26x48xf32, #tpu.memory_space<vmem>>, vector<2x26x48xf32>
    tpu.vector_store %arg8[%c0, %c0_0, %c0_1], %0 {strides = array<i32>} : memref<20x26x48xf32, #tpu.memory_space<vmem>>, vector<2x26x48xf32>,
    %cst_2 = arith.constant 0.000000e+00 : f32
    %2 = vector.broadcast %cst_2 : f32 to vector<2x26x48xf32>
    %c18 = arith.constant 18 : index
    %c0_3 = arith.constant 0 : index
    %c0_4 = arith.constant 0 : index
    %3 = vector.load %arg8[%c18, %c0_3, %c0_4] : memref<20x26x48xf32, #tpu.memory_space<vmem>>, vector<2x26x48xf32>
    tpu.vector_store %arg8[%c18, %c0_3, %c0_4], %2 {strides = array<i32>} : memref<20x26x48xf32, #tpu.memory_space<vmem>>, vector<2x26x48xf32>,
    %cst_5 = arith.constant 0.000000e+00 : f32
    %4 = vector.broadcast %cst_5 : f32 to vector<20x2x48xf32>
    %c0_6 = arith.constant 0 : index
    %c6 = arith.constant 6 : index
    %c0_7 = arith.constant 0 : index
    %5 = vector.load %arg8[%c0_6, %c6, %c0_7] : memref<20x26x48xf32, #tpu.memory_space<vmem>>, vector<20x2x48xf32>
    tpu.vector_store %arg8[%c0_6, %c6, %c0_7], %4 {strides = array<i32>} : memref<20x26x48xf32, #tpu.memory_space<vmem>>, vector<20x2x48xf32>,
    %cst_8 = arith.constant 0.000000e+00 : f32
    %6 = vector.broadcast %cst_8 : f32 to vector<20x2x48xf32>
    %c0_9 = arith.constant 0 : index
    %c24 = arith.constant 24 : index
    %c0_10 = arith.constant 0 : index
    %7 = vector.load %arg8[%c0_9, %c24, %c0_10] : memref<20x26x48xf32, #tpu.memory_space<vmem>>, vector<20x2x48xf32>
    tpu.vector_store %arg8[%c0_9, %c24, %c0_10], %6 {strides = array<i32>} : memref<20x26x48xf32, #tpu.memory_space<vmem>>, vector<20x2x48xf32>,
    %c0_11 = arith.constant 0 : index
    %c0_12 = arith.constant 0 : index
    %8 = vector.load %arg4[%c0_11, %c0_12] : memref<25x48xf32, #tpu.memory_space<vmem>>, vector<25x48xf32>
    %c0_13 = arith.constant 0 : index
    %c0_14 = arith.constant 0 : index
    %9 = vector.load %arg5[%c0_13, %c0_14] : memref<1x48xf32, #tpu.memory_space<vmem>>, vector<1x48xf32>
    %10 = vector.shape_cast %9 : vector<1x48xf32> to vector<1x1x48xf32>
    %c0_15 = arith.constant 0 : index
    %c0_16 = arith.constant 0 : index
    %c0_17 = arith.constant 0 : index
    %11 = vector.load %arg1[%c0_15, %c0_16, %c0_17] : memref<1x16x256xf32, #tpu.memory_space<vmem>>, vector<1x16x256xf32>
    %12 = vector.shape_cast %11 : vector<1x16x256xf32> to vector<16x256xf32>
    %13 = tpu.transpose %12, [1, 0] : vector<16x256xf32> -> vector<256x16xf32>
    %14 = arith.truncf %13 : vector<256x16xf32> to vector<256x16xbf16>
    %c0_18 = arith.constant 0 : index
    %c0_19 = arith.constant 0 : index
    %15 = vector.load %arg2[%c0_18, %c0_19] : memref<16x48xbf16, #tpu.memory_space<vmem>>, vector<16x48xbf16>
    %cst_20 = arith.constant dense<0.000000e+00> : vector<256x48xf32>
    %16 = tpu.matmul %14, %15, %cst_20 {dimension_numbers = #tpu.dot_dimension_numbers<[1], [0], [0], [1], [0, 0, 1, 1], [], []>} : vector<256x16xbf16>, vector<16x48xbf16>, vector<256x48xf32> -> vector<256x48xf32>
    %c0_21 = arith.constant 0 : index
    %c0_22 = arith.constant 0 : index
    %17 = vector.load %arg3[%c0_21, %c0_22] : memref<1x48xf32, #tpu.memory_space<vmem>>, vector<1x48xf32>
    %18 = vector.broadcast %17 : vector<1x48xf32> to vector<256x48xf32>
    %19 = arith.addf %16, %18 : vector<256x48xf32>
    %cst_23 = arith.constant 0.000000e+00 : f32
    %20 = vector.broadcast %cst_23 : f32 to vector<256x48xf32>
    %21 = arith.maximumf %19, %20 : vector<256x48xf32>
    %22 = vector.shape_cast %21 : vector<256x48xf32> to vector<16x16x48xf32>
    %c2 = arith.constant 2 : index
    %c8 = arith.constant 8 : index
    %c0_24 = arith.constant 0 : index
    %23 = vector.load %arg8[%c2, %c8, %c0_24] : memref<20x26x48xf32, #tpu.memory_space<vmem>>, vector<16x16x48xf32>
    tpu.vector_store %arg8[%c2, %c8, %c0_24], %22 {strides = array<i32>} : memref<20x26x48xf32, #tpu.memory_space<vmem>>, vector<16x16x48xf32>,
    %cst_25 = arith.constant 0.000000e+00 : f32
    %24 = vector.broadcast %cst_25 : f32 to vector<8x16x48xf32>
    %c0_26 = arith.constant 0 : index
    %c6_27 = arith.constant 6 : index
    %c0_28 = arith.constant 0 : index
    %25 = vector.load %arg8[%c0_26, %c6_27, %c0_28] : memref<20x26x48xf32, #tpu.memory_space<vmem>>, vector<8x16x48xf32>
    %26 = vector.extract_strided_slice %8 {offsets = [0, 0], sizes = [1, 48], strides = [1, 1]} : vector<25x48xf32> to vector<1x48xf32>
    %27 = vector.shape_cast %26 : vector<1x48xf32> to vector<48xf32>
    %28 = vector.shape_cast %27 : vector<48xf32> to vector<1x1x48xf32>
    %29 = vector.broadcast %28 : vector<1x1x48xf32> to vector<8x16x48xf32>
    %30 = arith.mulf %25, %29 : vector<8x16x48xf32>
    %31 = arith.addf %24, %30 : vector<8x16x48xf32>
    %c0_29 = arith.constant 0 : index
    %c7 = arith.constant 7 : index
    %c0_30 = arith.constant 0 : index
    %32 = vector.load %arg8[%c0_29, %c7, %c0_30] : memref<20x26x48xf32, #tpu.memory_space<vmem>>, vector<8x16x48xf32>
    %33 = vector.extract_strided_slice %8 {offsets = [1, 0], sizes = [1, 48], strides = [1, 1]} : vector<25x48xf32> to vector<1x48xf32>
    %34 = vector.shape_cast %33 : vector<1x48xf32> to vector<48xf32>
    %35 = vector.shape_cast %34 : vector<48xf32> to vector<1x1x48xf32>
    %36 = vector.broadcast %35 : vector<1x1x48xf32> to vector<8x16x48xf32>
    %37 = arith.mulf %32, %36 : vector<8x16x48xf32>
    %38 = arith.addf %31, %37 : vector<8x16x48xf32>
    %c0_31 = arith.constant 0 : index
    %c8_32 = arith.constant 8 : index
    %c0_33 = arith.constant 0 : index
    %39 = vector.load %arg8[%c0_31, %c8_32, %c0_33] : memref<20x26x48xf32, #tpu.memory_space<vmem>>, vector<8x16x48xf32>
    %40 = vector.extract_strided_slice %8 {offsets = [2, 0], sizes = [1, 48], strides = [1, 1]} : vector<25x48xf32> to vector<1x48xf32>
    %41 = vector.shape_cast %40 : vector<1x48xf32> to vector<48xf32>
    %42 = vector.shape_cast %41 : vector<48xf32> to vector<1x1x48xf32>
    %43 = vector.broadcast %42 : vector<1x1x48xf32> to vector<8x16x48xf32>
    %44 = arith.mulf %39, %43 : vector<8x16x48xf32>
    %45 = arith.addf %38, %44 : vector<8x16x48xf32>
    %c0_34 = arith.constant 0 : index
    %c9 = arith.constant 9 : index
    %c0_35 = arith.constant 0 : index
    %46 = vector.load %arg8[%c0_34, %c9, %c0_35] : memref<20x26x48xf32, #tpu.memory_space<vmem>>, vector<8x16x48xf32>
    %47 = vector.extract_strided_slice %8 {offsets = [3, 0], sizes = [1, 48], strides = [1, 1]} : vector<25x48xf32> to vector<1x48xf32>
    %48 = vector.shape_cast %47 : vector<1x48xf32> to vector<48xf32>
    %49 = vector.shape_cast %48 : vector<48xf32> to vector<1x1x48xf32>
    %50 = vector.broadcast %49 : vector<1x1x48xf32> to vector<8x16x48xf32>
    %51 = arith.mulf %46, %50 : vector<8x16x48xf32>
    %52 = arith.addf %45, %51 : vector<8x16x48xf32>
    %c0_36 = arith.constant 0 : index
    %c10 = arith.constant 10 : index
    %c0_37 = arith.constant 0 : index
    %53 = vector.load %arg8[%c0_36, %c10, %c0_37] : memref<20x26x48xf32, #tpu.memory_space<vmem>>, vector<8x16x48xf32>
    %54 = vector.extract_strided_slice %8 {offsets = [4, 0], sizes = [1, 48], strides = [1, 1]} : vector<25x48xf32> to vector<1x48xf32>
    %55 = vector.shape_cast %54 : vector<1x48xf32> to vector<48xf32>
    %56 = vector.shape_cast %55 : vector<48xf32> to vector<1x1x48xf32>
    %57 = vector.broadcast %56 : vector<1x1x48xf32> to vector<8x16x48xf32>
    %58 = arith.mulf %53, %57 : vector<8x16x48xf32>
    %59 = arith.addf %52, %58 : vector<8x16x48xf32>
    %c1 = arith.constant 1 : index
    %c6_38 = arith.constant 6 : index
    %c0_39 = arith.constant 0 : index
    %60 = vector.load %arg8[%c1, %c6_38, %c0_39] : memref<20x26x48xf32, #tpu.memory_space<vmem>>, vector<8x16x48xf32>
    %61 = vector.extract_strided_slice %8 {offsets = [5, 0], sizes = [1, 48], strides = [1, 1]} : vector<25x48xf32> to vector<1x48xf32>
    %62 = vector.shape_cast %61 : vector<1x48xf32> to vector<48xf32>
    %63 = vector.shape_cast %62 : vector<48xf32> to vector<1x1x48xf32>
    %64 = vector.broadcast %63 : vector<1x1x48xf32> to vector<8x16x48xf32>
    %65 = arith.mulf %60, %64 : vector<8x16x48xf32>
    %66 = arith.addf %59, %65 : vector<8x16x48xf32>
    %c1_40 = arith.constant 1 : index
    %c7_41 = arith.constant 7 : index
    %c0_42 = arith.constant 0 : index
    %67 = vector.load %arg8[%c1_40, %c7_41, %c0_42] : memref<20x26x48xf32, #tpu.memory_space<vmem>>, vector<8x16x48xf32>
    %68 = vector.extract_strided_slice %8 {offsets = [6, 0], sizes = [1, 48], strides = [1, 1]} : vector<25x48xf32> to vector<1x48xf32>
    %69 = vector.shape_cast %68 : vector<1x48xf32> to vector<48xf32>
    %70 = vector.shape_cast %69 : vector<48xf32> to vector<1x1x48xf32>
    %71 = vector.broadcast %70 : vector<1x1x48xf32> to vector<8x16x48xf32>
    %72 = arith.mulf %67, %71 : vector<8x16x48xf32>
    %73 = arith.addf %66, %72 : vector<8x16x48xf32>
    %c1_43 = arith.constant 1 : index
    %c8_44 = arith.constant 8 : index
    %c0_45 = arith.constant 0 : index
    %74 = vector.load %arg8[%c1_43, %c8_44, %c0_45] : memref<20x26x48xf32, #tpu.memory_space<vmem>>, vector<8x16x48xf32>
    %75 = vector.extract_strided_slice %8 {offsets = [7, 0], sizes = [1, 48], strides = [1, 1]} : vector<25x48xf32> to vector<1x48xf32>
    %76 = vector.shape_cast %75 : vector<1x48xf32> to vector<48xf32>
    %77 = vector.shape_cast %76 : vector<48xf32> to vector<1x1x48xf32>
    %78 = vector.broadcast %77 : vector<1x1x48xf32> to vector<8x16x48xf32>
    %79 = arith.mulf %74, %78 : vector<8x16x48xf32>
    %80 = arith.addf %73, %79 : vector<8x16x48xf32>
    %c1_46 = arith.constant 1 : index
    %c9_47 = arith.constant 9 : index
    %c0_48 = arith.constant 0 : index
    %81 = vector.load %arg8[%c1_46, %c9_47, %c0_48] : memref<20x26x48xf32, #tpu.memory_space<vmem>>, vector<8x16x48xf32>
    %82 = vector.extract_strided_slice %8 {offsets = [8, 0], sizes = [1, 48], strides = [1, 1]} : vector<25x48xf32> to vector<1x48xf32>
    %83 = vector.shape_cast %82 : vector<1x48xf32> to vector<48xf32>
    %84 = vector.shape_cast %83 : vector<48xf32> to vector<1x1x48xf32>
    %85 = vector.broadcast %84 : vector<1x1x48xf32> to vector<8x16x48xf32>
    %86 = arith.mulf %81, %85 : vector<8x16x48xf32>
    %87 = arith.addf %80, %86 : vector<8x16x48xf32>
    %c1_49 = arith.constant 1 : index
    %c10_50 = arith.constant 10 : index
    %c0_51 = arith.constant 0 : index
    %88 = vector.load %arg8[%c1_49, %c10_50, %c0_51] : memref<20x26x48xf32, #tpu.memory_space<vmem>>, vector<8x16x48xf32>
    %89 = vector.extract_strided_slice %8 {offsets = [9, 0], sizes = [1, 48], strides = [1, 1]} : vector<25x48xf32> to vector<1x48xf32>
    %90 = vector.shape_cast %89 : vector<1x48xf32> to vector<48xf32>
    %91 = vector.shape_cast %90 : vector<48xf32> to vector<1x1x48xf32>
    %92 = vector.broadcast %91 : vector<1x1x48xf32> to vector<8x16x48xf32>
    %93 = arith.mulf %88, %92 : vector<8x16x48xf32>
    %94 = arith.addf %87, %93 : vector<8x16x48xf32>
    %c2_52 = arith.constant 2 : index
    %c6_53 = arith.constant 6 : index
    %c0_54 = arith.constant 0 : index
    %95 = vector.load %arg8[%c2_52, %c6_53, %c0_54] : memref<20x26x48xf32, #tpu.memory_space<vmem>>, vector<8x16x48xf32>
    %96 = vector.extract_strided_slice %8 {offsets = [10, 0], sizes = [1, 48], strides = [1, 1]} : vector<25x48xf32> to vector<1x48xf32>
    %97 = vector.shape_cast %96 : vector<1x48xf32> to vector<48xf32>
    %98 = vector.shape_cast %97 : vector<48xf32> to vector<1x1x48xf32>
    %99 = vector.broadcast %98 : vector<1x1x48xf32> to vector<8x16x48xf32>
    %100 = arith.mulf %95, %99 : vector<8x16x48xf32>
    %101 = arith.addf %94, %100 : vector<8x16x48xf32>
    %c2_55 = arith.constant 2 : index
    %c7_56 = arith.constant 7 : index
    %c0_57 = arith.constant 0 : index
    %102 = vector.load %arg8[%c2_55, %c7_56, %c0_57] : memref<20x26x48xf32, #tpu.memory_space<vmem>>, vector<8x16x48xf32>
    %103 = vector.extract_strided_slice %8 {offsets = [11, 0], sizes = [1, 48], strides = [1, 1]} : vector<25x48xf32> to vector<1x48xf32>
    %104 = vector.shape_cast %103 : vector<1x48xf32> to vector<48xf32>
    %105 = vector.shape_cast %104 : vector<48xf32> to vector<1x1x48xf32>
    %106 = vector.broadcast %105 : vector<1x1x48xf32> to vector<8x16x48xf32>
    %107 = arith.mulf %102, %106 : vector<8x16x48xf32>
    %108 = arith.addf %101, %107 : vector<8x16x48xf32>
    %c2_58 = arith.constant 2 : index
    %c8_59 = arith.constant 8 : index
    %c0_60 = arith.constant 0 : index
    %109 = vector.load %arg8[%c2_58, %c8_59, %c0_60] : memref<20x26x48xf32, #tpu.memory_space<vmem>>, vector<8x16x48xf32>
    %110 = vector.extract_strided_slice %8 {offsets = [12, 0], sizes = [1, 48], strides = [1, 1]} : vector<25x48xf32> to vector<1x48xf32>
    %111 = vector.shape_cast %110 : vector<1x48xf32> to vector<48xf32>
    %112 = vector.shape_cast %111 : vector<48xf32> to vector<1x1x48xf32>
    %113 = vector.broadcast %112 : vector<1x1x48xf32> to vector<8x16x48xf32>
    %114 = arith.mulf %109, %113 : vector<8x16x48xf32>
    %115 = arith.addf %108, %114 : vector<8x16x48xf32>
    %c2_61 = arith.constant 2 : index
    %c9_62 = arith.constant 9 : index
    %c0_63 = arith.constant 0 : index
    %116 = vector.load %arg8[%c2_61, %c9_62, %c0_63] : memref<20x26x48xf32, #tpu.memory_space<vmem>>, vector<8x16x48xf32>
    %117 = vector.extract_strided_slice %8 {offsets = [13, 0], sizes = [1, 48], strides = [1, 1]} : vector<25x48xf32> to vector<1x48xf32>
    %118 = vector.shape_cast %117 : vector<1x48xf32> to vector<48xf32>
    %119 = vector.shape_cast %118 : vector<48xf32> to vector<1x1x48xf32>
    %120 = vector.broadcast %119 : vector<1x1x48xf32> to vector<8x16x48xf32>
    %121 = arith.mulf %116, %120 : vector<8x16x48xf32>
    %122 = arith.addf %115, %121 : vector<8x16x48xf32>
    %c2_64 = arith.constant 2 : index
    %c10_65 = arith.constant 10 : index
    %c0_66 = arith.constant 0 : index
    %123 = vector.load %arg8[%c2_64, %c10_65, %c0_66] : memref<20x26x48xf32, #tpu.memory_space<vmem>>, vector<8x16x48xf32>
    %124 = vector.extract_strided_slice %8 {offsets = [14, 0], sizes = [1, 48], strides = [1, 1]} : vector<25x48xf32> to vector<1x48xf32>
    %125 = vector.shape_cast %124 : vector<1x48xf32> to vector<48xf32>
    %126 = vector.shape_cast %125 : vector<48xf32> to vector<1x1x48xf32>
    %127 = vector.broadcast %126 : vector<1x1x48xf32> to vector<8x16x48xf32>
    %128 = arith.mulf %123, %127 : vector<8x16x48xf32>
    %129 = arith.addf %122, %128 : vector<8x16x48xf32>
    %c3 = arith.constant 3 : index
    %c6_67 = arith.constant 6 : index
    %c0_68 = arith.constant 0 : index
    %130 = vector.load %arg8[%c3, %c6_67, %c0_68] : memref<20x26x48xf32, #tpu.memory_space<vmem>>, vector<8x16x48xf32>
    %131 = vector.extract_strided_slice %8 {offsets = [15, 0], sizes = [1, 48], strides = [1, 1]} : vector<25x48xf32> to vector<1x48xf32>
    %132 = vector.shape_cast %131 : vector<1x48xf32> to vector<48xf32>
    %133 = vector.shape_cast %132 : vector<48xf32> to vector<1x1x48xf32>
    %134 = vector.broadcast %133 : vector<1x1x48xf32> to vector<8x16x48xf32>
    %135 = arith.mulf %130, %134 : vector<8x16x48xf32>
    %136 = arith.addf %129, %135 : vector<8x16x48xf32>
    %c3_69 = arith.constant 3 : index
    %c7_70 = arith.constant 7 : index
    %c0_71 = arith.constant 0 : index
    %137 = vector.load %arg8[%c3_69, %c7_70, %c0_71] : memref<20x26x48xf32, #tpu.memory_space<vmem>>, vector<8x16x48xf32>
    %138 = vector.extract_strided_slice %8 {offsets = [16, 0], sizes = [1, 48], strides = [1, 1]} : vector<25x48xf32> to vector<1x48xf32>
    %139 = vector.shape_cast %138 : vector<1x48xf32> to vector<48xf32>
    %140 = vector.shape_cast %139 : vector<48xf32> to vector<1x1x48xf32>
    %141 = vector.broadcast %140 : vector<1x1x48xf32> to vector<8x16x48xf32>
    %142 = arith.mulf %137, %141 : vector<8x16x48xf32>
    %143 = arith.addf %136, %142 : vector<8x16x48xf32>
    %c3_72 = arith.constant 3 : index
    %c8_73 = arith.constant 8 : index
    %c0_74 = arith.constant 0 : index
    %144 = vector.load %arg8[%c3_72, %c8_73, %c0_74] : memref<20x26x48xf32, #tpu.memory_space<vmem>>, vector<8x16x48xf32>
    %145 = vector.extract_strided_slice %8 {offsets = [17, 0], sizes = [1, 48], strides = [1, 1]} : vector<25x48xf32> to vector<1x48xf32>
    %146 = vector.shape_cast %145 : vector<1x48xf32> to vector<48xf32>
    %147 = vector.shape_cast %146 : vector<48xf32> to vector<1x1x48xf32>
    %148 = vector.broadcast %147 : vector<1x1x48xf32> to vector<8x16x48xf32>
    %149 = arith.mulf %144, %148 : vector<8x16x48xf32>
    %150 = arith.addf %143, %149 : vector<8x16x48xf32>
    %c3_75 = arith.constant 3 : index
    %c9_76 = arith.constant 9 : index
    %c0_77 = arith.constant 0 : index
    %151 = vector.load %arg8[%c3_75, %c9_76, %c0_77] : memref<20x26x48xf32, #tpu.memory_space<vmem>>, vector<8x16x48xf32>
    %152 = vector.extract_strided_slice %8 {offsets = [18, 0], sizes = [1, 48], strides = [1, 1]} : vector<25x48xf32> to vector<1x48xf32>
    %153 = vector.shape_cast %152 : vector<1x48xf32> to vector<48xf32>
    %154 = vector.shape_cast %153 : vector<48xf32> to vector<1x1x48xf32>
    %155 = vector.broadcast %154 : vector<1x1x48xf32> to vector<8x16x48xf32>
    %156 = arith.mulf %151, %155 : vector<8x16x48xf32>
    %157 = arith.addf %150, %156 : vector<8x16x48xf32>
    %c3_78 = arith.constant 3 : index
    %c10_79 = arith.constant 10 : index
    %c0_80 = arith.constant 0 : index
    %158 = vector.load %arg8[%c3_78, %c10_79, %c0_80] : memref<20x26x48xf32, #tpu.memory_space<vmem>>, vector<8x16x48xf32>
    %159 = vector.extract_strided_slice %8 {offsets = [19, 0], sizes = [1, 48], strides = [1, 1]} : vector<25x48xf32> to vector<1x48xf32>
    %160 = vector.shape_cast %159 : vector<1x48xf32> to vector<48xf32>
    %161 = vector.shape_cast %160 : vector<48xf32> to vector<1x1x48xf32>
    %162 = vector.broadcast %161 : vector<1x1x48xf32> to vector<8x16x48xf32>
    %163 = arith.mulf %158, %162 : vector<8x16x48xf32>
    %164 = arith.addf %157, %163 : vector<8x16x48xf32>
    %c4 = arith.constant 4 : index
    %c6_81 = arith.constant 6 : index
    %c0_82 = arith.constant 0 : index
    %165 = vector.load %arg8[%c4, %c6_81, %c0_82] : memref<20x26x48xf32, #tpu.memory_space<vmem>>, vector<8x16x48xf32>
    %166 = vector.extract_strided_slice %8 {offsets = [20, 0], sizes = [1, 48], strides = [1, 1]} : vector<25x48xf32> to vector<1x48xf32>
    %167 = vector.shape_cast %166 : vector<1x48xf32> to vector<48xf32>
    %168 = vector.shape_cast %167 : vector<48xf32> to vector<1x1x48xf32>
    %169 = vector.broadcast %168 : vector<1x1x48xf32> to vector<8x16x48xf32>
    %170 = arith.mulf %165, %169 : vector<8x16x48xf32>
    %171 = arith.addf %164, %170 : vector<8x16x48xf32>
    %c4_83 = arith.constant 4 : index
    %c7_84 = arith.constant 7 : index
    %c0_85 = arith.constant 0 : index
    %172 = vector.load %arg8[%c4_83, %c7_84, %c0_85] : memref<20x26x48xf32, #tpu.memory_space<vmem>>, vector<8x16x48xf32>
    %173 = vector.extract_strided_slice %8 {offsets = [21, 0], sizes = [1, 48], strides = [1, 1]} : vector<25x48xf32> to vector<1x48xf32>
    %174 = vector.shape_cast %173 : vector<1x48xf32> to vector<48xf32>
    %175 = vector.shape_cast %174 : vector<48xf32> to vector<1x1x48xf32>
    %176 = vector.broadcast %175 : vector<1x1x48xf32> to vector<8x16x48xf32>
    %177 = arith.mulf %172, %176 : vector<8x16x48xf32>
    %178 = arith.addf %171, %177 : vector<8x16x48xf32>
    %c4_86 = arith.constant 4 : index
    %c8_87 = arith.constant 8 : index
    %c0_88 = arith.constant 0 : index
    %179 = vector.load %arg8[%c4_86, %c8_87, %c0_88] : memref<20x26x48xf32, #tpu.memory_space<vmem>>, vector<8x16x48xf32>
    %180 = vector.extract_strided_slice %8 {offsets = [22, 0], sizes = [1, 48], strides = [1, 1]} : vector<25x48xf32> to vector<1x48xf32>
    %181 = vector.shape_cast %180 : vector<1x48xf32> to vector<48xf32>
    %182 = vector.shape_cast %181 : vector<48xf32> to vector<1x1x48xf32>
    %183 = vector.broadcast %182 : vector<1x1x48xf32> to vector<8x16x48xf32>
    %184 = arith.mulf %179, %183 : vector<8x16x48xf32>
    %185 = arith.addf %178, %184 : vector<8x16x48xf32>
    %c4_89 = arith.constant 4 : index
    %c9_90 = arith.constant 9 : index
    %c0_91 = arith.constant 0 : index
    %186 = vector.load %arg8[%c4_89, %c9_90, %c0_91] : memref<20x26x48xf32, #tpu.memory_space<vmem>>, vector<8x16x48xf32>
    %187 = vector.extract_strided_slice %8 {offsets = [23, 0], sizes = [1, 48], strides = [1, 1]} : vector<25x48xf32> to vector<1x48xf32>
    %188 = vector.shape_cast %187 : vector<1x48xf32> to vector<48xf32>
    %189 = vector.shape_cast %188 : vector<48xf32> to vector<1x1x48xf32>
    %190 = vector.broadcast %189 : vector<1x1x48xf32> to vector<8x16x48xf32>
    %191 = arith.mulf %186, %190 : vector<8x16x48xf32>
    %192 = arith.addf %185, %191 : vector<8x16x48xf32>
    %c4_92 = arith.constant 4 : index
    %c10_93 = arith.constant 10 : index
    %c0_94 = arith.constant 0 : index
    %193 = vector.load %arg8[%c4_92, %c10_93, %c0_94] : memref<20x26x48xf32, #tpu.memory_space<vmem>>, vector<8x16x48xf32>
    %194 = vector.extract_strided_slice %8 {offsets = [24, 0], sizes = [1, 48], strides = [1, 1]} : vector<25x48xf32> to vector<1x48xf32>
    %195 = vector.shape_cast %194 : vector<1x48xf32> to vector<48xf32>
    %196 = vector.shape_cast %195 : vector<48xf32> to vector<1x1x48xf32>
    %197 = vector.broadcast %196 : vector<1x1x48xf32> to vector<8x16x48xf32>
    %198 = arith.mulf %193, %197 : vector<8x16x48xf32>
    %199 = arith.addf %192, %198 : vector<8x16x48xf32>
    %200 = vector.broadcast %10 : vector<1x1x48xf32> to vector<8x16x48xf32>
    %201 = arith.addf %199, %200 : vector<8x16x48xf32>
    %cst_95 = arith.constant 0.000000e+00 : f32
    %202 = vector.broadcast %cst_95 : f32 to vector<8x16x48xf32>
    %203 = arith.maximumf %201, %202 : vector<8x16x48xf32>
    %204 = vector.shape_cast %203 : vector<8x16x48xf32> to vector<128x48xf32>
    %205 = arith.truncf %204 : vector<128x48xf32> to vector<128x48xbf16>
    %c0_96 = arith.constant 0 : index
    %c0_97 = arith.constant 0 : index
    %206 = vector.load %arg9[%c0_96, %c0_97] : memref<256x48xbf16, #tpu.memory_space<vmem>>, vector<128x48xbf16>
    tpu.vector_store %arg9[%c0_96, %c0_97], %205 {strides = array<i32>} : memref<256x48xbf16, #tpu.memory_space<vmem>>, vector<128x48xbf16>,
    %cst_98 = arith.constant 0.000000e+00 : f32
    %207 = vector.broadcast %cst_98 : f32 to vector<8x16x48xf32>
    %c8_99 = arith.constant 8 : index
    %c6_100 = arith.constant 6 : index
    %c0_101 = arith.constant 0 : index
    %208 = vector.load %arg8[%c8_99, %c6_100, %c0_101] : memref<20x26x48xf32, #tpu.memory_space<vmem>>, vector<8x16x48xf32>
    %209 = vector.extract_strided_slice %8 {offsets = [0, 0], sizes = [1, 48], strides = [1, 1]} : vector<25x48xf32> to vector<1x48xf32>
    %210 = vector.shape_cast %209 : vector<1x48xf32> to vector<48xf32>
    %211 = vector.shape_cast %210 : vector<48xf32> to vector<1x1x48xf32>
    %212 = vector.broadcast %211 : vector<1x1x48xf32> to vector<8x16x48xf32>
    %213 = arith.mulf %208, %212 : vector<8x16x48xf32>
    %214 = arith.addf %207, %213 : vector<8x16x48xf32>
    %c8_102 = arith.constant 8 : index
    %c7_103 = arith.constant 7 : index
    %c0_104 = arith.constant 0 : index
    %215 = vector.load %arg8[%c8_102, %c7_103, %c0_104] : memref<20x26x48xf32, #tpu.memory_space<vmem>>, vector<8x16x48xf32>
    %216 = vector.extract_strided_slice %8 {offsets = [1, 0], sizes = [1, 48], strides = [1, 1]} : vector<25x48xf32> to vector<1x48xf32>
    %217 = vector.shape_cast %216 : vector<1x48xf32> to vector<48xf32>
    %218 = vector.shape_cast %217 : vector<48xf32> to vector<1x1x48xf32>
    %219 = vector.broadcast %218 : vector<1x1x48xf32> to vector<8x16x48xf32>
    %220 = arith.mulf %215, %219 : vector<8x16x48xf32>
    %221 = arith.addf %214, %220 : vector<8x16x48xf32>
    %c8_105 = arith.constant 8 : index
    %c8_106 = arith.constant 8 : index
    %c0_107 = arith.constant 0 : index
    %222 = vector.load %arg8[%c8_105, %c8_106, %c0_107] : memref<20x26x48xf32, #tpu.memory_space<vmem>>, vector<8x16x48xf32>
    %223 = vector.extract_strided_slice %8 {offsets = [2, 0], sizes = [1, 48], strides = [1, 1]} : vector<25x48xf32> to vector<1x48xf32>
    %224 = vector.shape_cast %223 : vector<1x48xf32> to vector<48xf32>
    %225 = vector.shape_cast %224 : vector<48xf32> to vector<1x1x48xf32>
    %226 = vector.broadcast %225 : vector<1x1x48xf32> to vector<8x16x48xf32>
    %227 = arith.mulf %222, %226 : vector<8x16x48xf32>
    %228 = arith.addf %221, %227 : vector<8x16x48xf32>
    %c8_108 = arith.constant 8 : index
    %c9_109 = arith.constant 9 : index
    %c0_110 = arith.constant 0 : index
    %229 = vector.load %arg8[%c8_108, %c9_109, %c0_110] : memref<20x26x48xf32, #tpu.memory_space<vmem>>, vector<8x16x48xf32>
    %230 = vector.extract_strided_slice %8 {offsets = [3, 0], sizes = [1, 48], strides = [1, 1]} : vector<25x48xf32> to vector<1x48xf32>
    %231 = vector.shape_cast %230 : vector<1x48xf32> to vector<48xf32>
    %232 = vector.shape_cast %231 : vector<48xf32> to vector<1x1x48xf32>
    %233 = vector.broadcast %232 : vector<1x1x48xf32> to vector<8x16x48xf32>
    %234 = arith.mulf %229, %233 : vector<8x16x48xf32>
    %235 = arith.addf %228, %234 : vector<8x16x48xf32>
    %c8_111 = arith.constant 8 : index
    %c10_112 = arith.constant 10 : index
    %c0_113 = arith.constant 0 : index
    %236 = vector.load %arg8[%c8_111, %c10_112, %c0_113] : memref<20x26x48xf32, #tpu.memory_space<vmem>>, vector<8x16x48xf32>
    %237 = vector.extract_strided_slice %8 {offsets = [4, 0], sizes = [1, 48], strides = [1, 1]} : vector<25x48xf32> to vector<1x48xf32>
    %238 = vector.shape_cast %237 : vector<1x48xf32> to vector<48xf32>
    %239 = vector.shape_cast %238 : vector<48xf32> to vector<1x1x48xf32>
    %240 = vector.broadcast %239 : vector<1x1x48xf32> to vector<8x16x48xf32>
    %241 = arith.mulf %236, %240 : vector<8x16x48xf32>
    %242 = arith.addf %235, %241 : vector<8x16x48xf32>
    %c9_114 = arith.constant 9 : index
    %c6_115 = arith.constant 6 : index
    %c0_116 = arith.constant 0 : index
    %243 = vector.load %arg8[%c9_114, %c6_115, %c0_116] : memref<20x26x48xf32, #tpu.memory_space<vmem>>, vector<8x16x48xf32>
    %244 = vector.extract_strided_slice %8 {offsets = [5, 0], sizes = [1, 48], strides = [1, 1]} : vector<25x48xf32> to vector<1x48xf32>
    %245 = vector.shape_cast %244 : vector<1x48xf32> to vector<48xf32>
    %246 = vector.shape_cast %245 : vector<48xf32> to vector<1x1x48xf32>
    %247 = vector.broadcast %246 : vector<1x1x48xf32> to vector<8x16x48xf32>
    %248 = arith.mulf %243, %247 : vector<8x16x48xf32>
    %249 = arith.addf %242, %248 : vector<8x16x48xf32>
    %c9_117 = arith.constant 9 : index
    %c7_118 = arith.constant 7 : index
    %c0_119 = arith.constant 0 : index
    %250 = vector.load %arg8[%c9_117, %c7_118, %c0_119] : memref<20x26x48xf32, #tpu.memory_space<vmem>>, vector<8x16x48xf32>
    %251 = vector.extract_strided_slice %8 {offsets = [6, 0], sizes = [1, 48], strides = [1, 1]} : vector<25x48xf32> to vector<1x48xf32>
    %252 = vector.shape_cast %251 : vector<1x48xf32> to vector<48xf32>
    %253 = vector.shape_cast %252 : vector<48xf32> to vector<1x1x48xf32>
    %254 = vector.broadcast %253 : vector<1x1x48xf32> to vector<8x16x48xf32>
    %255 = arith.mulf %250, %254 : vector<8x16x48xf32>
    %256 = arith.addf %249, %255 : vector<8x16x48xf32>
    %c9_120 = arith.constant 9 : index
    %c8_121 = arith.constant 8 : index
    %c0_122 = arith.constant 0 : index
    %257 = vector.load %arg8[%c9_120, %c8_121, %c0_122] : memref<20x26x48xf32, #tpu.memory_space<vmem>>, vector<8x16x48xf32>
    %258 = vector.extract_strided_slice %8 {offsets = [7, 0], sizes = [1, 48], strides = [1, 1]} : vector<25x48xf32> to vector<1x48xf32>
    %259 = vector.shape_cast %258 : vector<1x48xf32> to vector<48xf32>
    %260 = vector.shape_cast %259 : vector<48xf32> to vector<1x1x48xf32>
    %261 = vector.broadcast %260 : vector<1x1x48xf32> to vector<8x16x48xf32>
    %262 = arith.mulf %257, %261 : vector<8x16x48xf32>
    %263 = arith.addf %256, %262 : vector<8x16x48xf32>
    %c9_123 = arith.constant 9 : index
    %c9_124 = arith.constant 9 : index
    %c0_125 = arith.constant 0 : index
    %264 = vector.load %arg8[%c9_123, %c9_124, %c0_125] : memref<20x26x48xf32, #tpu.memory_space<vmem>>, vector<8x16x48xf32>
    %265 = vector.extract_strided_slice %8 {offsets = [8, 0], sizes = [1, 48], strides = [1, 1]} : vector<25x48xf32> to vector<1x48xf32>
    %266 = vector.shape_cast %265 : vector<1x48xf32> to vector<48xf32>
    %267 = vector.shape_cast %266 : vector<48xf32> to vector<1x1x48xf32>
    %268 = vector.broadcast %267 : vector<1x1x48xf32> to vector<8x16x48xf32>
    %269 = arith.mulf %264, %268 : vector<8x16x48xf32>
    %270 = arith.addf %263, %269 : vector<8x16x48xf32>
    %c9_126 = arith.constant 9 : index
    %c10_127 = arith.constant 10 : index
    %c0_128 = arith.constant 0 : index
    %271 = vector.load %arg8[%c9_126, %c10_127, %c0_128] : memref<20x26x48xf32, #tpu.memory_space<vmem>>, vector<8x16x48xf32>
    %272 = vector.extract_strided_slice %8 {offsets = [9, 0], sizes = [1, 48], strides = [1, 1]} : vector<25x48xf32> to vector<1x48xf32>
    %273 = vector.shape_cast %272 : vector<1x48xf32> to vector<48xf32>
    %274 = vector.shape_cast %273 : vector<48xf32> to vector<1x1x48xf32>
    %275 = vector.broadcast %274 : vector<1x1x48xf32> to vector<8x16x48xf32>
    %276 = arith.mulf %271, %275 : vector<8x16x48xf32>
    %277 = arith.addf %270, %276 : vector<8x16x48xf32>
    %c10_129 = arith.constant 10 : index
    %c6_130 = arith.constant 6 : index
    %c0_131 = arith.constant 0 : index
    %278 = vector.load %arg8[%c10_129, %c6_130, %c0_131] : memref<20x26x48xf32, #tpu.memory_space<vmem>>, vector<8x16x48xf32>
    %279 = vector.extract_strided_slice %8 {offsets = [10, 0], sizes = [1, 48], strides = [1, 1]} : vector<25x48xf32> to vector<1x48xf32>
    %280 = vector.shape_cast %279 : vector<1x48xf32> to vector<48xf32>
    %281 = vector.shape_cast %280 : vector<48xf32> to vector<1x1x48xf32>
    %282 = vector.broadcast %281 : vector<1x1x48xf32> to vector<8x16x48xf32>
    %283 = arith.mulf %278, %282 : vector<8x16x48xf32>
    %284 = arith.addf %277, %283 : vector<8x16x48xf32>
    %c10_132 = arith.constant 10 : index
    %c7_133 = arith.constant 7 : index
    %c0_134 = arith.constant 0 : index
    %285 = vector.load %arg8[%c10_132, %c7_133, %c0_134] : memref<20x26x48xf32, #tpu.memory_space<vmem>>, vector<8x16x48xf32>
    %286 = vector.extract_strided_slice %8 {offsets = [11, 0], sizes = [1, 48], strides = [1, 1]} : vector<25x48xf32> to vector<1x48xf32>
    %287 = vector.shape_cast %286 : vector<1x48xf32> to vector<48xf32>
    %288 = vector.shape_cast %287 : vector<48xf32> to vector<1x1x48xf32>
    %289 = vector.broadcast %288 : vector<1x1x48xf32> to vector<8x16x48xf32>
    %290 = arith.mulf %285, %289 : vector<8x16x48xf32>
    %291 = arith.addf %284, %290 : vector<8x16x48xf32>
    %c10_135 = arith.constant 10 : index
    %c8_136 = arith.constant 8 : index
    %c0_137 = arith.constant 0 : index
    %292 = vector.load %arg8[%c10_135, %c8_136, %c0_137] : memref<20x26x48xf32, #tpu.memory_space<vmem>>, vector<8x16x48xf32>
    %293 = vector.extract_strided_slice %8 {offsets = [12, 0], sizes = [1, 48], strides = [1, 1]} : vector<25x48xf32> to vector<1x48xf32>
    %294 = vector.shape_cast %293 : vector<1x48xf32> to vector<48xf32>
    %295 = vector.shape_cast %294 : vector<48xf32> to vector<1x1x48xf32>
    %296 = vector.broadcast %295 : vector<1x1x48xf32> to vector<8x16x48xf32>
    %297 = arith.mulf %292, %296 : vector<8x16x48xf32>
    %298 = arith.addf %291, %297 : vector<8x16x48xf32>
    %c10_138 = arith.constant 10 : index
    %c9_139 = arith.constant 9 : index
    %c0_140 = arith.constant 0 : index
    %299 = vector.load %arg8[%c10_138, %c9_139, %c0_140] : memref<20x26x48xf32, #tpu.memory_space<vmem>>, vector<8x16x48xf32>
    %300 = vector.extract_strided_slice %8 {offsets = [13, 0], sizes = [1, 48], strides = [1, 1]} : vector<25x48xf32> to vector<1x48xf32>
    %301 = vector.shape_cast %300 : vector<1x48xf32> to vector<48xf32>
    %302 = vector.shape_cast %301 : vector<48xf32> to vector<1x1x48xf32>
    %303 = vector.broadcast %302 : vector<1x1x48xf32> to vector<8x16x48xf32>
    %304 = arith.mulf %299, %303 : vector<8x16x48xf32>
    %305 = arith.addf %298, %304 : vector<8x16x48xf32>
    %c10_141 = arith.constant 10 : index
    %c10_142 = arith.constant 10 : index
    %c0_143 = arith.constant 0 : index
    %306 = vector.load %arg8[%c10_141, %c10_142, %c0_143] : memref<20x26x48xf32, #tpu.memory_space<vmem>>, vector<8x16x48xf32>
    %307 = vector.extract_strided_slice %8 {offsets = [14, 0], sizes = [1, 48], strides = [1, 1]} : vector<25x48xf32> to vector<1x48xf32>
    %308 = vector.shape_cast %307 : vector<1x48xf32> to vector<48xf32>
    %309 = vector.shape_cast %308 : vector<48xf32> to vector<1x1x48xf32>
    %310 = vector.broadcast %309 : vector<1x1x48xf32> to vector<8x16x48xf32>
    %311 = arith.mulf %306, %310 : vector<8x16x48xf32>
    %312 = arith.addf %305, %311 : vector<8x16x48xf32>
    %c11 = arith.constant 11 : index
    %c6_144 = arith.constant 6 : index
    %c0_145 = arith.constant 0 : index
    %313 = vector.load %arg8[%c11, %c6_144, %c0_145] : memref<20x26x48xf32, #tpu.memory_space<vmem>>, vector<8x16x48xf32>
    %314 = vector.extract_strided_slice %8 {offsets = [15, 0], sizes = [1, 48], strides = [1, 1]} : vector<25x48xf32> to vector<1x48xf32>
    %315 = vector.shape_cast %314 : vector<1x48xf32> to vector<48xf32>
    %316 = vector.shape_cast %315 : vector<48xf32> to vector<1x1x48xf32>
    %317 = vector.broadcast %316 : vector<1x1x48xf32> to vector<8x16x48xf32>
    %318 = arith.mulf %313, %317 : vector<8x16x48xf32>
    %319 = arith.addf %312, %318 : vector<8x16x48xf32>
    %c11_146 = arith.constant 11 : index
    %c7_147 = arith.constant 7 : index
    %c0_148 = arith.constant 0 : index
    %320 = vector.load %arg8[%c11_146, %c7_147, %c0_148] : memref<20x26x48xf32, #tpu.memory_space<vmem>>, vector<8x16x48xf32>
    %321 = vector.extract_strided_slice %8 {offsets = [16, 0], sizes = [1, 48], strides = [1, 1]} : vector<25x48xf32> to vector<1x48xf32>
    %322 = vector.shape_cast %321 : vector<1x48xf32> to vector<48xf32>
    %323 = vector.shape_cast %322 : vector<48xf32> to vector<1x1x48xf32>
    %324 = vector.broadcast %323 : vector<1x1x48xf32> to vector<8x16x48xf32>
    %325 = arith.mulf %320, %324 : vector<8x16x48xf32>
    %326 = arith.addf %319, %325 : vector<8x16x48xf32>
    %c11_149 = arith.constant 11 : index
    %c8_150 = arith.constant 8 : index
    %c0_151 = arith.constant 0 : index
    %327 = vector.load %arg8[%c11_149, %c8_150, %c0_151] : memref<20x26x48xf32, #tpu.memory_space<vmem>>, vector<8x16x48xf32>
    %328 = vector.extract_strided_slice %8 {offsets = [17, 0], sizes = [1, 48], strides = [1, 1]} : vector<25x48xf32> to vector<1x48xf32>
    %329 = vector.shape_cast %328 : vector<1x48xf32> to vector<48xf32>
    %330 = vector.shape_cast %329 : vector<48xf32> to vector<1x1x48xf32>
    %331 = vector.broadcast %330 : vector<1x1x48xf32> to vector<8x16x48xf32>
    %332 = arith.mulf %327, %331 : vector<8x16x48xf32>
    %333 = arith.addf %326, %332 : vector<8x16x48xf32>
    %c11_152 = arith.constant 11 : index
    %c9_153 = arith.constant 9 : index
    %c0_154 = arith.constant 0 : index
    %334 = vector.load %arg8[%c11_152, %c9_153, %c0_154] : memref<20x26x48xf32, #tpu.memory_space<vmem>>, vector<8x16x48xf32>
    %335 = vector.extract_strided_slice %8 {offsets = [18, 0], sizes = [1, 48], strides = [1, 1]} : vector<25x48xf32> to vector<1x48xf32>
    %336 = vector.shape_cast %335 : vector<1x48xf32> to vector<48xf32>
    %337 = vector.shape_cast %336 : vector<48xf32> to vector<1x1x48xf32>
    %338 = vector.broadcast %337 : vector<1x1x48xf32> to vector<8x16x48xf32>
    %339 = arith.mulf %334, %338 : vector<8x16x48xf32>
    %340 = arith.addf %333, %339 : vector<8x16x48xf32>
    %c11_155 = arith.constant 11 : index
    %c10_156 = arith.constant 10 : index
    %c0_157 = arith.constant 0 : index
    %341 = vector.load %arg8[%c11_155, %c10_156, %c0_157] : memref<20x26x48xf32, #tpu.memory_space<vmem>>, vector<8x16x48xf32>
    %342 = vector.extract_strided_slice %8 {offsets = [19, 0], sizes = [1, 48], strides = [1, 1]} : vector<25x48xf32> to vector<1x48xf32>
    %343 = vector.shape_cast %342 : vector<1x48xf32> to vector<48xf32>
    %344 = vector.shape_cast %343 : vector<48xf32> to vector<1x1x48xf32>
    %345 = vector.broadcast %344 : vector<1x1x48xf32> to vector<8x16x48xf32>
    %346 = arith.mulf %341, %345 : vector<8x16x48xf32>
    %347 = arith.addf %340, %346 : vector<8x16x48xf32>
    %c12 = arith.constant 12 : index
    %c6_158 = arith.constant 6 : index
    %c0_159 = arith.constant 0 : index
    %348 = vector.load %arg8[%c12, %c6_158, %c0_159] : memref<20x26x48xf32, #tpu.memory_space<vmem>>, vector<8x16x48xf32>
    %349 = vector.extract_strided_slice %8 {offsets = [20, 0], sizes = [1, 48], strides = [1, 1]} : vector<25x48xf32> to vector<1x48xf32>
    %350 = vector.shape_cast %349 : vector<1x48xf32> to vector<48xf32>
    %351 = vector.shape_cast %350 : vector<48xf32> to vector<1x1x48xf32>
    %352 = vector.broadcast %351 : vector<1x1x48xf32> to vector<8x16x48xf32>
    %353 = arith.mulf %348, %352 : vector<8x16x48xf32>
    %354 = arith.addf %347, %353 : vector<8x16x48xf32>
    %c12_160 = arith.constant 12 : index
    %c7_161 = arith.constant 7 : index
    %c0_162 = arith.constant 0 : index
    %355 = vector.load %arg8[%c12_160, %c7_161, %c0_162] : memref<20x26x48xf32, #tpu.memory_space<vmem>>, vector<8x16x48xf32>
    %356 = vector.extract_strided_slice %8 {offsets = [21, 0], sizes = [1, 48], strides = [1, 1]} : vector<25x48xf32> to vector<1x48xf32>
    %357 = vector.shape_cast %356 : vector<1x48xf32> to vector<48xf32>
    %358 = vector.shape_cast %357 : vector<48xf32> to vector<1x1x48xf32>
    %359 = vector.broadcast %358 : vector<1x1x48xf32> to vector<8x16x48xf32>
    %360 = arith.mulf %355, %359 : vector<8x16x48xf32>
    %361 = arith.addf %354, %360 : vector<8x16x48xf32>
    %c12_163 = arith.constant 12 : index
    %c8_164 = arith.constant 8 : index
    %c0_165 = arith.constant 0 : index
    %362 = vector.load %arg8[%c12_163, %c8_164, %c0_165] : memref<20x26x48xf32, #tpu.memory_space<vmem>>, vector<8x16x48xf32>
    %363 = vector.extract_strided_slice %8 {offsets = [22, 0], sizes = [1, 48], strides = [1, 1]} : vector<25x48xf32> to vector<1x48xf32>
    %364 = vector.shape_cast %363 : vector<1x48xf32> to vector<48xf32>
    %365 = vector.shape_cast %364 : vector<48xf32> to vector<1x1x48xf32>
    %366 = vector.broadcast %365 : vector<1x1x48xf32> to vector<8x16x48xf32>
    %367 = arith.mulf %362, %366 : vector<8x16x48xf32>
    %368 = arith.addf %361, %367 : vector<8x16x48xf32>
    %c12_166 = arith.constant 12 : index
    %c9_167 = arith.constant 9 : index
    %c0_168 = arith.constant 0 : index
    %369 = vector.load %arg8[%c12_166, %c9_167, %c0_168] : memref<20x26x48xf32, #tpu.memory_space<vmem>>, vector<8x16x48xf32>
    %370 = vector.extract_strided_slice %8 {offsets = [23, 0], sizes = [1, 48], strides = [1, 1]} : vector<25x48xf32> to vector<1x48xf32>
    %371 = vector.shape_cast %370 : vector<1x48xf32> to vector<48xf32>
    %372 = vector.shape_cast %371 : vector<48xf32> to vector<1x1x48xf32>
    %373 = vector.broadcast %372 : vector<1x1x48xf32> to vector<8x16x48xf32>
    %374 = arith.mulf %369, %373 : vector<8x16x48xf32>
    %375 = arith.addf %368, %374 : vector<8x16x48xf32>
    %c12_169 = arith.constant 12 : index
    %c10_170 = arith.constant 10 : index
    %c0_171 = arith.constant 0 : index
    %376 = vector.load %arg8[%c12_169, %c10_170, %c0_171] : memref<20x26x48xf32, #tpu.memory_space<vmem>>, vector<8x16x48xf32>
    %377 = vector.extract_strided_slice %8 {offsets = [24, 0], sizes = [1, 48], strides = [1, 1]} : vector<25x48xf32> to vector<1x48xf32>
    %378 = vector.shape_cast %377 : vector<1x48xf32> to vector<48xf32>
    %379 = vector.shape_cast %378 : vector<48xf32> to vector<1x1x48xf32>
    %380 = vector.broadcast %379 : vector<1x1x48xf32> to vector<8x16x48xf32>
    %381 = arith.mulf %376, %380 : vector<8x16x48xf32>
    %382 = arith.addf %375, %381 : vector<8x16x48xf32>
    %383 = vector.broadcast %10 : vector<1x1x48xf32> to vector<8x16x48xf32>
    %384 = arith.addf %382, %383 : vector<8x16x48xf32>
    %cst_172 = arith.constant 0.000000e+00 : f32
    %385 = vector.broadcast %cst_172 : f32 to vector<8x16x48xf32>
    %386 = arith.maximumf %384, %385 : vector<8x16x48xf32>
    %387 = vector.shape_cast %386 : vector<8x16x48xf32> to vector<128x48xf32>
    %388 = arith.truncf %387 : vector<128x48xf32> to vector<128x48xbf16>
    %c128 = arith.constant 128 : index
    %c0_173 = arith.constant 0 : index
    %389 = vector.load %arg9[%c128, %c0_173] : memref<256x48xbf16, #tpu.memory_space<vmem>>, vector<128x48xbf16>
    tpu.vector_store %arg9[%c128, %c0_173], %388 {strides = array<i32>} : memref<256x48xbf16, #tpu.memory_space<vmem>>, vector<128x48xbf16>,
    %c0_174 = arith.constant 0 : index
    %c0_175 = arith.constant 0 : index
    %390 = vector.load %arg6[%c0_174, %c0_175] : memref<12x48xbf16, #tpu.memory_space<vmem>>, vector<12x48xbf16>
    %c0_176 = arith.constant 0 : index
    %c0_177 = arith.constant 0 : index
    %391 = vector.load %arg9[%c0_176, %c0_177] : memref<256x48xbf16, #tpu.memory_space<vmem>>, vector<256x48xbf16>
    %cst_178 = arith.constant dense<0.000000e+00> : vector<12x256xf32>
    %392 = tpu.matmul %390, %391, %cst_178 {dimension_numbers = #tpu.dot_dimension_numbers<[1], [1], [0], [0], [0, 0, 1, 0], [], []>} : vector<12x48xbf16>, vector<256x48xbf16>, vector<12x256xf32> -> vector<12x256xf32>
    %393 = vector.extract_strided_slice %392 {offsets = [0, 0], sizes = [1, 256], strides = [1, 1]} : vector<12x256xf32> to vector<1x256xf32>
    %394 = arith.negf %393 : vector<1x256xf32>
    %395 = math.exp %394 : vector<1x256xf32>
    %cst_179 = arith.constant 1.000000e+00 : f32
    %396 = vector.broadcast %cst_179 : f32 to vector<1x256xf32>
    %397 = arith.addf %396, %395 : vector<1x256xf32>
    %398 = arith.divf %396, %397 : vector<1x256xf32>
    %399 = vector.extract_strided_slice %392 {offsets = [1, 0], sizes = [8, 256], strides = [1, 1]} : vector<12x256xf32> to vector<8x256xf32>
    %400 = vector.extract_strided_slice %392 {offsets = [9, 0], sizes = [3, 256], strides = [1, 1]} : vector<12x256xf32> to vector<3x256xf32>
    %cst_180 = arith.constant dense<0xFF800000> : vector<256xf32>
    %401 = vector.multi_reduction <maximumf>, %400, %cst_180 [0] : vector<3x256xf32> to vector<256xf32>
    %402 = vector.shape_cast %401 : vector<256xf32> to vector<1x256xf32>
    %403 = vector.broadcast %402 : vector<1x256xf32> to vector<3x256xf32>
    %404 = arith.subf %400, %403 : vector<3x256xf32>
    %405 = math.exp %404 : vector<3x256xf32>
    %cst_181 = arith.constant dense<0.000000e+00> : vector<256xf32>
    %406 = vector.multi_reduction <add>, %405, %cst_181 [0] : vector<3x256xf32> to vector<256xf32>
    %407 = vector.shape_cast %406 : vector<256xf32> to vector<1x256xf32>
    %408 = tpu.reciprocal %407 : vector<1x256xf32> -> vector<1x256xf32>
    %409 = vector.broadcast %408 : vector<1x256xf32> to vector<3x256xf32>
    %410 = arith.mulf %405, %409 : vector<3x256xf32>
    %411 = tpu.concatenate %398, %399, %410 in 0 : vector<1x256xf32>, vector<8x256xf32>, vector<3x256xf32> -> vector<12x256xf32>
    %c0_182 = arith.constant 0 : index
    %c0_183 = arith.constant 0 : index
    %c0_184 = arith.constant 0 : index
    %412 = vector.load %arg7[%c0_182, %c0_183, %c0_184] : memref<1x12x256xf32, #tpu.memory_space<vmem>>, vector<1x12x256xf32>
    %413 = vector.shape_cast %412 : vector<1x12x256xf32> to vector<12x256xf32>
    %414 = vector.shape_cast %411 : vector<12x256xf32> to vector<1x12x256xf32>
    tpu.vector_store %arg7[%c0_182, %c0_183, %c0_184], %414 {strides = array<i32>} : memref<1x12x256xf32, #tpu.memory_space<vmem>>, vector<1x12x256xf32>,
    return
  }
  func.func @transform_0(%arg0: i32) -> (i32, i32, i32) {
    %c0_i32 = arith.constant 0 : i32
    %c0_i32_0 = arith.constant 0 : i32
    %c0_i32_1 = arith.constant 0 : i32
    return %arg0, %c0_i32, %c0_i32_0 : i32, i32, i32
  }
  func.func @transform_1(%arg0: i32) -> (i32, i32) {
    %c0_i32 = arith.constant 0 : i32
    %c0_i32_0 = arith.constant 0 : i32
    %c0_i32_1 = arith.constant 0 : i32
    return %c0_i32, %c0_i32_0 : i32, i32
  }
  func.func @transform_2(%arg0: i32) -> (i32, i32) {
    %c0_i32 = arith.constant 0 : i32
    %c0_i32_0 = arith.constant 0 : i32
    %c0_i32_1 = arith.constant 0 : i32
    return %c0_i32, %c0_i32_0 : i32, i32
  }
  func.func @transform_3(%arg0: i32) -> (i32, i32) {
    %c0_i32 = arith.constant 0 : i32
    %c0_i32_0 = arith.constant 0 : i32
    %c0_i32_1 = arith.constant 0 : i32
    return %c0_i32, %c0_i32_0 : i32, i32
  }
  func.func @transform_4(%arg0: i32) -> (i32, i32) {
    %c0_i32 = arith.constant 0 : i32
    %c0_i32_0 = arith.constant 0 : i32
    %c0_i32_1 = arith.constant 0 : i32
    return %c0_i32, %c0_i32_0 : i32, i32
  }
  func.func @transform_5(%arg0: i32) -> (i32, i32) {
    %c0_i32 = arith.constant 0 : i32
    %c0_i32_0 = arith.constant 0 : i32
    %c0_i32_1 = arith.constant 0 : i32
    return %c0_i32, %c0_i32_0 : i32, i32
  }
  func.func @transform_6(%arg0: i32) -> (i32, i32, i32) {
    %c0_i32 = arith.constant 0 : i32
    %c0_i32_0 = arith.constant 0 : i32
    %c0_i32_1 = arith.constant 0 : i32
    return %arg0, %c0_i32, %c0_i32_0 : i32, i32, i32
  }
}

</mosaic_0001>

<bundles_post_ra>
// kernel: detect_head_forward.1
= control target key start
LH: loop header
LB: loop body
LE: loop exit
PB: predicated region body
PF: predicated region fallthrough
CT: control target
= control target key end

     0   :  { %s3755_s21 = smov 0   ;;  %s6245_s0 = inlined_call_operand.vmem [shape: f32[2,16,256], index: 0, kind: input, shape index: {}]   ;;  %s6246_s1 = inlined_call_operand.vmem [shape: bf16[16,48], index: 1, kind: input, shape index: {}]   ;;  %s6247_s2 = inlined_call_operand.vmem [shape: f32[1,48], index: 2, kind: input, shape index: {}]   ;;  %s6248_s3 = inlined_call_operand.vmem [shape: f32[25,48], index: 3, kind: input, shape index: {}]   ;;  %s6249_s4 = inlined_call_operand.vmem [shape: f32[1,48], index: 4, kind: input, shape index: {}]   ;;  %s6250_s5 = inlined_call_operand.vmem [shape: bf16[12,48], index: 5, kind: input, shape index: {}]   ;;  %s6251_s6 = inlined_call_operand.vmem [shape: f32[2,12,256], index: 6, kind: output, shape index: {}]  }
   0x1 LB: > { %s3553_s22 = sadd.s32 4294967295, %s3717_s21   ;;  %p3557_p0 = scmp.ge.s32.totalorder %s3717_s21, 1  ;;  %s3717_s21 = sphi %s3755_s21, %s16_s21  }
   0x2   : > { %p212_p1 = scmp.lt.s32.totalorder %s3717_s21, 3 }
   0x4   : > { %p213_p2 = pnand %p3557_p0, %p212_p1 }
   0x6   : > { %216 = sbr.rel (%p213_p2) target bundleno = 1016 (0x3f8), region = 44 }
   0xb   : > { %p242_p3 = scmp.lt.s32.totalorder %s3553_s22, 1  ;;  %v3658_v4 = vld [vmem:[%s6246_s1] sm:$0xff]  ;;  %vm413_vm0 = vcmask 130048   ;;  %vm253_vm1 = vcmask 392192   ;;  %v3719_v23 = vmov 0.0   ;;  %vm257_vm2 = vcmask 386048  }
   0xc   : > { %469 = vmatpush.bf16.msra.mxu0 %v3658_v4  ;;  %3676 = vmatpush.bf16.msra.mxu3 %v3658_v4  ;;  %254 = vst.msk [vmem:[#allocation2] sm:$0xff] %vm253_vm1, %v3719_v23  ;;  %v3824_v29 = vld [vmem:[%s6248_s3] sm:$0xff]  ;;  %vm1895_vm3 = vcmask 388096   ;;  %vm3417_vm4 = vcmask 1043457   ;;  %vm3489_vm9 = vcmask 1040384   ;;  %vm3444_vm10 = vcmask 1042432  }
   0xd   : > { %s6815_s22 = smov (!%p242_p3, %s3553_s22), 1  ;;  %255 = vst.msk [vmem:[#allocation2 + $0x8] sm:$0xff] %vm253_vm1, %v3719_v23  ;;  %v3833_v30 = vperm.slane %v3824_v29, 0  ;;  %v3836_v31 = vperm.slane %v3824_v29, 1  ;;  %v3849_v37 = vperm.slane %v3824_v29, 2  ;;  %v3863_v42 = vperm.slane %v3824_v29, 3 }
   0xe   : > { %s3656_s23 = sshll.u32 %s6815_s22, 5  ;;  %256 = vst.msk [vmem:[#allocation2 + $0x10] sm:$0xff] %vm253_vm1, %v3719_v23  ;;  %v3876_v48 = vperm.slane %v3824_v29, 4  ;;  %v3888_v52 = vperm.slane %v3824_v29, 5  ;;  %v3902_v58 = vperm.slane %v3824_v29, 6 }
   0xf   : > { %s246_s26 = scalar_lea.vmem %s6245_s0, %s3656_s23  ;;  %259 = vst.msk [vmem:[#allocation2 + $0x20] sm:$0xff] %vm253_vm1, %v3719_v23  ;;  %v3911_v59 = vld [vmem:[%s6247_s2] ss:$0 sm:$0xff]  ;;  %s6229_s14 = scalar_lea.vmem %s6251_s6, %s3656_s23 }
  0x10   : > { %v317_v0 = vld [vmem:[%s246_s26] sm:$0xff]  ;;  %v318_v1 = vld [vmem:[%s246_s26 + $0x8] sm:$0xff]  ;;  %v319_v2 = vld [vmem:[%s246_s26 + $0x10] sm:$0xff]  ;;  %260 = vst.msk [vmem:[#allocation2 + $0x28] sm:$0xff] %vm253_vm1, %v3719_v23 }
  0x11   : > { %321 = vxpose.xlu0.b32.start [1/2] (short) %v317_v0, 128  ;;  %353 = vxpose.xlu1.b32.start [1/2] (short) %v318_v1, 128  ;;  %v320_v3 = vld [vmem:[%s246_s26 + $0x18] sm:$0xff]  ;;  %261 = vst.msk [vmem:[#allocation2 + $0x30] sm:$0xff] %vm253_vm1, %v3719_v23  ;;  %v3921_v1 = vperm.slane %v3824_v29, 7 }
  0x12   : > { %272 = vst.msk [vmem:[#allocation2 + $0x6] sm:$0x3] %vm257_vm2, %v3719_v23 }
  0x13   : > { %273 = vst.msk [vmem:[#allocation2 + $0x26] sm:$0x3] %vm257_vm2, %v3719_v23 }
  0x14   : > { %274 = vst.msk [vmem:[#allocation2 + $0x46] sm:$0x3] %vm257_vm2, %v3719_v23  ;;  %v714_v38 = vld [vmem:[#allocation2 + $0x8] sm:$0xff] }
  0x15   : > { %258 = vst.msk [vmem:[#allocation2 + $0x18] sm:$0x3] %vm257_vm2, %v3719_v23  ;;  %v731_v41 = vmul.f32 %v3849_v37, %v714_v38  ;;  %v763_v44 = vld [vmem:[#allocation2 + $0x9] sm:$0xff] }
  0x16   : > { %262 = vst.msk [vmem:[#allocation2 + $0x38] sm:$0x3] %vm257_vm2, %v3719_v23  ;;  %v780_v47 = vmul.f32 %v3863_v42, %v763_v44  ;;  %v812_v49 = vld [vmem:[#allocation2 + $0xa] sm:$0xff] }
  0x17   : > { %264 = vst.msk [vmem:[#allocation2 + $0x240] sm:$0xff] %vm253_vm1, %v3719_v23  ;;  %v829_v51 = vmul.f32 %v3876_v48, %v812_v49  ;;  %v716_v62 = vld [vmem:[#allocation2 + $0x28] sm:$0xff] }
  0x18   : > { %265 = vst.msk [vmem:[#allocation2 + $0x248] sm:$0xff] %vm253_vm1, %v3719_v23 }
  0x19   : > { %322 = vxpose.xlu0.b32.end [2/2] (short) %v319_v2, 128  ;;  %354 = vxpose.xlu1.b32.end [2/2] (short) %v320_v3, 128  ;;  %266 = vst.msk [vmem:[#allocation2 + $0x250] sm:$0xff] %vm253_vm1, %v3719_v23  ;;  %v616_v33 = vld [vmem:[#allocation2 + $0x6] sm:$0xff] }
  0x1a   : > { %267 = vst.msk [vmem:[#allocation2 + $0x258] sm:$0x3] %vm257_vm2, %v3719_v23  ;;  %v665_v34 = vld [vmem:[#allocation2 + $0x7] sm:$0xff]  ;;  %v633_v35 = vmul.f32 %v3833_v30, %v616_v33 }
  0x1b   : > { %268 = vst.msk [vmem:[#allocation2 + $0x260] sm:$0xff] %vm253_vm1, %v3719_v23  ;;  %v682_v36 = vmul.f32 %v3836_v31, %v665_v34  ;;  %v618_v53 = vld [vmem:[#allocation2 + $0x26] sm:$0xff] }
  0x1c   : > { %269 = vst.msk [vmem:[#allocation2 + $0x268] sm:$0xff] %vm253_vm1, %v3719_v23  ;;  %v667_v55 = vld [vmem:[#allocation2 + $0x27] sm:$0xff]  ;;  %v879_v57 = vmul.f32 %v3888_v52, %v618_v53  ;;  %v635_v60 = vmul.f32 %v3833_v30, %v618_v53 }
  0x1d   : > { %270 = vst.msk [vmem:[#allocation2 + $0x270] sm:$0xff] %vm253_vm1, %v3719_v23  ;;  %v698_v40 = vadd.f32 %v682_v36, %v633_v35  ;;  %v684_v61 = vmul.f32 %v3836_v31, %v667_v55  ;;  %v928_v0 = vmul.f32 %v3902_v58, %v667_v55  ;;  %v3928_v2 = vld [vmem:[%s6248_s3 + $0x8] sm:$0xff]  ;;  %v717_v35 = vld [vmem:[#allocation2 + $0x30] sm:$0xff] }
  0x1e   : > { %271 = vst.msk [vmem:[#allocation2 + $0x278] sm:$0x3] %vm257_vm2, %v3719_v23  ;;  %v3976_v44 = vperm.slane %v3928_v2, 2  ;;  %v734_v49 = vmul.f32 %v3849_v37, %v717_v35 }
  0x1f   : > { %275 = vst.msk [vmem:[#allocation2 + $0x66] sm:$0x3] %vm257_vm2, %v3719_v23  ;;  %v747_v46 = vadd.f32 %v731_v41, %v698_v40 }
  0x20   : > { %276 = vst.msk [vmem:[#allocation2 + $0x86] sm:$0x3] %vm257_vm2, %v3719_v23 }
  0x21   : > { %6471 = vst [vmem:[#allocation4_spill] sm:$0xff] %v3833_v30  ;;  %v796_v50 = vadd.f32 %v780_v47, %v747_v46 }
  0x22   : > { %6472 = vst [vmem:[#allocation5_spill] sm:$0xff] %v3836_v31 }
  0x23   : > { %277 = vst.msk [vmem:[#allocation2 + $0xa6] sm:$0x3] %vm257_vm2, %v3719_v23  ;;  %v845_v56 = vadd.f32 %v829_v51, %v796_v50 }
  0x24   : > { %278 = vst.msk [vmem:[#allocation2 + $0xc6] sm:$0x3] %vm257_vm2, %v3719_v23 }
  0x25   : > { %279 = vst.msk [vmem:[#allocation2 + $0xe6] sm:$0x3] %vm257_vm2, %v3719_v23  ;;  %v895_v63 = vadd.f32 %v879_v57, %v845_v56 }
  0x26   : > { %280 = vst.msk [vmem:[#allocation2 + $0x106] sm:$0x3] %vm257_vm2, %v3719_v23 }
  0x27   : > { %6473 = vst [vmem:[#allocation6_spill] sm:$0xff] %v3849_v37 }
  0x28   : > { %281 = vst.msk [vmem:[#allocation2 + $0x126] sm:$0x3] %vm257_vm2, %v3719_v23 }
  0x29   : > { %282 = vst.msk [vmem:[#allocation2 + $0x146] sm:$0x3] %vm257_vm2, %v3719_v23 }
  0x2a   : > { %283 = vst.msk [vmem:[#allocation2 + $0x166] sm:$0x3] %vm257_vm2, %v3719_v23 }
  0x2b   : > { %284 = vst.msk [vmem:[#allocation2 + $0x186] sm:$0x3] %vm257_vm2, %v3719_v23 }
  0x2c   : > { %6474 = vst [vmem:[#allocation7_spill] sm:$0xff] %v3863_v42 }
  0x2d   : > { %285 = vst.msk [vmem:[#allocation2 + $0x1a6] sm:$0x3] %vm257_vm2, %v3719_v23 }
  0x2e   : > { %286 = vst.msk [vmem:[#allocation2 + $0x1c6] sm:$0x3] %vm257_vm2, %v3719_v23 }
  0x2f   : > { %287 = vst.msk [vmem:[#allocation2 + $0x1e6] sm:$0x3] %vm257_vm2, %v3719_v23 }
  0x30   : > { %288 = vst.msk [vmem:[#allocation2 + $0x206] sm:$0x3] %vm257_vm2, %v3719_v23 }
  0x31   : > { %6475 = vst [vmem:[#allocation8_spill] sm:$0xff] %v3876_v48 }
  0x32   : > { %289 = vst.msk [vmem:[#allocation2 + $0x226] sm:$0x3] %vm257_vm2, %v3719_v23 }
  0x33   : > { %294 = vst.msk [vmem:[#allocation2 + $0x58] sm:$0x3] %vm257_vm2, %v3719_v23 }
  0x34   : > { %295 = vst.msk [vmem:[#allocation2 + $0x78] sm:$0x3] %vm257_vm2, %v3719_v23 }
  0x35   : > { %296 = vst.msk [vmem:[#allocation2 + $0x98] sm:$0x3] %vm257_vm2, %v3719_v23 }
  0x36   : > { %6476 = vst [vmem:[#allocation9_spill] sm:$0xff] %v3888_v52 }
  0x37   : > { %297 = vst.msk [vmem:[#allocation2 + $0xb8] sm:$0x3] %vm257_vm2, %v3719_v23 }
  0x38   : > { %298 = vst.msk [vmem:[#allocation2 + $0xd8] sm:$0x3] %vm257_vm2, %v3719_v23 }
  0x39   : > { %299 = vst.msk [vmem:[#allocation2 + $0xf8] sm:$0x3] %vm257_vm2, %v3719_v23 }
  0x3a   : > { %300 = vst.msk [vmem:[#allocation2 + $0x118] sm:$0x3] %vm257_vm2, %v3719_v23 }
  0x3b   : > { %6477 = vst [vmem:[#allocation10_spill] sm:$0xff] %v3902_v58 }
  0x3c   : > { %301 = vst.msk [vmem:[#allocation2 + $0x138] sm:$0x3] %vm257_vm2, %v3719_v23 }
  0x3d   : > { %302 = vst.msk [vmem:[#allocation2 + $0x158] sm:$0x3] %vm257_vm2, %v3719_v23 }
  0x3e   : > { %303 = vst.msk [vmem:[#allocation2 + $0x178] sm:$0x3] %vm257_vm2, %v3719_v23 }
  0x3f   : > { %304 = vst.msk [vmem:[#allocation2 + $0x198] sm:$0x3] %vm257_vm2, %v3719_v23 }
  0x40   : > { %6478 = vst [vmem:[#allocation11_spill] sm:$0xff] %v3921_v1 }
  0x41   : > { %305 = vst.msk [vmem:[#allocation2 + $0x1b8] sm:$0x3] %vm257_vm2, %v3719_v23 }
  0x42   : > { %306 = vst.msk [vmem:[#allocation2 + $0x1d8] sm:$0x3] %vm257_vm2, %v3719_v23 }
  0x43   : > { %307 = vst.msk [vmem:[#allocation2 + $0x1f8] sm:$0x3] %vm257_vm2, %v3719_v23 }
  0x44   : > { %308 = vst.msk [vmem:[#allocation2 + $0x218] sm:$0x3] %vm257_vm2, %v3719_v23 }
  0x45   : > { %309 = vst.msk [vmem:[#allocation2 + $0x238] sm:$0x3] %vm257_vm2, %v3719_v23 }
  0x46   : > { %290 = vst.msk [vmem:[#allocation2 + $0x246] sm:$0x3] %vm257_vm2, %v3719_v23 }
  0x47   : > { %291 = vst.msk [vmem:[#allocation2 + $0x266] sm:$0x3] %vm257_vm2, %v3719_v23 }
  0x48   : > { %292 = vst.msk [vmem:[#allocation2 + $0x18] sm:$0x3] %vm257_vm2, %v3719_v23 }
  0x49   : > { %293 = vst.msk [vmem:[#allocation2 + $0x38] sm:$0x3] %vm257_vm2, %v3719_v23 }
  0x4a   : > { %310 = vst.msk [vmem:[#allocation2 + $0x258] sm:$0x3] %vm257_vm2, %v3719_v23 }
  0x4b   : > { %311 = vst.msk [vmem:[#allocation2 + $0x278] sm:$0x3] %vm257_vm2, %v3719_v23 }
  0x4c   : > { %6481 = vst [vmem:[#allocation14_spill] sm:$0xff] %v3976_v44 }
  0x4f   : > { %v764_v56 = vld [vmem:[#allocation2 + $0x11] sm:$0xff] }
  0x50   : > { %v813_v57 = vld [vmem:[#allocation2 + $0x12] sm:$0xff] }
  0xb5   : > { %v337_v5 = vpop.trf.xlu0  ;;  %v3796_v25 = vpop.trf.xlu1 }
  0xbd   : > { %v338_v6 = vpop.trf.xlu0  ;;  %v3819_v28 = vpop.trf.xlu1 }
  0xbe   : > { %v385_v7 = vpack.c.bf16 %v338_v6, %v337_v5  ;;  %v393_v4 = vpack.c.bf16 %v3819_v28, %v3796_v25  ;;  %v700_v6 = vadd.f32 %v684_v61, %v635_v60 }
  0xc0   : > { %3566 = vmatmul.msk.bf16.vlgmr.msra.gmra.mxu0 %vm413_vm0, %v385_v7  ;;  %v733_v7 = vmul.f32 %v3849_v37, %v716_v62 }
  0xc5   : > { %v339_v8 = vpop.trf.xlu0  ;;  %v3857_v39 = vpop.trf.xlu1 }
  0xcd   : > { %v340_v9 = vpop.trf.xlu0  ;;  %v3894_v54 = vpop.trf.xlu1 }
  0xce   : > { %v386_v10 = vpack.c.bf16 %v340_v9, %v339_v8  ;;  %v617_v8 = vld [vmem:[#allocation2 + $0xe] sm:$0xff] }
  0xcf   : > { %v666_v9 = vld [vmem:[#allocation2 + $0xf] sm:$0xff] }
  0xd0   : > { %3567 = vmatmul.msk.bf16.gmra.mxu0 %vm413_vm0, %v386_v10 }
  0xd5   : > { %v341_v11 = vpop.trf.xlu0  ;;  %v3940_v10 = vpop.trf.xlu1 }
  0xdd   : > { %v342_v12 = vpop.trf.xlu0  ;;  %v3979_v50 = vpop.trf.xlu1 }
  0xde   : > { %v387_v13 = vpack.c.bf16 %v342_v12, %v341_v11  ;;  %v765_v12 = vld [vmem:[#allocation2 + $0x29] sm:$0xff] }
  0xe0   : > { %3568 = vmatmul.msk.bf16.gmra.mxu0 %vm413_vm0, %v387_v13  ;;  %v944_v13 = vadd.f32 %v928_v0, %v895_v63  ;;  %v781_v63 = vmul.f32 %v3863_v42, %v764_v56  ;;  %v3986_v0 = vperm.slane %v3928_v2, 3 }
  0xe2   : > { %6482 = vst [vmem:[#allocation15_spill] sm:$0xff] %v3986_v0 }
  0xe5   : > { %v343_v14 = vpop.trf.xlu0 }
  0xed   : > { %v344_v15 = vpop.trf.xlu0 }
  0xee   : > { %v388_v16 = vpack.c.bf16 %v344_v15, %v343_v14  ;;  %v977_v14 = vmul.f32 %v3921_v1, %v716_v62  ;;  %v3944_v15 = vperm.slane %v3928_v2, 0  ;;  %v766_v62 = vld [vmem:[#allocation2 + $0x31] sm:$0xff] }
  0xf0   : > { %3569 = vmatmul.msk.bf16.gmra.mxu0 %vm413_vm0, %v388_v16  ;;  %6479 = vst [vmem:[#allocation12_spill] sm:$0xff] %v3944_v15  ;;  %v634_v16 = vmul.f32 %v3833_v30, %v617_v8  ;;  %v1026_v25 = vmul.f32 %v3944_v15, %v765_v12 }
  0xf5   : > { %v345_v17 = vpop.trf.xlu0 }
  0xfd   : > { %v346_v18 = vpop.trf.xlu0 }
  0xfe   : > { %v389_v19 = vpack.c.bf16 %v346_v18, %v345_v17  ;;  %v668_v17 = vld [vmem:[#allocation2 + $0x2f] sm:$0xff]  ;;  %v683_v18 = vmul.f32 %v3836_v31, %v666_v9  ;;  %v394_v9 = vpack.c.bf16 %v3894_v54, %v3857_v39 }
 0x100   : > { %3570 = vmatmul.msk.bf16.gmra.mxu0 %vm413_vm0, %v389_v19  ;;  %v749_v19 = vadd.f32 %v733_v7, %v700_v6  ;;  %v699_v34 = vadd.f32 %v683_v18, %v634_v16 }
 0x105   : > { %v347_v20 = vpop.trf.xlu0 }
 0x10d   : > { %v348_v21 = vpop.trf.xlu0 }
 0x10e   : > { %v390_v22 = vpack.c.bf16 %v348_v21, %v347_v20  ;;  %v782_v20 = vmul.f32 %v3863_v42, %v765_v12  ;;  %v715_v21 = vld [vmem:[#allocation2 + $0x10] sm:$0xff] }
 0x10f   : > { %v732_v36 = vmul.f32 %v3849_v37, %v715_v21  ;;  %v815_v12 = vld [vmem:[#allocation2 + $0x32] sm:$0xff]  ;;  %v929_v21 = vmul.f32 %v3902_v58, %v668_v17 }
 0x110   : > { %3571 = vmatmul.msk.bf16.gmra.mxu0 %vm413_vm0, %v390_v22  ;;  %v814_v22 = vld [vmem:[#allocation2 + $0x2a] sm:$0xff]  ;;  %v798_v38 = vadd.f32 %v782_v20, %v749_v19 }
 0x111   : > { %v831_v40 = vmul.f32 %v3876_v48, %v814_v22  ;;  %v748_v51 = vadd.f32 %v732_v36, %v699_v34 }
 0x113   : > { %v847_v55 = vadd.f32 %v831_v40, %v798_v38  ;;  %v4007_v40 = vperm.slane %v3928_v2, 5 }
 0x115   : > { %v349_v24 = vpop.trf.xlu0  ;;  %6484 = vst [vmem:[#allocation17_spill] sm:$0xff] %v4007_v40 }
 0x11d   : > { %v350_v26 = vpop.trf.xlu0 }
 0x11e   : > { %v391_v27 = vpack.c.bf16 %v350_v26, %v349_v24  ;;  %v993_v24 = vadd.f32 %v977_v14, %v944_v13  ;;  %v3959_v26 = vperm.slane %v3928_v2, 1 }
 0x120   : > { %3572 = vmatmul.msk.bf16.gmra.mxu0 %vm413_vm0, %v391_v27  ;;  %6480 = vst [vmem:[#allocation13_spill] sm:$0xff] %v3959_v26  ;;  %v619_v27 = vld [vmem:[#allocation2 + $0x2e] sm:$0xff]  ;;  %v1042_v41 = vadd.f32 %v1026_v25, %v993_v24  ;;  %v832_v25 = vmul.f32 %v3876_v48, %v815_v12 }
 0x121   : > { %v636_v29 = vmul.f32 %v3833_v30, %v619_v27  ;;  %v880_v14 = vmul.f32 %v3888_v52, %v619_v27  ;;  %v4002_v27 = vperm.slane %v3928_v2, 4 }
 0x123   : > { %6483 = vst [vmem:[#allocation16_spill] sm:$0xff] %v4002_v27 }
 0x125   : > { %v351_v32 = vpop.trf.xlu0 }
 0x12d   : > { %v352_v43 = vpop.trf.xlu0 }
 0x12e   : > { %v392_v45 = vpack.c.bf16 %v352_v43, %v351_v32  ;;  %v685_v32 = vmul.f32 %v3836_v31, %v668_v17  ;;  %v1075_v43 = vmul.f32 %v3959_v26, %v814_v22 }
 0x130   : > { %3573 = vmatmul.msk.bf16.vlgmr.msra.gmra.mxu3 %vm413_vm0, %v392_v45  ;;  %v701_v47 = vadd.f32 %v685_v32, %v636_v29  ;;  %v1091_v60 = vadd.f32 %v1075_v43, %v1042_v41  ;;  %v4010_v41 = vpop.trf.xlu1 }
 0x13d   : > { %v471_v3 = vpop.f32.mrf.mxu0 }
 0x13e   : > { %v472_v5 = vadd.f32 %v3911_v59, %v471_v3  ;;  %v750_v3 = vadd.f32 %v734_v49, %v701_v47  ;;  %v1027_v47 = vmul.f32 %v3944_v15, %v766_v62 }
 0x140   : > { %v551_v11 = vmax.f32 %v472_v5, 0.0  ;;  %3574 = vmatmul.msk.bf16.gmra.mxu3 %vm413_vm0, %v393_v4  ;;  %v783_v4 = vmul.f32 %v3863_v42, %v766_v62  ;;  %v830_v5 = vmul.f32 %v3876_v48, %v813_v57  ;;  %v4022_v62 = vperm.slane %v3928_v2, 6 }
 0x142   : > { %584 = vst.msk [vmem:[#allocation2 + $0x48] sm:$0xff] %vm253_vm1, %v551_v11  ;;  %v797_v11 = vadd.f32 %v781_v63, %v748_v51  ;;  %v799_v24 = vadd.f32 %v783_v4, %v750_v3  ;;  %v1076_v4 = vmul.f32 %v3959_v26, %v815_v12 }
 0x143   : > { %6485 = vst [vmem:[#allocation18_spill] sm:$0xff] %v4022_v62 }
 0x144   : > { %v846_v20 = vadd.f32 %v830_v5, %v797_v11  ;;  %v4027_v5 = vld [vmem:[%s6248_s3 + $0x10] sm:$0xff] }
 0x145   : > { %v473_v28 = vpop.f32.mrf.mxu0  ;;  %6486 = vst [vmem:[#allocation19_spill] sm:$0xff] %v4027_v5 }
 0x146   : > { %v474_v33 = vadd.f32 %v3911_v59, %v473_v28  ;;  %v896_v38 = vadd.f32 %v880_v14, %v846_v20 }
 0x148   : > { %v552_v45 = vmax.f32 %v474_v33, 0.0  ;;  %v978_v33 = vmul.f32 %v3921_v1, %v717_v35  ;;  %v848_v35 = vadd.f32 %v832_v25, %v799_v24  ;;  %v945_v51 = vadd.f32 %v929_v21, %v896_v38 }
 0x149   : > { %v620_v46 = vld [vmem:[#allocation2 + $0x46] sm:$0xff] }
 0x14a   : > { %585 = vst.msk [vmem:[#allocation2 + $0x50] sm:$0xff] %vm253_vm1, %v552_v45  ;;  %v669_v53 = vld [vmem:[#allocation2 + $0x47] sm:$0xff]  ;;  %v881_v23 = vmul.f32 %v3888_v52, %v620_v46  ;;  %v1124_v61 = vmul.f32 %v3976_v44, %v620_v46  ;;  %v637_v7 = vmul.f32 %v3833_v30, %v620_v46  ;;  %v994_v3 = vadd.f32 %v978_v33, %v945_v51 }
 0x14b   : > { %v686_v8 = vmul.f32 %v3836_v31, %v669_v53  ;;  %v718_v18 = vld [vmem:[#allocation2 + $0x48] sm:$0xff]  ;;  %v930_v22 = vmul.f32 %v3902_v58, %v669_v53  ;;  %v1173_v28 = vmul.f32 %v3986_v0, %v669_v53 }
 0x14c   : > { %v897_v13 = vadd.f32 %v881_v23, %v847_v55  ;;  %v1140_v19 = vadd.f32 %v1124_v61, %v1091_v60  ;;  %v735_v17 = vmul.f32 %v3849_v37, %v718_v18  ;;  %v979_v43 = vmul.f32 %v3921_v1, %v718_v18 }
 0x14d   : > { %v476_v6 = vpop.f32.mrf.mxu0  ;;  %v702_v54 = vadd.f32 %v686_v8, %v637_v7  ;;  %v1222_v56 = vmul.f32 %v4002_v27, %v718_v18  ;;  %v4030_v8 = vperm.slane %v3928_v2, 7  ;;  %v1043_v14 = vadd.f32 %v1027_v47, %v994_v3 }
 0x14e   : > { %v477_v16 = vadd.f32 %v3911_v59, %v476_v6  ;;  %v946_v34 = vadd.f32 %v930_v22, %v897_v13  ;;  %v1189_v45 = vadd.f32 %v1173_v28, %v1140_v19  ;;  %v4038_v22 = vperm.slane %v4027_v5, 0 }
 0x14f   : > { %v751_v23 = vadd.f32 %v735_v17, %v702_v54  ;;  %6487 = vst [vmem:[#allocation20_spill] sm:$0xff] %v4030_v8 }
 0x150   : > { %3575 = vmatmul.msk.bf16.gmra.mxu3 %vm413_vm0, %v394_v9  ;;  %v553_v39 = vmax.f32 %v477_v16, 0.0  ;;  %v995_v61 = vadd.f32 %v979_v43, %v946_v34  ;;  %v1238_v6 = vadd.f32 %v1222_v56, %v1189_v45  ;;  %v395_v9 = vpack.c.bf16 %v3979_v50, %v3940_v10  ;;  %6488 = vst [vmem:[#allocation21_spill] sm:$0xff] %v4038_v22 }
 0x151   : > { %v621_v29 = vld [vmem:[#allocation2 + $0x4e] sm:$0xff]  ;;  %v1092_v10 = vadd.f32 %v1076_v4, %v1043_v14 }
 0x152   : > { %v767_v32 = vld [vmem:[#allocation2 + $0x49] sm:$0xff]  ;;  %586 = vst.msk [vmem:[#allocation2 + $0x68] sm:$0xff] %vm253_vm1, %v553_v39  ;;  %v882_v49 = vmul.f32 %v3888_v52, %v621_v29  ;;  %v638_v57 = vmul.f32 %v3833_v30, %v621_v29  ;;  %v1125_v20 = vmul.f32 %v3976_v44, %v621_v29  ;;  %v4042_v39 = vpop.trf.xlu1  ;;  %v4047_v29 = vperm.slane %v4027_v5, 1 }
 0x153   : > { %v670_v36 = vld [vmem:[#allocation2 + $0x4f] sm:$0xff]  ;;  %v784_v46 = vmul.f32 %v3863_v42, %v767_v32  ;;  %v1028_v53 = vmul.f32 %v3944_v15, %v767_v32  ;;  %v1271_v16 = vmul.f32 %v4007_v40, %v767_v32 }
 0x154   : > { %v687_v60 = vmul.f32 %v3836_v31, %v670_v36  ;;  %v816_v63 = vld [vmem:[#allocation2 + $0x4a] sm:$0xff]  ;;  %v898_v13 = vadd.f32 %v882_v49, %v848_v35  ;;  %v931_v2 = vmul.f32 %v3902_v58, %v670_v36  ;;  %6489 = vst [vmem:[#allocation22_spill] sm:$0xff] %v4047_v29 }
 0x155   : > { %v478_v55 = vpop.f32.mrf.mxu0  ;;  %v800_v7 = vadd.f32 %v784_v46, %v751_v23  ;;  %v719_v11 = vld [vmem:[#allocation2 + $0x50] sm:$0xff]  ;;  %v1044_v12 = vadd.f32 %v1028_v53, %v995_v61  ;;  %v833_v19 = vmul.f32 %v3876_v48, %v816_v63  ;;  %v1077_v24 = vmul.f32 %v3959_v26, %v816_v63 }
 0x156   : > { %v703_v18 = vadd.f32 %v687_v60, %v638_v57  ;;  %v1287_v50 = vadd.f32 %v1271_v16, %v1238_v6  ;;  %v736_v54 = vmul.f32 %v3849_v37, %v719_v11  ;;  %v947_v33 = vadd.f32 %v931_v2, %v898_v13  ;;  %v768_v13 = vld [vmem:[#allocation2 + $0x51] sm:$0xff] }
 0x157   : > { %v849_v28 = vadd.f32 %v833_v19, %v800_v7  ;;  %v980_v17 = vmul.f32 %v3921_v1, %v719_v11  ;;  %v1093_v34 = vadd.f32 %v1077_v24, %v1044_v12  ;;  %v1320_v38 = vmul.f32 %v4022_v62, %v816_v63 }
 0x158   : > { %v1141_v46 = vadd.f32 %v1125_v20, %v1092_v10  ;;  %v752_v51 = vadd.f32 %v736_v54, %v703_v18  ;;  %v1174_v53 = vmul.f32 %v3986_v0, %v670_v36  ;;  %v479_v7 = vadd.f32 %v3911_v59, %v478_v55 }
 0x159   : > { %v622_v21 = vld [vmem:[#allocation2 + $0x66] sm:$0xff]  ;;  %v1336_v23 = vadd.f32 %v1320_v38, %v1287_v50  ;;  %v996_v3 = vadd.f32 %v980_v17, %v947_v33  ;;  %v1223_v18 = vmul.f32 %v4002_v27, %v719_v11  ;;  %v785_v54 = vmul.f32 %v3863_v42, %v768_v13  ;;  %v817_v33 = vld [vmem:[#allocation2 + $0x52] sm:$0xff] }
 0x15a   : > { %v671_v25 = vld [vmem:[#allocation2 + $0x67] sm:$0xff]  ;;  %v883_v32 = vmul.f32 %v3888_v52, %v622_v21  ;;  %v1126_v49 = vmul.f32 %v3976_v44, %v622_v21  ;;  %v1370_v56 = vmul.f32 %v4030_v8, %v622_v21  ;;  %v1190_v14 = vadd.f32 %v1174_v53, %v1141_v46  ;;  %v4070_v50 = vpop.trf.xlu1 }
 0x15b   : > { %v720_v43 = vld [vmem:[#allocation2 + $0x68] sm:$0xff]  ;;  %v932_v35 = vmul.f32 %v3902_v58, %v671_v25  ;;  %v1175_v63 = vmul.f32 %v3986_v0, %v671_v25  ;;  %v1419_v6 = vmul.f32 %v4038_v22, %v671_v25  ;;  %v554_v2 = vmax.f32 %v479_v7, 0.0 }
 0x15c   : > { %v899_v47 = vadd.f32 %v883_v32, %v849_v28  ;;  %v981_v60 = vmul.f32 %v3921_v1, %v720_v43  ;;  %v1142_v61 = vadd.f32 %v1126_v49, %v1093_v34  ;;  %v1386_v4 = vadd.f32 %v1370_v56, %v1336_v23 }
 0x15d   : > { %v481_v45 = vpop.f32.mrf.mxu0  ;;  %v1224_v16 = vmul.f32 %v4002_v27, %v720_v43  ;;  %v1468_v20 = vmul.f32 %v4047_v29, %v720_v43  ;;  %v688_v24 = vmul.f32 %v3836_v31, %v671_v25  ;;  %v1029_v28 = vmul.f32 %v3944_v15, %v768_v13  ;;  %587 = vst.msk [vmem:[#allocation2 + $0x70] sm:$0xff] %vm253_vm1, %v554_v2 }
 0x15e   : > { %v948_v57 = vadd.f32 %v932_v35, %v899_v47  ;;  %v1191_v12 = vadd.f32 %v1175_v63, %v1142_v61  ;;  %v1435_v19 = vadd.f32 %v1419_v6, %v1386_v4  ;;  %v482_v55 = vadd.f32 %v3911_v59, %v481_v45 }
 0x15f   : > { %v1239_v17 = vadd.f32 %v1223_v18, %v1190_v14  ;;  %v801_v34 = vadd.f32 %v785_v54, %v752_v51  ;;  %v1045_v38 = vadd.f32 %v1029_v28, %v996_v3  ;;  %v1272_v45 = vmul.f32 %v4007_v40, %v768_v13 }
 0x160   : > { %3576 = vmatmul.msk.bf16.gmra.mxu3 %vm413_vm0, %v395_v9  ;;  %v4060_v36 = vadd.f32 %v981_v60, %v948_v57  ;;  %v639_v9 = vmul.f32 %v3833_v30, %v622_v21  ;;  %v4067_v10 = vadd.f32 %v1224_v16, %v1191_v12  ;;  %v4074_v32 = vadd.f32 %v1468_v20, %v1435_v19 }
 0x161   : > { %v555_v21 = vmax.f32 %v482_v55, 0.0  ;;  %v834_v35 = vmul.f32 %v3876_v48, %v817_v33  ;;  %v1078_v49 = vmul.f32 %v3959_v26, %v817_v33  ;;  %v1288_v53 = vadd.f32 %v1272_v45, %v1239_v17 }
 0x162   : > { %v704_v46 = vadd.f32 %v688_v24, %v639_v9  ;;  %v737_v23 = vmul.f32 %v3849_v37, %v720_v43  ;;  %v1321_v51 = vmul.f32 %v4022_v62, %v817_v33  ;;  %v4088_v4 = vperm.slane %v4027_v5, 2  ;;  %v4110_v28 = vpop.trf.xlu1 }
 0x163   : > { %588 = vst.msk [vmem:[#allocation2 + $0x88] sm:$0xff] %vm253_vm1, %v555_v21  ;;  %v850_v56 = vadd.f32 %v834_v35, %v801_v34  ;;  %v1094_v57 = vadd.f32 %v1078_v49, %v1045_v38  ;;  %v4091_v6 = vperm.slane %v4027_v5, 3  ;;  %v4094_v7 = vperm.slane %v4027_v5, 4 }
 0x164   : > { %v753_v60 = vadd.f32 %v737_v23, %v704_v46  ;;  %v623_v61 = vld [vmem:[#allocation2 + $0x6e] sm:$0xff]  ;;  %6490 = vst [vmem:[#allocation23_spill] sm:$0xff] %v4088_v4  ;;  %v4100_v19 = vperm.slane %v4027_v5, 5  ;;  %v1337_v2 = vadd.f32 %v1321_v51, %v1288_v53  ;;  %v4106_v55 = vperm.slane %v4027_v5, 6 }
 0x165   : > { %v483_v11 = vpop.f32.mrf.mxu0  ;;  %v672_v63 = vld [vmem:[#allocation2 + $0x6f] sm:$0xff]  ;;  %6491 = vst [vmem:[#allocation24_spill] sm:$0xff] %v4091_v6  ;;  %v640_v43 = vmul.f32 %v3833_v30, %v623_v61  ;;  %v884_v18 = vmul.f32 %v3888_v52, %v623_v61  ;;  %v396_v54 = vpack.c.bf16 %v4042_v39, %v4010_v41 }
 0x166   : > { %v484_v25 = vadd.f32 %v3911_v59, %v483_v11  ;;  %v4085_v3 = vld [vmem:[#allocation2 + $0x70] sm:$0xff]  ;;  %6492 = vst [vmem:[#allocation25_spill] sm:$0xff] %v4094_v7  ;;  %v689_v13 = vmul.f32 %v3836_v31, %v672_v63  ;;  %v933_v21 = vmul.f32 %v3902_v58, %v672_v63 }
 0x167   : > { %v769_v14 = vld [vmem:[#allocation2 + $0x69] sm:$0xff]  ;;  %v770_v12 = vld [vmem:[#allocation2 + $0x71] sm:$0xff]  ;;  %6493 = vst [vmem:[#allocation26_spill] sm:$0xff] %v4100_v19  ;;  %v738_v33 = vmul.f32 %v3849_v37, %v4085_v3  ;;  %v900_v17 = vadd.f32 %v884_v18, %v850_v56  ;;  %v982_v46 = vmul.f32 %v3921_v1, %v4085_v3 }
 0x168   : > { %v556_v47 = vmax.f32 %v484_v25, 0.0  ;;  %v818_v16 = vld [vmem:[#allocation2 + $0x6a] sm:$0xff]  ;;  %v786_v9 = vmul.f32 %v3863_v42, %v769_v14  ;;  %v819_v24 = vld [vmem:[#allocation2 + $0x72] sm:$0xff]  ;;  %6494 = vst [vmem:[#allocation27_spill] sm:$0xff] %v4106_v55  ;;  %v705_v11 = vadd.f32 %v689_v13, %v640_v43  ;;  %v787_v25 = vmul.f32 %v3863_v42, %v770_v12 }
 0x169   : > { %v835_v34 = vmul.f32 %v3876_v48, %v818_v16  ;;  %v836_v38 = vmul.f32 %v3876_v48, %v819_v24  ;;  %v1030_v45 = vmul.f32 %v3944_v15, %v769_v14  ;;  %v949_v39 = vadd.f32 %v933_v21, %v900_v17 }
 0x16a   : > { %589 = vst.msk [vmem:[#allocation2 + $0x90] sm:$0xff] %vm253_vm1, %v556_v47  ;;  %v754_v41 = vadd.f32 %v738_v33, %v705_v11  ;;  %v1127_v47 = vmul.f32 %v3976_v44, %v623_v61  ;;  %v802_v35 = vadd.f32 %v786_v9, %v753_v60  ;;  %v1031_v49 = vmul.f32 %v3944_v15, %v770_v12 }
 0x16b   : > { %v1046_v53 = vadd.f32 %v1030_v45, %v4060_v36  ;;  %v1079_v23 = vmul.f32 %v3959_v26, %v818_v16  ;;  %v998_v56 = vadd.f32 %v982_v46, %v949_v39  ;;  %v1176_v43 = vmul.f32 %v3986_v0, %v672_v63  ;;  %v4138_v46 = vpop.trf.xlu1 }
 0x16c   : > { %v1143_v51 = vadd.f32 %v1127_v47, %v1094_v57  ;;  %v1273_v13 = vmul.f32 %v4007_v40, %v769_v14  ;;  %v803_v18 = vadd.f32 %v787_v25, %v754_v41  ;;  %v1225_v33 = vmul.f32 %v4002_v27, %v4085_v3  ;;  %v868_v41 = vld [vmem:[#allocation2 + $0x86] sm:$0xff] }
 0x16d   : > { %v4102_v20 = vpop.f32.mrf.mxu0  ;;  %v1095_v11 = vadd.f32 %v1079_v23, %v1046_v53  ;;  %v1047_v60 = vadd.f32 %v1031_v49, %v998_v56  ;;  %v1322_v36 = vmul.f32 %v4022_v62, %v818_v16  ;;  %v851_v57 = vadd.f32 %v835_v34, %v802_v35 }
 0x16e   : > { %v1192_v9 = vadd.f32 %v1176_v43, %v1143_v51  ;;  %v1289_v17 = vadd.f32 %v1273_v13, %v4067_v10  ;;  %v1274_v45 = vmul.f32 %v4007_v40, %v770_v12  ;;  %v1371_v39 = vmul.f32 %v4030_v8, %v623_v61  ;;  %v917_v51 = vld [vmem:[#allocation2 + $0x87] sm:$0xff] }
 0x16f   : > { %v1517_v25 = vmul.f32 %v4088_v4, %v769_v14  ;;  %v1323_v53 = vmul.f32 %v4022_v62, %v819_v24  ;;  %v1420_v56 = vmul.f32 %v4038_v22, %v672_v63  ;;  %v1566_v35 = vmul.f32 %v4091_v6, %v818_v16  ;;  %v966_v13 = vld [vmem:[#allocation2 + $0x88] sm:$0xff] }
 0x170   : > { %3577 = vmatmul.msk.bf16.gmra.mxu3 %vm413_vm0, %v396_v54  ;;  %v1080_v54 = vmul.f32 %v3959_v26, %v819_v24  ;;  %v1241_v49 = vadd.f32 %v1225_v33, %v1192_v9  ;;  %v1338_v10 = vadd.f32 %v1322_v36, %v1289_v17  ;;  %v1387_v23 = vadd.f32 %v1371_v39, %v1337_v2 }
 0x171   : > { %v1533_v34 = vadd.f32 %v1517_v25, %v4074_v32  ;;  %v4146_v61 = vadd.f32 %v836_v38, %v803_v18  ;;  %v1469_v43 = vmul.f32 %v4047_v29, %v4085_v3  ;;  %v1128_v63 = vmul.f32 %v3976_v44, %v868_v41  ;;  %v1065_v5 = vld [vmem:[#allocation2 + $0x92] sm:$0xff] }
 0x172   : > { %v4140_v47 = vadd.f32 %v1080_v54, %v1047_v60  ;;  %v1290_v14 = vadd.f32 %v1274_v45, %v1241_v49  ;;  %v885_v54 = vmul.f32 %v3888_v52, %v868_v41  ;;  %v1436_v33 = vadd.f32 %v1420_v56, %v1387_v23  ;;  %v869_v49 = vld [vmem:[#allocation2 + $0x8e] sm:$0xff] }
 0x173   : > { %v1518_v60 = vmul.f32 %v4088_v4, %v770_v12  ;;  %v1582_v2 = vadd.f32 %v1566_v35, %v1533_v34  ;;  %v1567_v32 = vmul.f32 %v4091_v6, %v819_v24  ;;  %v934_v16 = vmul.f32 %v3902_v58, %v917_v51  ;;  %v4166_v48 = vpop.trf.xlu1 }
 0x174   : > { %v4153_v9 = vadd.f32 %v1323_v53, %v1290_v14  ;;  %v1372_v38 = vmul.f32 %v4030_v8, %v868_v41  ;;  %v1485_v18 = vadd.f32 %v1469_v43, %v1436_v33  ;;  %v983_v3 = vmul.f32 %v3921_v1, %v966_v13  ;;  %v918_v53 = vld [vmem:[#allocation2 + $0x8f] sm:$0xff] }
 0x175   : > { %v4133_v21 = vpop.f32.mrf.mxu0  ;;  %v1177_v17 = vmul.f32 %v3986_v0, %v917_v51  ;;  %v1616_v36 = vmul.f32 %v4094_v7, %v868_v41  ;;  %v1421_v12 = vmul.f32 %v4038_v22, %v917_v51  ;;  %v901_v45 = vadd.f32 %v885_v54, %v851_v57  ;;  %v967_v14 = vld [vmem:[#allocation2 + $0x90] sm:$0xff] }
 0x176   : > { %v1144_v39 = vadd.f32 %v1128_v63, %v1095_v11  ;;  %v1388_v25 = vadd.f32 %v1372_v38, %v1338_v10  ;;  %v1534_v24 = vadd.f32 %v1518_v60, %v1485_v18  ;;  %v1226_v56 = vmul.f32 %v4002_v27, %v966_v13  ;;  %v1015_v43 = vld [vmem:[#allocation2 + $0x89] sm:$0xff]  ;;  %v1016_v33 = vld [vmem:[#allocation2 + $0x91] sm:$0xff] }
 0x177   : > { %v1665_v34 = vmul.f32 %v4100_v19, %v917_v51  ;;  %v1632_v35 = vadd.f32 %v1616_v36, %v1582_v2  ;;  %v1470_v41 = vmul.f32 %v4047_v29, %v966_v13  ;;  %v950_v57 = vadd.f32 %v934_v16, %v901_v45  ;;  %v1064_v11 = vld [vmem:[#allocation2 + $0x8a] sm:$0xff] }
 0x178   : > { %v1193_v10 = vadd.f32 %v1177_v17, %v1144_v39  ;;  %v1437_v54 = vadd.f32 %v1421_v12, %v1388_v25  ;;  %v1583_v63 = vadd.f32 %v1567_v32, %v1534_v24  ;;  %v1714_v38 = vmul.f32 %v4106_v55, %v966_v13 }
 0x179   : > { %v1681_v60 = vadd.f32 %v1665_v34, %v1632_v35  ;;  %v886_v18 = vmul.f32 %v3888_v52, %v869_v49  ;;  %v935_v51 = vmul.f32 %v3902_v58, %v918_v53  ;;  %v984_v2 = vmul.f32 %v3921_v1, %v967_v14 }
 0x17a   : > { %v1032_v36 = vmul.f32 %v3944_v15, %v1015_v43  ;;  %v1033_v42 = vmul.f32 %v3944_v15, %v1016_v33  ;;  %v999_v37 = vadd.f32 %v983_v3, %v950_v57  ;;  %v1081_v16 = vmul.f32 %v3959_v26, %v1064_v11 }
 0x17b   : > { %v1129_v17 = vmul.f32 %v3976_v44, %v869_v49  ;;  %v1242_v32 = vadd.f32 %v1226_v56, %v1193_v10  ;;  %v1178_v13 = vmul.f32 %v3986_v0, %v918_v53  ;;  %v1227_v12 = vmul.f32 %v4002_v27, %v967_v14 }
 0x17c   : > { %v1275_v45 = vmul.f32 %v4007_v40, %v1015_v43  ;;  %v1276_v39 = vmul.f32 %v4007_v40, %v1016_v33  ;;  %v1324_v25 = vmul.f32 %v4022_v62, %v1064_v11  ;;  %v1373_v24 = vmul.f32 %v4030_v8, %v869_v49 }
 0x17d   : > { %v4162_v23 = vpop.f32.mrf.mxu0  ;;  %v1486_v34 = vadd.f32 %v1470_v41, %v1437_v54  ;;  %v1519_v3 = vmul.f32 %v4088_v4, %v1015_v43  ;;  %v1325_v35 = vmul.f32 %v4022_v62, %v1065_v5  ;;  %v1422_v57 = vmul.f32 %v4038_v22, %v918_v53  ;;  %v4194_v54 = vpop.trf.xlu1 }
 0x17e   : > { %v1471_v56 = vmul.f32 %v4047_v29, %v967_v14  ;;  %v1617_v10 = vmul.f32 %v4094_v7, %v869_v49  ;;  %v1568_v1 = vmul.f32 %v4091_v6, %v1064_v11  ;;  %v1666_v58 = vmul.f32 %v4100_v19, %v918_v53 }
 0x17f   : > { %v4190_v52 = vadd.f32 %v1714_v38, %v1681_v60  ;;  %v487_v41 = vadd.f32 %v3911_v59, %v4102_v20  ;;  %v1715_v43 = vmul.f32 %v4106_v55, %v967_v14  ;;  %v902_v62 = vadd.f32 %v886_v18, %v4146_v61 }
 0x180   : > { %v1145_v40 = vadd.f32 %v1129_v17, %v4140_v47  ;;  %v1291_v29 = vadd.f32 %v1275_v45, %v1242_v32  ;;  %v1389_v7 = vadd.f32 %v1373_v24, %v4153_v9  ;;  %v1535_v11 = vadd.f32 %v1519_v3, %v1486_v34  ;;  %v625_v17 = vld [vmem:[#allocation2 + $0x8e] sm:$0xff] }
 0x181   : > { %6495 = vst [vmem:[#allocation28_spill] sm:$0xff] %v4190_v52  ;;  %v557_v49 = vmax.f32 %v487_v41, 0.0  ;;  %v1633_v27 = vadd.f32 %v1617_v10, %v1583_v63  ;;  %v1048_v53 = vadd.f32 %v1032_v36, %v999_v37  ;;  %v951_v38 = vadd.f32 %v935_v51, %v902_v62  ;;  %v624_v63 = vld [vmem:[#allocation2 + $0x86] sm:$0xff]  ;;  %v723_v34 = vld [vmem:[#allocation2 + $0x90] sm:$0xff] }
 0x182   : > { %v1194_v60 = vadd.f32 %v1178_v13, %v1145_v40  ;;  %v1340_v52 = vadd.f32 %v1324_v25, %v1291_v29  ;;  %v1438_v20 = vadd.f32 %v1422_v57, %v1389_v7  ;;  %v4201_v19 = vadd.f32 %v1568_v1, %v1535_v11  ;;  %v673_v51 = vld [vmem:[#allocation2 + $0x87] sm:$0xff]  ;;  %v6499_v11 = vld [vmem:[#allocation6_spill] sm:$0xff] }
 0x183   : > { %590 = vst.msk [vmem:[#allocation2 + $0xa8] sm:$0xff] %vm253_vm1, %v557_v49  ;;  %v1682_v14 = vadd.f32 %v1666_v58, %v1633_v27  ;;  %v397_v61 = vpack.c.bf16 %v4110_v28, %v4070_v50  ;;  %v1000_v47 = vadd.f32 %v984_v2, %v951_v38  ;;  %v489_v9 = vadd.f32 %v3911_v59, %v4133_v21 }
 0x184   : > { %6496 = vst [vmem:[#allocation29_spill] sm:$0xff] %v4201_v19  ;;  %v1243_v18 = vadd.f32 %v1227_v12, %v1194_v60  ;;  %v492_v37 = vadd.f32 %v3911_v59, %v4162_v23  ;;  %v1520_v40 = vmul.f32 %v4088_v4, %v1016_v33  ;;  %v1487_v62 = vadd.f32 %v1471_v56, %v1438_v20  ;;  %v722_v12 = vld [vmem:[#allocation2 + $0x88] sm:$0xff] }
 0x185   : > { %v493_v15 = vpop.f32.mrf.mxu0  ;;  %v4210_v29 = vadd.f32 %v1715_v43, %v1682_v14  ;;  %3578 = vmatmul.msk.bf16.gmra.mxu3 %vm413_vm0, %v397_v61  ;;  %v558_v1 = vmax.f32 %v489_v9, 0.0  ;;  %v1049_v27 = vadd.f32 %v1033_v42, %v1000_v47  ;;  %v1569_v21 = vmul.f32 %v4091_v6, %v1065_v5  ;;  %v4216_v36 = vpop.trf.xlu1 }
 0x186   : > { %v494_v58 = vadd.f32 %v3911_v59, %v493_v15  ;;  %v1292_v50 = vadd.f32 %v1276_v39, %v1243_v18  ;;  %v559_v7 = vmax.f32 %v492_v37, 0.0  ;;  %v1536_v2 = vadd.f32 %v1520_v40, %v1487_v62  ;;  %v674_v15 = vld [vmem:[#allocation2 + $0x8f] sm:$0xff]  ;;  %v6501_v37 = vld [vmem:[#allocation16_spill] sm:$0xff] }
 0x187   : > { %6497 = vst [vmem:[#allocation30_spill] sm:$0xff] %v4210_v29  ;;  %v1082_v32 = vmul.f32 %v3959_v26, %v1065_v5  ;;  %v1097_v13 = vadd.f32 %v1081_v16, %v1048_v53  ;;  %v641_v25 = vmul.f32 %v3833_v30, %v624_v63  ;;  %v690_v24 = vmul.f32 %v3836_v31, %v673_v51  ;;  %v6502_v62 = vld [vmem:[#allocation22_spill] sm:$0xff] }
 0x188   : > { %v560_v23 = vmax.f32 %v494_v58, 0.0  ;;  %591 = vst.msk [vmem:[#allocation2 + $0xb0] sm:$0xff] %vm253_vm1, %v558_v1  ;;  %v4220_v42 = vadd.f32 %v1325_v35, %v1292_v50  ;;  %v4222_v45 = vadd.f32 %v1569_v21, %v1536_v2  ;;  %v642_v56 = vmul.f32 %v3833_v30, %v625_v17 }
 0x189   : > { %592 = vst.msk [vmem:[#allocation2 + $0xc8] sm:$0xff] %vm253_vm1, %v559_v7  ;;  %v1098_v5 = vadd.f32 %v1082_v32, %v1049_v27  ;;  %v691_v49 = vmul.f32 %v3836_v31, %v674_v15  ;;  %v739_v53 = vmul.f32 %v6499_v11, %v722_v12  ;;  %v4242_v14 = vmul.f32 %v6499_v11, %v723_v34 }
 0x18a   : > { %6498 = vst [vmem:[#allocation31_spill] sm:$0xff] %v4222_v45  ;;  %v1113_v3 = vld [vmem:[#allocation2 + $0xa6] sm:$0xff]  ;;  %v706_v9 = vadd.f32 %v690_v24, %v641_v25 }
 0x18b   : > { %v1162_v57 = vld [vmem:[#allocation2 + $0xa7] sm:$0xff]  ;;  %593 = vst.msk [vmem:[#allocation2 + $0xd0] sm:$0xff] %vm253_vm1, %v560_v23  ;;  %v1130_v41 = vmul.f32 %v3976_v44, %v1113_v3  ;;  %v1374_v43 = vmul.f32 %v4030_v8, %v1113_v3  ;;  %v643_v60 = vmul.f32 %v1113_v3, %v3833_v30  ;;  %v4261_v23 = vadd.f32 %v691_v49, %v642_v56 }
 0x18c   : > { %v1211_v10 = vld [vmem:[#allocation2 + $0xa8] sm:$0xff]  ;;  %v1179_v38 = vmul.f32 %v3986_v0, %v1162_v57  ;;  %v692_v20 = vmul.f32 %v1162_v57, %v3836_v31  ;;  %6500 = vst [vmem:[#allocation32_spill] sm:$0xff] %v4242_v14  ;;  %v1423_v61 = vmul.f32 %v4038_v22, %v1162_v57 }
 0x18d   : > { %v496_v28 = vpop.f32.mrf.mxu0  ;;  %v1146_v47 = vadd.f32 %v1130_v41, %v1097_v13  ;;  %v1390_v18 = vadd.f32 %v1374_v43, %v1340_v52  ;;  %v1228_v40 = vmul.f32 %v6501_v37, %v1211_v10  ;;  %v1472_v58 = vmul.f32 %v6502_v62, %v1211_v10  ;;  %v4259_v2 = vpop.trf.xlu1  ;;  %6504 = vst [vmem:[#allocation34_spill] sm:$0xff] %v4261_v23  ;;  %v6506_v3 = vld [vmem:[#allocation17_spill] sm:$0xff]  ;;  %v6508_v41 = vld [vmem:[#allocation18_spill] sm:$0xff] }
 0x18e   : > { %v497_v33 = vadd.f32 %v3911_v59, %v496_v28  ;;  %v4247_v27 = vadd.f32 %v692_v20, %v643_v60  ;;  %v4250_v50 = vmul.f32 %v1211_v10, %v6499_v11  ;;  %6503 = vst [vmem:[#allocation33_spill] sm:$0xff] %v4259_v2 }
 0x18f   : > { %v4252_v7 = vld [vmem:[#allocation2 + $0xae] sm:$0xff]  ;;  %v1195_v63 = vadd.f32 %v1179_v38, %v1146_v47  ;;  %v1439_v21 = vadd.f32 %v1423_v61, %v1390_v18 }
 0x190   : > { %v561_v39 = vmax.f32 %v497_v33, 0.0  ;;  %v4254_v28 = vld [vmem:[#allocation2 + $0xaf] sm:$0xff]  ;;  %v1131_v13 = vmul.f32 %v3976_v44, %v4252_v7  ;;  %v1375_v12 = vmul.f32 %v4030_v8, %v4252_v7  ;;  %v4285_v10 = vld [vmem:[#allocation2 + $0xc6] sm:$0xff]  ;;  %v4409_v8 = vld [vmem:[%s6247_s2] ss:$0 sm:$0xff] }
 0x191   : > { %v4256_v51 = vld [vmem:[#allocation2 + $0xb0] sm:$0xff]  ;;  %v1180_v15 = vmul.f32 %v3986_v0, %v4254_v28  ;;  %v1244_v34 = vadd.f32 %v1228_v40, %v1195_v63  ;;  %6507 = vst [vmem:[#allocation36_spill] sm:$0xff] %v4285_v10  ;;  %v4295_v38 = vadd.f32 %v1472_v58, %v1439_v21  ;;  %v4306_v63 = vld [vmem:[#allocation2 + $0xc7] sm:$0xff] }
 0x192   : > { %594 = vst.msk [vmem:[#allocation2 + $0xe8] sm:$0xff] %vm253_vm1, %v561_v39  ;;  %v4263_v33 = vld [vmem:[#allocation2 + $0xa9] sm:$0xff]  ;;  %v4265_v17 = vld [vmem:[#allocation2 + $0xb1] sm:$0xff]  ;;  %v4275_v39 = vadd.f32 %v739_v53, %v706_v9  ;;  %v1229_v24 = vmul.f32 %v6501_v37, %v4256_v51  ;;  %v1424_v53 = vmul.f32 %v4038_v22, %v4254_v28  ;;  %v1147_v47 = vadd.f32 %v1131_v13, %v1098_v5 }
 0x193   : > { %v4267_v32 = vld [vmem:[#allocation2 + $0xaa] sm:$0xff]  ;;  %v4277_v25 = vld [vmem:[#allocation2 + $0xb2] sm:$0xff]  ;;  %v1277_v57 = vmul.f32 %v6506_v3, %v4263_v33  ;;  %v1278_v56 = vmul.f32 %v6506_v3, %v4265_v17  ;;  %6510 = vst [vmem:[#allocation38_spill] sm:$0xff] %v4295_v38  ;;  %v1391_v9 = vadd.f32 %v1375_v12, %v4220_v42  ;;  %v1473_v58 = vmul.f32 %v6502_v62, %v4256_v51 }
 0x194   : > { %6505 = vst [vmem:[#allocation35_spill] sm:$0xff] %v4275_v39  ;;  %v1326_v43 = vmul.f32 %v6508_v41, %v4267_v32  ;;  %v4291_v49 = vmul.f32 %v6508_v41, %v4277_v25  ;;  %v4308_v35 = vld [vmem:[#allocation2 + $0xcf] sm:$0xff]  ;;  %v645_v5 = vmul.f32 %v3833_v30, %v4285_v10  ;;  %v1196_v42 = vadd.f32 %v1180_v15, %v1147_v47 }
 0x195   : > { %v498_v1 = vpop.f32.mrf.mxu0  ;;  %v1293_v18 = vadd.f32 %v1277_v57, %v1244_v34  ;;  %6515 = vst [vmem:[#allocation43_spill] sm:$0xff] %v4306_v63  ;;  %v6517_v13 = vpack.c.bf16 %v4166_v48, %v4138_v46  ;;  %v6518_v34 = vld [vmem:[#allocation19_spill] sm:$0xff]  ;;  %v4328_v29 = vld [vmem:[#allocation2 + $0xc8] sm:$0xff]  ;;  %v694_v48 = vmul.f32 %v3836_v31, %v4306_v63  ;;  %v695_v46 = vmul.f32 %v3836_v31, %v4308_v35 }
 0x196   : > { %v499_v52 = vadd.f32 %v3911_v59, %v498_v1  ;;  %6509 = vst [vmem:[#allocation37_spill] sm:$0xff] %v4291_v49  ;;  %v4304_v1 = vld [vmem:[#allocation2 + $0xce] sm:$0xff]  ;;  %v4326_v57 = vperm.slane %v6518_v34, 7 }
 0x197   : > { %6514 = vst [vmem:[#allocation42_spill] sm:$0xff] %v4304_v1  ;;  %3579 = vmatmul.msk.bf16.gmra.mxu3 %vm413_vm0, %v6517_v13  ;;  %v646_v15 = vmul.f32 %v3833_v30, %v4304_v1  ;;  %v4338_v47 = vld [vmem:[#allocation2 + $0xc9] sm:$0xff]  ;;  %v4347_v34 = vld [vmem:[#allocation2 + $0xd1] sm:$0xff]  ;;  %v710_v39 = vadd.f32 %v694_v48, %v645_v5 }
 0x198   : > { %v562_v40 = vmax.f32 %v499_v52, 0.0  ;;  %6516 = vst [vmem:[#allocation44_spill] sm:$0xff] %v4308_v35  ;;  %v1440_v52 = vadd.f32 %v1424_v53, %v1391_v9  ;;  %v4336_v53 = vld [vmem:[#allocation2 + $0xd0] sm:$0xff]  ;;  %v4340_v9 = vadd.f32 %v1326_v43, %v1293_v18  ;;  %v743_v43 = vmul.f32 %v6499_v11, %v4328_v29 }
 0x199   : > { %v4297_v60 = vld [vmem:[#allocation2 + $0xe6] sm:$0xff]  ;;  %6519 = vst [vmem:[#allocation19_spill] sm:$0xff] %v4326_v57  ;;  %v711_v57 = vadd.f32 %v695_v46, %v646_v15  ;;  %v4355_v18 = vld [vmem:[#allocation2 + $0xd2] sm:$0xff] }
 0x19a   : > { %6511 = vst [vmem:[#allocation39_spill] sm:$0xff] %v4297_v60  ;;  %v4299_v20 = vld [vmem:[#allocation2 + $0xe7] sm:$0xff]  ;;  %v647_v21 = vmul.f32 %v3833_v30, %v4297_v60  ;;  %v4342_v13 = vadd.f32 %v1473_v58, %v1440_v52  ;;  %v6533_v49 = vld [vmem:[#allocation10_spill] sm:$0xff] }
 0x19b   : > { %6512 = vst [vmem:[#allocation40_spill] sm:$0xff] %v4299_v20  ;;  %v4301_v61 = vld [vmem:[#allocation2 + $0xe8] sm:$0xff]  ;;  %v696_v16 = vmul.f32 %v3836_v31, %v4299_v20  ;;  %v6531_v15 = vld [vmem:[#allocation8_spill] sm:$0xff] }
 0x19c   : > { %6513 = vst [vmem:[#allocation41_spill] sm:$0xff] %v4301_v61  ;;  %v745_v12 = vmul.f32 %v6499_v11, %v4301_v61  ;;  %v4349_v38 = vld [vmem:[#allocation2 + $0xca] sm:$0xff] }
 0x19d   : > { %595 = vst.msk [vmem:[#allocation2 + $0xf0] sm:$0xff] %vm253_vm1, %v562_v40  ;;  %v501_v45 = vpop.f32.mrf.mxu0  ;;  %v712_v19 = vadd.f32 %v696_v16, %v647_v21  ;;  %v1245_v40 = vadd.f32 %v1229_v24, %v1196_v42  ;;  %v4345_v21 = vpop.trf.xlu1  ;;  %v841_v48 = vmul.f32 %v6531_v15, %v4349_v38 }
 0x19e   : > { %6520 = vst [vmem:[#allocation45_spill] sm:$0xff] %v4328_v29  ;;  %v502_v16 = vadd.f32 %v3911_v59, %v501_v45  ;;  %v744_v59 = vmul.f32 %v6499_v11, %v4336_v53  ;;  %v6529_v45 = vld [vmem:[#allocation7_spill] sm:$0xff] }
 0x19f   : > { %6521 = vst [vmem:[#allocation46_spill] sm:$0xff] %v4336_v53  ;;  %v761_v58 = vadd.f32 %v745_v12, %v712_v19  ;;  %v792_v42 = vmul.f32 %v6529_v45, %v4338_v47  ;;  %v4361_v52 = vadd.f32 %v1278_v56, %v1245_v40  ;;  %v793_v5 = vmul.f32 %v6529_v45, %v4347_v34  ;;  %v6532_v12 = vld [vmem:[#allocation9_spill] sm:$0xff] }
 0x1a0   : > { %6522 = vst [vmem:[#allocation47_spill] sm:$0xff] %v4338_v47  ;;  %v563_v24 = vmax.f32 %v502_v16, 0.0  ;;  %v760_v46 = vadd.f32 %v744_v59, %v711_v57  ;;  %v842_v19 = vmul.f32 %v6531_v15, %v4355_v18  ;;  %v891_v16 = vmul.f32 %v6532_v12, %v4297_v60 }
 0x1a1   : > { %6523 = vst [vmem:[#allocation48_spill] sm:$0xff] %v4340_v9  ;;  %v940_v56 = vmul.f32 %v6533_v49, %v4299_v20  ;;  %v644_v57 = vmul.f32 %v4252_v7, %v3833_v30  ;;  %v693_v59 = vmul.f32 %v4254_v28, %v3836_v31 }
 0x1a2   : > { %6524 = vst [vmem:[#allocation49_spill] sm:$0xff] %v4342_v13  ;;  %v759_v13 = vadd.f32 %v743_v43, %v710_v39  ;;  %v809_v4 = vadd.f32 %v793_v5, %v760_v46 }
 0x1a3   : > { %6525 = vst [vmem:[#allocation50_spill] sm:$0xff] %v4345_v21 }
 0x1a4   : > { %6526 = vst [vmem:[#allocation51_spill] sm:$0xff] %v4347_v34  ;;  %v4374_v40 = vld [vmem:[#allocation2 + $0xee] sm:$0xff]  ;;  %v808_v9 = vadd.f32 %v792_v42, %v759_v13  ;;  %v858_v20 = vadd.f32 %v842_v19, %v809_v4 }
 0x1a5   : > { %6527 = vst [vmem:[#allocation52_spill] sm:$0xff] %v4349_v38  ;;  %v4376_v39 = vld [vmem:[#allocation2 + $0xef] sm:$0xff]  ;;  %v648_v14 = vmul.f32 %v3833_v30, %v4374_v40  ;;  %v503_v7 = vpop.f32.mrf.mxu0 }
 0x1a6   : > { %6528 = vst [vmem:[#allocation53_spill] sm:$0xff] %v4355_v18  ;;  %v4378_v43 = vld [vmem:[#allocation2 + $0xf0] sm:$0xff]  ;;  %v697_v23 = vmul.f32 %v3836_v31, %v4376_v39  ;;  %v857_v22 = vadd.f32 %v841_v48, %v808_v9  ;;  %v504_v5 = vadd.f32 %v4409_v8, %v503_v7  ;;  %v892_v18 = vmul.f32 %v6532_v12, %v4374_v40  ;;  %v6536_v7 = vld [vmem:[#allocation12_spill] sm:$0xff] }
 0x1a7   : > { %6530 = vst [vmem:[#allocation54_spill] sm:$0xff] %v4361_v52  ;;  %v6534_v52 = vld [vmem:[#allocation11_spill] sm:$0xff]  ;;  %v746_v55 = vmul.f32 %v6499_v11, %v4378_v43  ;;  %v4392_v6 = vld [vmem:[#allocation2 + $0xe9] sm:$0xff]  ;;  %v941_v9 = vmul.f32 %v6533_v49, %v4376_v39 }
 0x1a8   : > { %596 = vst.msk [vmem:[#allocation2 + $0x108] sm:$0xff] %vm253_vm1, %v563_v24  ;;  %v989_v24 = vmul.f32 %v6534_v52, %v4301_v61  ;;  %v4394_v13 = vld [vmem:[#allocation2 + $0xf1] sm:$0xff]  ;;  %v794_v28 = vmul.f32 %v6529_v45, %v4392_v6  ;;  %v713_v46 = vadd.f32 %v697_v23, %v648_v14  ;;  %v907_v38 = vadd.f32 %v891_v16, %v857_v22 }
 0x1a9   : > { %v4396_v42 = vld [vmem:[#allocation2 + $0xea] sm:$0xff]  ;;  %v795_v30 = vmul.f32 %v6529_v45, %v4394_v13  ;;  %v4402_v62 = vld [vmem:[#allocation2 + $0xf2] sm:$0xff]  ;;  %v564_v48 = vmax.f32 %v504_v5, 0.0  ;;  %v990_v21 = vmul.f32 %v6534_v52, %v4378_v43  ;;  %v1038_v14 = vmul.f32 %v6536_v7, %v4392_v6 }
 0x1aa   : > { %6535 = vst [vmem:[#allocation55_spill] sm:$0xff] %v4402_v62  ;;  %v843_v31 = vmul.f32 %v6531_v15, %v4396_v42  ;;  %v844_v61 = vmul.f32 %v6531_v15, %v4402_v62  ;;  %v810_v60 = vadd.f32 %v794_v28, %v761_v58  ;;  %v762_v2 = vadd.f32 %v746_v55, %v713_v46 }
 0x1ab   : > { %v908_v19 = vadd.f32 %v892_v18, %v858_v20  ;;  %v956_v22 = vadd.f32 %v940_v56, %v907_v38  ;;  %v1039_v16 = vmul.f32 %v6536_v7, %v4394_v13  ;;  %597 = vst.msk [vmem:[#allocation2 + $0x110] sm:$0xff] %vm253_vm1, %v564_v48  ;;  %v1087_v38 = vmul.f32 %v3959_v26, %v4396_v42 }
 0x1ac   : > { %v859_v23 = vadd.f32 %v843_v31, %v810_v60  ;;  %v811_v55 = vadd.f32 %v795_v30, %v762_v2  ;;  %v1088_v20 = vmul.f32 %v3959_v26, %v4402_v62  ;;  %v6538_v30 = vpack.c.bf16 %v4216_v36, %v4194_v54 }
 0x1ad   : > { %v957_v5 = vadd.f32 %v941_v9, %v908_v19  ;;  %v1005_v46 = vadd.f32 %v989_v24, %v956_v22  ;;  %v709_v22 = vadd.f32 %v693_v59, %v644_v57  ;;  %v742_v54 = vmul.f32 %v4256_v51, %v6499_v11 }
 0x1ae   : > { %3580 = vmatmul.msk.bf16.gmra.mxu3 %vm413_vm0, %v6538_v30  ;;  %v860_v2 = vadd.f32 %v844_v61, %v811_v55  ;;  %v757_v36 = vadd.f32 %v4250_v50, %v4247_v27  ;;  %v790_v61 = vmul.f32 %v4263_v33, %v6529_v45  ;;  %v840_v51 = vmul.f32 %v4277_v25, %v6531_v15 }
 0x1af   : > { %v4422_v34 = vld [vmem:[#allocation2 + $0x106] sm:$0xff]  ;;  %v1006_v24 = vadd.f32 %v990_v21, %v957_v5  ;;  %v1054_v48 = vadd.f32 %v1038_v14, %v1005_v46  ;;  %v791_v21 = vmul.f32 %v4265_v17, %v6529_v45  ;;  %v839_v14 = vmul.f32 %v4267_v32, %v6531_v15 }
 0x1b0   : > { %v4424_v4 = vld [vmem:[#allocation2 + $0x107] sm:$0xff]  ;;  %v893_v28 = vmul.f32 %v6532_v12, %v4422_v34  ;;  %v1136_v56 = vmul.f32 %v3976_v44, %v4422_v34  ;;  %v758_v57 = vadd.f32 %v742_v54, %v709_v22  ;;  %v806_v59 = vadd.f32 %v790_v61, %v757_v36 }
 0x1b1   : > { %v4426_v58 = vld [vmem:[#allocation2 + $0x108] sm:$0xff]  ;;  %v942_v31 = vmul.f32 %v6533_v49, %v4424_v4  ;;  %v1185_v9 = vmul.f32 %v3986_v0, %v4424_v4  ;;  %v1103_v55 = vadd.f32 %v1087_v38, %v1054_v48  ;;  %v889_v17 = vmul.f32 %v6532_v12, %v4285_v10 }
 0x1b2   : > { %6537 = vst [vmem:[#allocation56_spill] sm:$0xff] %v4426_v58  ;;  %v991_v60 = vmul.f32 %v6534_v52, %v4426_v58  ;;  %v909_v18 = vadd.f32 %v893_v28, %v859_v23  ;;  %v1234_v19 = vmul.f32 %v6501_v37, %v4426_v58  ;;  %v1055_v23 = vadd.f32 %v1039_v16, %v1006_v24  ;;  %v4465_v27 = vld [vmem:[#allocation2 + $0x10f] sm:$0xff] }
 0x1b3   : > { %v4467_v50 = vld [vmem:[#allocation2 + $0x110] sm:$0xff]  ;;  %v1152_v16 = vadd.f32 %v1136_v56, %v1103_v55  ;;  %v890_v32 = vmul.f32 %v6532_v12, %v4304_v1  ;;  %v943_v25 = vmul.f32 %v6533_v49, %v4465_v27  ;;  %v506_v30 = vpop.f32.mrf.mxu3  ;;  %v1186_v22 = vmul.f32 %v3986_v0, %v4465_v27 }
 0x1b4   : > { %v958_v62 = vadd.f32 %v942_v31, %v909_v18  ;;  %v4463_v31 = vld [vmem:[#allocation2 + $0x10e] sm:$0xff]  ;;  %v1104_v33 = vadd.f32 %v1088_v20, %v1055_v23  ;;  %v507_v54 = vadd.f32 %v4409_v8, %v506_v30  ;;  %v1235_v1 = vmul.f32 %v6501_v37, %v4467_v50 }
 0x1b5   : > { %v4479_v5 = vld [vmem:[#allocation2 + $0x109] sm:$0xff]  ;;  %v4481_v46 = vld [vmem:[#allocation2 + $0x111] sm:$0xff]  ;;  %v1137_v20 = vmul.f32 %v3976_v44, %v4463_v31  ;;  %v1201_v11 = vadd.f32 %v1185_v9, %v1152_v16  ;;  %v807_v16 = vadd.f32 %v791_v21, %v758_v57 }
 0x1b6   : > { %v1007_v28 = vadd.f32 %v991_v60, %v958_v62  ;;  %v894_v62 = vmul.f32 %v6532_v12, %v4463_v31  ;;  %v992_v60 = vmul.f32 %v6534_v52, %v4467_v50  ;;  %v4483_v38 = vld [vmem:[#allocation2 + $0x10a] sm:$0xff]  ;;  %v1040_v18 = vmul.f32 %v6536_v7, %v4479_v5  ;;  %v4491_v24 = vld [vmem:[#allocation2 + $0x112] sm:$0xff] }
 0x1b7   : > { %v1041_v56 = vmul.f32 %v6536_v7, %v4481_v46  ;;  %v1089_v48 = vmul.f32 %v3959_v26, %v4483_v38  ;;  %v1090_v61 = vmul.f32 %v3959_v26, %v4491_v24  ;;  %v1153_v23 = vadd.f32 %v1137_v20, %v1104_v33  ;;  %v6540_v21 = vld [vmem:[#allocation50_spill] sm:$0xff] }
 0x1b8   : > { %v910_v36 = vadd.f32 %v894_v62, %v860_v2  ;;  %v1056_v55 = vadd.f32 %v1040_v18, %v1007_v28  ;;  %v1283_v10 = vmul.f32 %v6506_v3, %v4479_v5  ;;  %v565_v12 = vmax.f32 %v507_v54, 0.0 }
 0x1b9   : > { %v1202_v45 = vadd.f32 %v1186_v22, %v1153_v23  ;;  %v1284_v58 = vmul.f32 %v6506_v3, %v4481_v46  ;;  %v1250_v2 = vadd.f32 %v1234_v19, %v1201_v11  ;;  %v1332_v62 = vmul.f32 %v6508_v41, %v4483_v38 }
 0x1ba   : > { %v959_v15 = vadd.f32 %v943_v25, %v910_v36  ;;  %v1105_v30 = vadd.f32 %v1089_v48, %v1056_v55  ;;  %v1333_v9 = vmul.f32 %v6508_v41, %v4491_v24  ;;  %598 = vst.msk [vmem:[#allocation2 + $0x128] sm:$0xff] %vm253_vm1, %v565_v12  ;;  %v855_v20 = vadd.f32 %v839_v14, %v806_v59  ;;  %v6541_v14 = vld [vmem:[#allocation33_spill] sm:$0xff] }
 0x1bb   : > { %v1251_v33 = vadd.f32 %v1235_v1, %v1202_v45  ;;  %v1299_v18 = vadd.f32 %v1283_v10, %v1250_v2  ;;  %v938_v25 = vmul.f32 %v6533_v49, %v4306_v63  ;;  %v939_v48 = vmul.f32 %v6533_v49, %v4308_v35  ;;  %v508_v23 = vpop.f32.mrf.mxu3  ;;  %v6539_v45 = vld [vmem:[#allocation51_spill] sm:$0xff]  ;;  %v6544_v2 = vld [vmem:[#allocation53_spill] sm:$0xff] }
 0x1bc   : > { %v1008_v28 = vadd.f32 %v992_v60, %v959_v15  ;;  %v987_v11 = vmul.f32 %v6534_v52, %v4328_v29  ;;  %v856_v54 = vadd.f32 %v840_v51, %v807_v16  ;;  %v905_v36 = vadd.f32 %v889_v17, %v855_v20  ;;  %v6551_v29 = vld [vmem:[#allocation55_spill] sm:$0xff] }
 0x1bd   : > { %v1300_v22 = vadd.f32 %v1284_v58, %v1251_v33  ;;  %v1348_v12 = vadd.f32 %v1332_v62, %v1299_v18  ;;  %v988_v1 = vmul.f32 %v6534_v52, %v4336_v53  ;;  %v1036_v10 = vmul.f32 %v6536_v7, %v4338_v47 }
 0x1be   : > { %v1057_v19 = vadd.f32 %v1041_v56, %v1008_v28  ;;  %v1037_v15 = vmul.f32 %v6536_v7, %v6539_v45  ;;  %v6542_v57 = vpack.c.bf16 %v6540_v21, %v6541_v14  ;;  %v509_v58 = vadd.f32 %v4409_v8, %v508_v23  ;;  %v6543_v56 = vld [vmem:[#allocation52_spill] sm:$0xff]  ;;  %v6545_v28 = vld [vmem:[#allocation39_spill] sm:$0xff] }
 0x1bf   : > { %v4530_v51 = vadd.f32 %v1333_v9, %v1300_v22  ;;  %v906_v17 = vadd.f32 %v890_v32, %v856_v54  ;;  %v954_v60 = vadd.f32 %v938_v25, %v905_v36  ;;  %v1085_v55 = vmul.f32 %v3959_v26, %v6543_v56  ;;  %v6547_v36 = vld [vmem:[#allocation41_spill] sm:$0xff]  ;;  %v6548_v21 = vld [vmem:[#allocation20_spill] sm:$0xff] }
 0x1c0   : > { %3581 = vmatmul.msk.bf16.gmra.mxu3 %vm413_vm0, %v6542_v57  ;;  %v4528_v59 = vadd.f32 %v1090_v61, %v1057_v19  ;;  %v1086_v62 = vmul.f32 %v3959_v26, %v6544_v2  ;;  %v1134_v33 = vmul.f32 %v3976_v44, %v6545_v28  ;;  %v566_v16 = vmax.f32 %v509_v58, 0.0  ;;  %v6546_v61 = vld [vmem:[#allocation40_spill] sm:$0xff]  ;;  %v6549_v57 = vld [vmem:[#allocation21_spill] sm:$0xff] }
 0x1c1   : > { %v955_v20 = vadd.f32 %v939_v48, %v906_v17  ;;  %v1135_v18 = vmul.f32 %v3976_v44, %v4374_v40  ;;  %v1183_v9 = vmul.f32 %v3986_v0, %v6546_v61  ;;  %v4542_v19 = vld [vmem:[#allocation2 + $0x126] sm:$0xff]  ;;  %v1003_v22 = vadd.f32 %v987_v11, %v954_v60 }
 0x1c2   : > { %v4544_v32 = vld [vmem:[#allocation2 + $0x127] sm:$0xff]  ;;  %v4550_v54 = vmul.f32 %v3986_v0, %v4376_v39  ;;  %v4554_v48 = vmul.f32 %v6501_v37, %v6547_v36  ;;  %v4558_v40 = vmul.f32 %v6501_v37, %v4378_v43  ;;  %599 = vst.msk [vmem:[#allocation2 + $0x130] sm:$0xff] %vm253_vm1, %v566_v16  ;;  %v1138_v23 = vmul.f32 %v3976_v44, %v4542_v19  ;;  %v6550_v43 = vld [vmem:[#allocation22_spill] sm:$0xff] }
 0x1c3   : > { %v4546_v25 = vld [vmem:[#allocation2 + $0x128] sm:$0xff]  ;;  %v1187_v11 = vmul.f32 %v3986_v0, %v4544_v32  ;;  %v1382_v14 = vmul.f32 %v6548_v21, %v4542_v19  ;;  %v1431_v58 = vmul.f32 %v6549_v57, %v4544_v32  ;;  %v1004_v60 = vadd.f32 %v988_v1, %v955_v20  ;;  %v511_v56 = vpop.f32.mrf.mxu3 }
 0x1c4   : > { %v1236_v39 = vmul.f32 %v6501_v37, %v4546_v25  ;;  %v1480_v17 = vmul.f32 %v6550_v43, %v4546_v25  ;;  %v1052_v28 = vadd.f32 %v1036_v10, %v1003_v22  ;;  %v1154_v16 = vadd.f32 %v1138_v23, %v1105_v30 }
 0x1c5   : > { %v1398_v61 = vadd.f32 %v1382_v14, %v1348_v12  ;;  %v4575_v36 = vmul.f32 %v6506_v3, %v4392_v6  ;;  %v4579_v2 = vmul.f32 %v6506_v3, %v4394_v13  ;;  %v1053_v45 = vadd.f32 %v1037_v15, %v1004_v60 }
 0x1c6   : > { %v1101_v47 = vadd.f32 %v1085_v55, %v1052_v28  ;;  %v4583_v53 = vmul.f32 %v6508_v41, %v4396_v42  ;;  %v4587_v1 = vmul.f32 %v6508_v41, %v6551_v29  ;;  %v512_v30 = vadd.f32 %v4409_v8, %v511_v56 }
 0x1c7   : > { %v1203_v12 = vadd.f32 %v1187_v11, %v1154_v16  ;;  %v1447_v6 = vadd.f32 %v1431_v58, %v1398_v61  ;;  %v4592_v10 = vmul.f32 %v6548_v21, %v4422_v34  ;;  %v1102_v13 = vadd.f32 %v1086_v62, %v1053_v45  ;;  %v6552_v62 = vld [vmem:[#allocation56_spill] sm:$0xff] }
 0x1c8   : > { %v1150_v20 = vadd.f32 %v1134_v33, %v1101_v47  ;;  %v4596_v15 = vmul.f32 %v6548_v21, %v4463_v31  ;;  %v4600_v42 = vmul.f32 %v6549_v57, %v4424_v4  ;;  %v567_v29 = vmax.f32 %v512_v30, 0.0 }
 0x1c9   : > { %v1252_v55 = vadd.f32 %v1236_v39, %v1203_v12  ;;  %v1496_v22 = vadd.f32 %v1480_v17, %v1447_v6  ;;  %v4604_v56 = vmul.f32 %v6549_v57, %v4465_v27  ;;  %v4606_v23 = vld [vmem:[#allocation2 + $0x12e] sm:$0xff]  ;;  %v1151_v45 = vadd.f32 %v1135_v18, %v1102_v13 }
 0x1ca   : > { %v4608_v34 = vld [vmem:[#allocation2 + $0x12f] sm:$0xff]  ;;  %v1199_v31 = vadd.f32 %v1183_v9, %v1150_v20  ;;  %v4614_v33 = vmul.f32 %v6550_v43, %v6552_v62  ;;  %v4618_v4 = vmul.f32 %v6550_v43, %v4467_v50  ;;  %600 = vst.msk [vmem:[#allocation2 + $0x148] sm:$0xff] %vm253_vm1, %v567_v29  ;;  %v1139_v27 = vmul.f32 %v3976_v44, %v4606_v23  ;;  %v6553_v29 = vld [vmem:[#allocation23_spill] sm:$0xff] }
 0x1cb   : > { %v4610_v47 = vld [vmem:[#allocation2 + $0x130] sm:$0xff]  ;;  %v1188_v11 = vmul.f32 %v3986_v0, %v4608_v34  ;;  %v1383_v50 = vmul.f32 %v6548_v21, %v4606_v23  ;;  %v1432_v16 = vmul.f32 %v6549_v57, %v4608_v34  ;;  %v513_v13 = vpop.f32.mrf.mxu3  ;;  %v4664_v7 = vmul.f32 %v6553_v29, %v4479_v5 }
 0x1cc   : > { %v1237_v18 = vmul.f32 %v6501_v37, %v4610_v47  ;;  %v4627_v9 = vld [vmem:[#allocation2 + $0x129] sm:$0xff]  ;;  %v4629_v39 = vld [vmem:[#allocation2 + $0x131] sm:$0xff]  ;;  %v1155_v61 = vadd.f32 %v1139_v27, %v4528_v59  ;;  %v1481_v6 = vmul.f32 %v6550_v43, %v4610_v47  ;;  %v6554_v37 = vld [vmem:[#allocation24_spill] sm:$0xff]  ;;  %v514_v59 = vadd.f32 %v4409_v8, %v513_v13 }
 0x1cd   : > { %v4631_v14 = vld [vmem:[#allocation2 + $0x12a] sm:$0xff]  ;;  %v1285_v58 = vmul.f32 %v6506_v3, %v4627_v9  ;;  %v1286_v17 = vmul.f32 %v6506_v3, %v4629_v39  ;;  %v4639_v60 = vld [vmem:[#allocation2 + $0x132] sm:$0xff]  ;;  %v1399_v12 = vadd.f32 %v1383_v50, %v4530_v51  ;;  %v1529_v62 = vmul.f32 %v6553_v29, %v4627_v9 }
 0x1ce   : > { %v1334_v28 = vmul.f32 %v6508_v41, %v4631_v14  ;;  %v1335_v30 = vmul.f32 %v6508_v41, %v4639_v60  ;;  %v1530_v3 = vmul.f32 %v6553_v29, %v4629_v39  ;;  %v1578_v35 = vmul.f32 %v6554_v37, %v4631_v14 }
 0x1cf   : > { %v1301_v20 = vadd.f32 %v1285_v58, %v1252_v55  ;;  %v1204_v27 = vadd.f32 %v1188_v11, %v1155_v61  ;;  %v1448_v41 = vadd.f32 %v1432_v16, %v1399_v12  ;;  %v1579_v51 = vmul.f32 %v6554_v37, %v4639_v60 }
 0x1d0   : > { %v1545_v0 = vadd.f32 %v1529_v62, %v1496_v22  ;;  %v1200_v55 = vadd.f32 %v4550_v54, %v1151_v45  ;;  %v1248_v58 = vadd.f32 %v4554_v48, %v1199_v31  ;;  %v568_v63 = vmax.f32 %v514_v59, 0.0  ;;  %v6555_v31 = vld [vmem:[#allocation25_spill] sm:$0xff] }
 0x1d1   : > { %v1350_v50 = vadd.f32 %v1334_v28, %v1301_v20  ;;  %v1253_v44 = vadd.f32 %v1237_v18, %v1204_v27  ;;  %v1497_v26 = vadd.f32 %v1481_v6, %v1448_v41  ;;  %v1367_v52 = vld [vmem:[#allocation2 + $0x146] sm:$0xff]  ;;  %v4670_v54 = vmul.f32 %v6553_v29, %v4481_v46  ;;  %v6557_v18 = vld [vmem:[#allocation27_spill] sm:$0xff] }
 0x1d2   : > { %v1416_v13 = vld [vmem:[#allocation2 + $0x147] sm:$0xff]  ;;  %v1594_v16 = vadd.f32 %v1578_v35, %v1545_v0  ;;  %v1249_v61 = vadd.f32 %v4558_v40, %v1200_v55  ;;  %v1297_v28 = vadd.f32 %v4575_v36, %v1248_v58  ;;  %601 = vst.msk [vmem:[#allocation2 + $0x150] sm:$0xff] %vm253_vm1, %v568_v63  ;;  %v1384_v41 = vmul.f32 %v6548_v21, %v1367_v52  ;;  %v6556_v35 = vld [vmem:[#allocation26_spill] sm:$0xff] }
 0x1d3   : > { %v1465_v11 = vld [vmem:[#allocation2 + $0x148] sm:$0xff]  ;;  %v1302_v48 = vadd.f32 %v1286_v17, %v1253_v44  ;;  %v1433_v5 = vmul.f32 %v6549_v57, %v1416_v13  ;;  %v1546_v45 = vadd.f32 %v1530_v3, %v1497_v26  ;;  %v1628_v0 = vmul.f32 %v6555_v31, %v1367_v52  ;;  %v516_v44 = vpop.f32.mrf.mxu3 }
 0x1d4   : > { %v1482_v22 = vmul.f32 %v6550_v43, %v1465_v11  ;;  %v1677_v40 = vmul.f32 %v6556_v35, %v1416_v13  ;;  %v1726_v36 = vmul.f32 %v6557_v18, %v1465_v11  ;;  %v1400_v6 = vadd.f32 %v1384_v41, %v1350_v50  ;;  %v771_v59 = vld [vmem:[#allocation2 + $0x89] sm:$0xff] }
 0x1d5   : > { %v1351_v12 = vadd.f32 %v1335_v30, %v1302_v48  ;;  %v1298_v46 = vadd.f32 %v4579_v2, %v1249_v61  ;;  %v1346_v63 = vadd.f32 %v4583_v53, %v1297_v28  ;;  %v1595_v17 = vadd.f32 %v1579_v51, %v1546_v45  ;;  %v772_v53 = vld [vmem:[#allocation2 + $0x91] sm:$0xff]  ;;  %v6559_v61 = vld [vmem:[#allocation32_spill] sm:$0xff] }
 0x1d6   : > { %v1644_v20 = vadd.f32 %v1628_v0, %v1594_v16  ;;  %v4683_v62 = vmul.f32 %v6554_v37, %v4483_v38  ;;  %v4687_v26 = vmul.f32 %v6554_v37, %v4491_v24  ;;  %v517_v3 = vadd.f32 %v4409_v8, %v516_v44 }
 0x1d7   : > { %v1449_v52 = vadd.f32 %v1433_v5, %v1400_v6  ;;  %v1347_v30 = vadd.f32 %v4587_v1, %v1298_v46  ;;  %v1396_v2 = vadd.f32 %v4592_v10, %v1346_v63  ;;  %v4694_v51 = vmul.f32 %v6555_v31, %v4542_v19  ;;  %v6558_v19 = vld [vmem:[#allocation34_spill] sm:$0xff]  ;;  %v4727_v63 = vld [vmem:[%s6248_s3 + $0x18] ss:$0 sm:$0xff] }
 0x1d8   : > { %v1693_v27 = vadd.f32 %v1677_v40, %v1644_v20  ;;  %v4698_v38 = vmul.f32 %v6556_v35, %v4544_v32  ;;  %v4702_v24 = vmul.f32 %v6557_v18, %v4546_v25  ;;  %v569_v50 = vmax.f32 %v517_v3, 0.0  ;;  %v6560_v32 = vld [vmem:[#allocation7_spill] sm:$0xff] }
 0x1d9   : > { %v1498_v55 = vadd.f32 %v1482_v22, %v1449_v52  ;;  %v1397_v1 = vadd.f32 %v4596_v15, %v1347_v30  ;;  %v1445_v10 = vadd.f32 %v4600_v42, %v1396_v2  ;;  %v1368_v58 = vld [vmem:[#allocation2 + $0x14e] sm:$0xff]  ;;  %v4708_v28 = vadd.f32 %v6559_v61, %v6558_v19 }
 0x1da   : > { %v1417_v13 = vld [vmem:[#allocation2 + $0x14f] sm:$0xff]  ;;  %v1742_v16 = vadd.f32 %v1726_v36, %v1693_v27  ;;  %v4711_v48 = vmul.f32 %v6560_v32, %v771_v59  ;;  %v4714_v25 = vmul.f32 %v6560_v32, %v772_v53  ;;  %602 = vst.msk [vmem:[#allocation2 + $0x168] sm:$0xff] %vm253_vm1, %v569_v50  ;;  %v1385_v15 = vmul.f32 %v6548_v21, %v1368_v58  ;;  %v6561_v53 = vld [vmem:[#allocation19_spill] sm:$0xff] }
 0x1db   : > { %v1466_v11 = vld [vmem:[#allocation2 + $0x150] sm:$0xff]  ;;  %v1434_v42 = vmul.f32 %v6549_v57, %v1417_v13  ;;  %v1629_v0 = vmul.f32 %v6555_v31, %v1368_v58  ;;  %v1678_v44 = vmul.f32 %v6556_v35, %v1417_v13  ;;  %v518_v2 = vpop.f32.mrf.mxu3 }
 0x1dc   : > { %v1483_v41 = vmul.f32 %v6550_v43, %v1466_v11  ;;  %v1514_v5 = vld [vmem:[#allocation2 + $0x149] sm:$0xff]  ;;  %v1515_v22 = vld [vmem:[#allocation2 + $0x151] sm:$0xff]  ;;  %v1401_v20 = vadd.f32 %v1385_v15, %v1351_v12  ;;  %v1727_v30 = vmul.f32 %v6557_v18, %v1466_v11  ;;  %v519_v19 = vadd.f32 %v4409_v8, %v518_v2 }
 0x1dd   : > { %v1563_v45 = vld [vmem:[#allocation2 + $0x14a] sm:$0xff]  ;;  %v1531_v40 = vmul.f32 %v6553_v29, %v1514_v5  ;;  %v1532_v36 = vmul.f32 %v6553_v29, %v1515_v22  ;;  %v1564_v6 = vld [vmem:[#allocation2 + $0x152] sm:$0xff]  ;;  %v1645_v52 = vadd.f32 %v1629_v0, %v1595_v17  ;;  %v1775_v27 = vmul.f32 %v6561_v53, %v1514_v5  ;;  %v4742_v5 = vld [vmem:[%s6249_s4] ss:$0 sm:$0xff] }
 0x1de   : > { %v1580_v46 = vmul.f32 %v6554_v37, %v1563_v45  ;;  %v1581_v3 = vmul.f32 %v6554_v37, %v1564_v6  ;;  %v1776_v50 = vmul.f32 %v6561_v53, %v1515_v22  ;;  %v1824_v58 = vmul.f32 %v4727_v63, %v1563_v45 }
 0x1df   : > { %v1547_v59 = vadd.f32 %v1531_v40, %v1498_v55  ;;  %v1450_v61 = vadd.f32 %v1434_v42, %v1401_v20  ;;  %v1694_v32 = vadd.f32 %v1678_v44, %v1645_v52  ;;  %v1825_v13 = vmul.f32 %v4727_v63, %v1564_v6 }
 0x1e0   : > { %v1791_v15 = vadd.f32 %v1775_v27, %v1742_v16  ;;  %v1446_v17 = vadd.f32 %v4604_v56, %v1397_v1  ;;  %v1494_v11 = vadd.f32 %v4614_v33, %v1445_v10  ;;  %v570_v0 = vmax.f32 %v519_v19, 0.0 }
 0x1e1   : > { %v1596_v12 = vadd.f32 %v1580_v46, %v1547_v59  ;;  %v1499_v55 = vadd.f32 %v1483_v41, %v1450_v61  ;;  %v1743_v22 = vadd.f32 %v1727_v30, %v1694_v32  ;;  %v1627_v42 = vmul.f32 %v6555_v31, %v4606_v23  ;;  %v1613_v45 = vld [vmem:[#allocation2 + $0x166] sm:$0xff] }
 0x1e2   : > { %v1662_v40 = vld [vmem:[#allocation2 + $0x167] sm:$0xff]  ;;  %v1840_v16 = vadd.f32 %v1824_v58, %v1791_v15  ;;  %v1495_v56 = vadd.f32 %v4618_v4, %v1446_v17  ;;  %v1543_v33 = vadd.f32 %v4664_v7, %v1494_v11  ;;  %v1676_v1 = vmul.f32 %v6556_v35, %v4608_v34  ;;  %603 = vst.msk [vmem:[#allocation2 + $0x170] sm:$0xff] %vm253_vm1, %v570_v0  ;;  %v6562_v15 = vld [vmem:[#allocation35_spill] sm:$0xff] }
 0x1e3   : > { %v1711_v6 = vld [vmem:[#allocation2 + $0x168] sm:$0xff]  ;;  %v1548_v10 = vadd.f32 %v1532_v36, %v1499_v55  ;;  %v1630_v41 = vmul.f32 %v6555_v31, %v1613_v45  ;;  %v1679_v32 = vmul.f32 %v6556_v35, %v1662_v40  ;;  %v1792_v46 = vadd.f32 %v1776_v50, %v1743_v22  ;;  %v521_v30 = vpop.f32.mrf.mxu3  ;;  %v821_v11 = vld [vmem:[#allocation2 + $0x92] sm:$0xff] }
 0x1e4   : > { %v1728_v23 = vmul.f32 %v6557_v18, %v1711_v6  ;;  %v1859_v44 = vadd.f32 %v4742_v5, %v1840_v16  ;;  %v1544_v20 = vadd.f32 %v4670_v54, %v1495_v56  ;;  %v1592_v4 = vadd.f32 %v4683_v62, %v1543_v33  ;;  %v6563_v33 = vld [vmem:[#allocation8_spill] sm:$0xff] }
 0x1e5   : > { %v1597_v7 = vadd.f32 %v1581_v3, %v1548_v10  ;;  %v1646_v52 = vadd.f32 %v1630_v41, %v1596_v12  ;;  %v1725_v34 = vmul.f32 %v6557_v18, %v4610_v47  ;;  %v1773_v36 = vmul.f32 %v6561_v53, %v4627_v9 }
 0x1e6   : > { %v1841_v2 = vadd.f32 %v1825_v13, %v1792_v46  ;;  %v1875_v59 = vmax.f32 %v1859_v44, 0.0  ;;  %v1593_v27 = vadd.f32 %v4687_v26, %v1544_v20  ;;  %v1642_v50 = vadd.f32 %v4694_v51, %v1592_v4  ;;  %v820_v13 = vld [vmem:[#allocation2 + $0x8a] sm:$0xff] }
 0x1e7   : > { %v522_v58 = vadd.f32 %v4409_v8, %v521_v30  ;;  %v1695_v54 = vadd.f32 %v1679_v32, %v1646_v52  ;;  %v1774_v62 = vmul.f32 %v6561_v53, %v4629_v39  ;;  %v1822_v3 = vmul.f32 %v4727_v63, %v4631_v14  ;;  %v870_v39 = vld [vmem:[#allocation2 + $0xa6] sm:$0xff]  ;;  %v871_v20 = vld [vmem:[#allocation2 + $0xae] sm:$0xff] }
 0x1e8   : > { %v1860_v47 = vadd.f32 %v4742_v5, %v1841_v2  ;;  %v1891_v19 = vpack.c.bf16 %v1875_v59, %v1875_v59  ;;  %v1643_v9 = vadd.f32 %v1627_v42, %v1593_v27  ;;  %v1691_v61 = vadd.f32 %v4698_v38, %v1642_v50  ;;  %v6564_v59 = vld [vmem:[#allocation9_spill] sm:$0xff] }
 0x1e9   : > { %v571_v12 = vmax.f32 %v522_v58, 0.0  ;;  %v1744_v26 = vadd.f32 %v1728_v23, %v1695_v54  ;;  %v1823_v51 = vmul.f32 %v4727_v63, %v4639_v60  ;;  %v804_v17 = vadd.f32 %v4711_v48, %v6562_v15  ;;  %v1614_v0 = vld [vmem:[#allocation2 + $0x16e] sm:$0xff] }
 0x1ea   : > { %v1663_v55 = vld [vmem:[#allocation2 + $0x16f] sm:$0xff]  ;;  %v1876_v22 = vmax.f32 %v1860_v47, 0.0  ;;  %1908 = vst.msk [vmem:[#allocation3 + $0x30] sm:$0xf] %vm1895_vm3, %v1891_v19  ;;  %v1692_v42 = vadd.f32 %v1676_v1, %v1643_v9  ;;  %v1740_v38 = vadd.f32 %v4702_v24, %v1691_v61  ;;  %v805_v45 = vadd.f32 %v4714_v25, %v4708_v28 }
 0x1eb   : > { %v1712_v14 = vld [vmem:[#allocation2 + $0x170] sm:$0xff]  ;;  %604 = vst.msk [vmem:[#allocation2 + $0x188] sm:$0xff] %vm253_vm1, %v571_v12  ;;  %v1631_v60 = vmul.f32 %v6555_v31, %v1614_v0  ;;  %v1680_v48 = vmul.f32 %v6556_v35, %v1663_v55  ;;  %v837_v10 = vmul.f32 %v6563_v33, %v820_v13  ;;  %v523_v4 = vpop.f32.mrf.mxu3  ;;  %v838_v30 = vmul.f32 %v6563_v33, %v821_v11  ;;  %v968_v13 = vld [vmem:[#allocation2 + $0xa8] sm:$0xff] }
 0x1ec   : > { %v1729_v40 = vmul.f32 %v6557_v18, %v1712_v14  ;;  %v1760_v6 = vld [vmem:[#allocation2 + $0x169] sm:$0xff]  ;;  %v1761_v16 = vld [vmem:[#allocation2 + $0x171] sm:$0xff]  ;;  %v1892_v25 = vpack.c.bf16 %v1876_v22, %v1876_v22  ;;  %v1741_v46 = vadd.f32 %v1725_v34, %v1692_v42  ;;  %v1789_v44 = vadd.f32 %v1773_v36, %v1740_v38 }
 0x1ed   : > { %v1809_v56 = vld [vmem:[#allocation2 + $0x16a] sm:$0xff]  ;;  %v1777_v1 = vmul.f32 %v6561_v53, %v1760_v6  ;;  %v1778_v24 = vmul.f32 %v6561_v53, %v1761_v16  ;;  %v1810_v41 = vld [vmem:[#allocation2 + $0x172] sm:$0xff]  ;;  %v1647_v32 = vadd.f32 %v1631_v60, %v1597_v7  ;;  %v853_v2 = vadd.f32 %v837_v10, %v804_v17 }
 0x1ee   : > { %v1826_v28 = vmul.f32 %v4727_v63, %v1809_v56  ;;  %v1827_v23 = vmul.f32 %v4727_v63, %v1810_v41  ;;  %1909 = vst.msk [vmem:[#allocation3 + $0x34] sm:$0xf] %vm1895_vm3, %v1892_v25  ;;  %v887_v27 = vmul.f32 %v6564_v59, %v870_v39  ;;  %v524_v50 = vadd.f32 %v4409_v8, %v523_v4  ;;  %v919_v7 = vld [vmem:[#allocation2 + $0xa7] sm:$0xff]  ;;  %v920_v19 = vld [vmem:[#allocation2 + $0xaf] sm:$0xff]  ;;  %v6565_v38 = vld [vmem:[#allocation11_spill] sm:$0xff] }
 0x1ef   : > { %v1793_v52 = vadd.f32 %v1777_v1, %v1744_v26  ;;  %v1696_v58 = vadd.f32 %v1680_v48, %v1647_v32  ;;  %v1790_v54 = vadd.f32 %v1774_v62, %v1741_v46  ;;  %v1838_v47 = vadd.f32 %v1822_v3, %v1789_v44  ;;  %v969_v11 = vld [vmem:[#allocation2 + $0xb0] sm:$0xff]  ;;  %v6566_v1 = vld [vmem:[#allocation12_spill] sm:$0xff] }
 0x1f0   : > { %v854_v34 = vadd.f32 %v838_v30, %v805_v45  ;;  %v888_v36 = vmul.f32 %v6564_v59, %v871_v20  ;;  %v903_v61 = vadd.f32 %v887_v27, %v853_v2  ;;  %v572_v12 = vmax.f32 %v524_v50, 0.0  ;;  %v1017_v55 = vld [vmem:[#allocation2 + $0xa9] sm:$0xff]  ;;  %v1067_v25 = vld [vmem:[#allocation2 + $0xb2] sm:$0xff] }
 0x1f1   : > { %v1842_v9 = vadd.f32 %v1826_v28, %v1793_v52  ;;  %v1745_v26 = vadd.f32 %v1729_v40, %v1696_v58  ;;  %v1839_v15 = vadd.f32 %v1823_v51, %v1790_v54  ;;  %v1857_v17 = vadd.f32 %v4742_v5, %v1838_v47  ;;  %v1018_v51 = vld [vmem:[#allocation2 + $0xb1] sm:$0xff]  ;;  %v6568_v30 = vld [vmem:[#allocation37_spill] sm:$0xff] }
 0x1f2   : > { %v904_v0 = vadd.f32 %v888_v36, %v854_v34  ;;  %v936_v62 = vmul.f32 %v6533_v49, %v919_v7  ;;  %v937_v3 = vmul.f32 %v6533_v49, %v920_v19  ;;  %605 = vst.msk [vmem:[#allocation2 + $0x190] sm:$0xff] %vm253_vm1, %v572_v12  ;;  %v985_v45 = vmul.f32 %v6565_v38, %v968_v13  ;;  %v1066_v28 = vld [vmem:[#allocation2 + $0xaa] sm:$0xff]  ;;  %v6570_v36 = vld [vmem:[#allocation36_spill] sm:$0xff] }
 0x1f3   : > { %v1861_v39 = vadd.f32 %v4742_v5, %v1842_v9  ;;  %v1794_v14 = vadd.f32 %v1778_v24, %v1745_v26  ;;  %v1858_v22 = vadd.f32 %v4742_v5, %v1839_v15  ;;  %v1873_v42 = vmax.f32 %v1857_v17, 0.0  ;;  %v526_v32 = vpop.f32.mrf.mxu3  ;;  %v6567_v52 = vld [vmem:[#allocation54_spill] sm:$0xff]  ;;  %v6569_v47 = vld [vmem:[#allocation13_spill] sm:$0xff] }
 0x1f4   : > { %v952_v48 = vadd.f32 %v936_v62, %v903_v61  ;;  %v953_v40 = vadd.f32 %v937_v3, %v904_v0  ;;  %v986_v6 = vmul.f32 %v6565_v38, %v969_v11  ;;  %v1034_v41 = vmul.f32 %v6566_v1, %v1017_v55  ;;  %v6571_v61 = vld [vmem:[#allocation14_spill] sm:$0xff]  ;;  %v6574_v0 = vld [vmem:[#allocation15_spill] sm:$0xff]  ;;  %v4822_v3 = vld [vmem:[#allocation2 + $0xe6] sm:$0xff] }
 0x1f5   : > { %v1877_v60 = vmax.f32 %v1861_v39, 0.0  ;;  %v1843_v16 = vadd.f32 %v1827_v23, %v1794_v14  ;;  %v1874_v56 = vmax.f32 %v1858_v22, 0.0  ;;  %v1889_v10 = vpack.c.bf16 %v1873_v42, %v1873_v42  ;;  %v3666_v46 = vld [vmem:[#allocation3 + $0x30] sm:$0xff]  ;;  %v6573_v39 = vld [vmem:[#allocation43_spill] sm:$0xff]  ;;  %v4824_v55 = vld [vmem:[#allocation2 + $0xe7] sm:$0xff] }
 0x1f6   : > { %v1001_v44 = vadd.f32 %v985_v45, %v952_v48  ;;  %v1002_v20 = vadd.f32 %v986_v6, %v953_v40  ;;  %v1035_v4 = vmul.f32 %v6566_v1, %v1018_v51  ;;  %v4804_v2 = vadd.f32 %v6568_v30, %v6567_v52  ;;  %v6572_v12 = vld [vmem:[#allocation42_spill] sm:$0xff]  ;;  %v6575_v22 = vld [vmem:[#allocation44_spill] sm:$0xff]  ;;  %v6576_v45 = vld [vmem:[#allocation45_spill] sm:$0xff] }
 0x1f7   : > { %v1893_v24 = vpack.c.bf16 %v1877_v60, %v1877_v60  ;;  %v527_v27 = vadd.f32 %v4409_v8, %v526_v32  ;;  %v1862_v23 = vadd.f32 %v4742_v5, %v1843_v16  ;;  %v1890_v50 = vpack.c.bf16 %v1874_v56, %v1874_v56  ;;  %1906 = vst.msk [vmem:[#allocation3 + $0x28] sm:$0xf] %vm1895_vm3, %v1889_v10  ;;  %v6577_v51 = vld [vmem:[#allocation16_spill] sm:$0xff]  ;;  %v6578_v48 = vld [vmem:[#allocation46_spill] sm:$0xff]  ;;  %v4833_v6 = vld [vmem:[#allocation2 + $0xe8] sm:$0xff] }
 0x1f8   : > { %v1050_v58 = vadd.f32 %v1034_v41, %v1001_v44  ;;  %v1051_v54 = vadd.f32 %v1035_v4, %v1002_v20  ;;  %v1083_v7 = vmul.f32 %v6569_v47, %v1066_v28  ;;  %v1084_v19 = vmul.f32 %v6569_v47, %v1067_v25  ;;  %v6579_v10 = vld [vmem:[#allocation47_spill] sm:$0xff]  ;;  %v6580_v41 = vld [vmem:[#allocation17_spill] sm:$0xff]  ;;  %v6582_v44 = vld [vmem:[#allocation52_spill] sm:$0xff] }
 0x1f9   : > { %1910 = vst.msk [vmem:[#allocation3 + $0x38] sm:$0xf] %vm1895_vm3, %v1893_v24  ;;  %v573_v9 = vmax.f32 %v527_v27, 0.0  ;;  %v1878_v34 = vmax.f32 %v1862_v23, 0.0  ;;  %v1132_v13 = vmul.f32 %v6571_v61, %v6570_v36  ;;  %v1133_v26 = vmul.f32 %v6571_v61, %v6572_v12  ;;  %v6581_v25 = vld [vmem:[#allocation51_spill] sm:$0xff]  ;;  %v4839_v24 = vld [vmem:[#allocation2 + $0xc6] sm:$0xff] }
 0x1fa   : > { %1907 = vst.msk [vmem:[#allocation3 + $0x2c] sm:$0xf] %vm1895_vm3, %v1890_v50  ;;  %v4818_v15 = vsel %vm253_vm1, %v3666_v46, 0  ;;  %v1099_v17 = vadd.f32 %v1083_v7, %v1050_v58  ;;  %v1100_v11 = vadd.f32 %v1084_v19, %v1051_v54  ;;  %v1181_v62 = vmul.f32 %v6574_v0, %v6573_v39  ;;  %v4841_v46 = vld [vmem:[#allocation2 + $0xce] sm:$0xff] }
 0x1fb   : > { %606 = vst.msk [vmem:[#allocation2 + $0x1a8] sm:$0xff] %vm253_vm1, %v573_v9  ;;  %v1894_v14 = vpack.c.bf16 %v1878_v34, %v1878_v34  ;;  %v1182_v42 = vmul.f32 %v6574_v0, %v6575_v22  ;;  %v1230_v60 = vmul.f32 %v6577_v51, %v6576_v45  ;;  %v1231_v40 = vmul.f32 %v6577_v51, %v6578_v48  ;;  %v6583_v20 = vld [vmem:[#allocation18_spill] sm:$0xff]  ;;  %v6584_v52 = vld [vmem:[#allocation53_spill] sm:$0xff]  ;;  %v528_v7 = vpop.f32.mrf.mxu3  ;;  %v6589_v0 = vld [vmem:[#allocation48_spill] sm:$0xff] }
 0x1fc   : > { %v1148_v16 = vadd.f32 %v1132_v13, %v1099_v17  ;;  %v1149_v56 = vadd.f32 %v1133_v26, %v1100_v11  ;;  %v1279_v28 = vmul.f32 %v6580_v41, %v6579_v10  ;;  %v1280_v32 = vmul.f32 %v6580_v41, %v6581_v25  ;;  %v4848_v27 = vld [vmem:[#allocation2 + $0xee] sm:$0xff] }
 0x1fd   : > { %1911 = vst.msk [vmem:[#allocation3 + $0x3c] sm:$0xf] %vm1895_vm3, %v1894_v14  ;;  %v1328_v4 = vmul.f32 %v6583_v20, %v6582_v44  ;;  %v1329_v30 = vmul.f32 %v6583_v20, %v6584_v52  ;;  %v1378_v23 = vmul.f32 %v6548_v21, %v4822_v3  ;;  %v4852_v50 = vld [vmem:[#allocation2 + $0xef] sm:$0xff]  ;;  %v1427_v58 = vmul.f32 %v6549_v57, %v4824_v55  ;;  %v4881_v22 = vld [vmem:[#allocation2 + $0xc7] sm:$0xff] }
 0x1fe   : > { %v4856_v54 = vld [vmem:[#allocation2 + $0xf0] sm:$0xff]  ;;  %v1197_v19 = vadd.f32 %v1181_v62, %v1148_v16  ;;  %v1198_v9 = vadd.f32 %v1182_v42, %v1149_v56  ;;  %v1379_v34 = vmul.f32 %v6548_v21, %v4848_v27  ;;  %v4862_v36 = vmul.f32 %v6550_v43, %v4833_v6  ;;  %v4891_v10 = vld [vmem:[#allocation2 + $0xc8] sm:$0xff] }
 0x1ff   : > { %v4864_v13 = vld [vmem:[#allocation2 + $0xe9] sm:$0xff]  ;;  %v4866_v12 = vld [vmem:[#allocation2 + $0xf1] sm:$0xff]  ;;  %v529_v17 = vadd.f32 %v4409_v8, %v528_v7  ;;  %v1428_v11 = vmul.f32 %v6549_v57, %v4852_v50  ;;  %v1477_v39 = vmul.f32 %v6550_v43, %v4856_v54  ;;  %6585 = vst [vmem:[#allocation50_spill] sm:$0xff] %v4891_v10 }
 0x200   : > { %v4868_v26 = vld [vmem:[#allocation2 + $0xea] sm:$0xff]  ;;  %v4877_v62 = vmul.f32 %v6553_v29, %v4864_v13  ;;  %v4879_v14 = vld [vmem:[#allocation2 + $0xf2] sm:$0xff]  ;;  %v1246_v45 = vadd.f32 %v1230_v60, %v1197_v19  ;;  %v1247_v48 = vadd.f32 %v1231_v40, %v1198_v9  ;;  %v1526_v8 = vmul.f32 %v6553_v29, %v4866_v12 }
 0x201   : > { %v3665_v42 = vld [vmem:[#allocation3 + $0x28] sm:$0xff]  ;;  %v4887_v16 = vmul.f32 %v6554_v37, %v4868_v26  ;;  %v574_v25 = vmax.f32 %v529_v17, 0.0  ;;  %v4895_v44 = vmul.f32 %v6554_v37, %v4879_v14  ;;  %v1376_v60 = vmul.f32 %v6548_v21, %v4839_v24  ;;  %v4901_v52 = vld [vmem:[#allocation2 + $0xd0] sm:$0xff] }
 0x202   : > { %v4889_v56 = vld [vmem:[#allocation2 + $0xcf] sm:$0xff]  ;;  %v1377_v40 = vmul.f32 %v6548_v21, %v4841_v46  ;;  %v4906_v19 = vsel %vm253_vm1, %v3665_v42, 0  ;;  %v1295_v9 = vadd.f32 %v1279_v28, %v1246_v45  ;;  %v1296_v20 = vadd.f32 %v1280_v32, %v1247_v48 }
 0x203   : > { %v4903_v7 = vld [vmem:[#allocation2 + $0xc9] sm:$0xff]  ;;  %v1425_v17 = vmul.f32 %v6549_v57, %v4881_v22  ;;  %v4910_v41 = vld [vmem:[#allocation2 + $0xd1] sm:$0xff]  ;;  %607 = vst.msk [vmem:[#allocation2 + $0x1b0] sm:$0xff] %vm253_vm1, %v574_v25  ;;  %v1392_v21 = vadd.f32 %v1376_v60, %v6589_v0  ;;  %v1426_v47 = vmul.f32 %v6549_v57, %v4889_v56  ;;  %v1474_v28 = vmul.f32 %v6550_v43, %v4891_v10 }
 0x204   : > { %6586 = vst [vmem:[#allocation33_spill] sm:$0xff] %v4903_v7  ;;  %v4912_v51 = vld [vmem:[#allocation2 + $0xca] sm:$0xff]  ;;  %v1393_v61 = vadd.f32 %v1377_v40, %v4804_v2  ;;  %v4921_v32 = vld [vmem:[#allocation2 + $0xd2] sm:$0xff]  ;;  %v1344_v45 = vadd.f32 %v1328_v4, %v1295_v9  ;;  %v1345_v48 = vadd.f32 %v1329_v30, %v1296_v20  ;;  %v1475_v1 = vmul.f32 %v6550_v43, %v4901_v52 }
 0x205   : > { %6587 = vst [vmem:[#allocation39_spill] sm:$0xff] %v4910_v41  ;;  %v3667_v42 = vld [vmem:[#allocation3 + $0x38] sm:$0xff]  ;;  %v1523_v25 = vmul.f32 %v6553_v29, %v4903_v7  ;;  %v1607_v0 = vld [vmem:[#allocation2 + $0x106] sm:$0xff]  ;;  %v1441_v40 = vadd.f32 %v1425_v17, %v1392_v21  ;;  %v1524_v57 = vmul.f32 %v6553_v29, %v4910_v41  ;;  %v1572_v10 = vmul.f32 %v6554_v37, %v4912_v51 }
 0x206   : > { %6588 = vst [vmem:[#allocation40_spill] sm:$0xff] %v4912_v51  ;;  %v1656_v60 = vld [vmem:[#allocation2 + $0x107] sm:$0xff]  ;;  %v1442_v38 = vadd.f32 %v1426_v47, %v1393_v61  ;;  %v3325_v4 = vsel %vm253_vm1, %v3667_v42, 0  ;;  %v1394_v20 = vadd.f32 %v1378_v23, %v1344_v45  ;;  %v1395_v30 = vadd.f32 %v1379_v34, %v1345_v48 }
 0x207   : > { %6590 = vst [vmem:[#allocation41_spill] sm:$0xff] %v4921_v32  ;;  %v1705_v2 = vld [vmem:[#allocation2 + $0x108] sm:$0xff]  ;;  %v1573_v9 = vmul.f32 %v6554_v37, %v4921_v32  ;;  %3351 = vmatpush.bf16.xpose.msra.mxu1 %v3325_v4  ;;  %v1624_v7 = vmul.f32 %v6555_v31, %v1607_v0  ;;  %v1673_v43 = vmul.f32 %v6556_v35, %v1656_v60  ;;  %v1706_v60 = vld [vmem:[#allocation2 + $0x110] sm:$0xff] }
 0x208   : > { %v1490_v21 = vadd.f32 %v1474_v28, %v1441_v40  ;;  %v1491_v47 = vadd.f32 %v1475_v1, %v1442_v38  ;;  %v1443_v61 = vadd.f32 %v1427_v58, %v1394_v20  ;;  %v1444_v17 = vadd.f32 %v1428_v11, %v1395_v30  ;;  %v4948_v58 = vld [vmem:[#allocation2 + $0xa9] sm:$0xff]  ;;  %v1755_v4 = vld [vmem:[#allocation2 + $0x111] sm:$0xff] }
 0x209   : > { %v1722_v41 = vmul.f32 %v6557_v18, %v1705_v2  ;;  %v1622_v51 = vmul.f32 %v6555_v31, %v4822_v3  ;;  %v1623_v34 = vmul.f32 %v6555_v31, %v4848_v27  ;;  %v1671_v45 = vmul.f32 %v6556_v35, %v4824_v55  ;;  %6591 = vst [vmem:[#allocation55_spill] sm:$0xff] %v4948_v58  ;;  %v4954_v55 = vld [vmem:[#allocation2 + $0xb1] sm:$0xff] }
 0x20a   : > { %v1539_v42 = vadd.f32 %v1523_v25, %v1490_v21  ;;  %v1540_v23 = vadd.f32 %v1524_v57, %v1491_v47  ;;  %v1492_v48 = vadd.f32 %v4862_v36, %v1443_v61  ;;  %v1493_v0 = vadd.f32 %v1477_v39, %v1444_v17  ;;  %6592 = vst [vmem:[#allocation56_spill] sm:$0xff] %v4954_v55  ;;  %v4961_v28 = vld [vmem:[#allocation2 + $0xaa] sm:$0xff]  ;;  %v4977_v21 = vld [vmem:[#allocation2 + $0xb2] sm:$0xff] }
 0x20b   : > { %v1672_v38 = vmul.f32 %v6556_v35, %v4852_v50  ;;  %v1720_v1 = vmul.f32 %v6557_v18, %v4833_v6  ;;  %v1721_v57 = vmul.f32 %v6557_v18, %v4856_v54  ;;  %v1769_v27 = vmul.f32 %v6561_v53, %v4864_v13  ;;  %6593 = vst [vmem:[#allocation25_spill] sm:$0xff] %v4961_v28  ;;  %v1657_v25 = vld [vmem:[#allocation2 + $0x10f] sm:$0xff] }
 0x20c   : > { %v1588_v3 = vadd.f32 %v1572_v10, %v1539_v42  ;;  %v1589_v11 = vadd.f32 %v1573_v9, %v1540_v23  ;;  %v1541_v36 = vadd.f32 %v4877_v62, %v1492_v48  ;;  %v1542_v39 = vadd.f32 %v1526_v8, %v1493_v0  ;;  %v1608_v10 = vld [vmem:[#allocation2 + $0x10e] sm:$0xff]  ;;  %6594 = vst [vmem:[#allocation26_spill] sm:$0xff] %v4977_v21 }
 0x20d   : > { %v1770_v50 = vmul.f32 %v6561_v53, %v4866_v12  ;;  %v1818_v6 = vmul.f32 %v4727_v63, %v4868_v26  ;;  %v1819_v13 = vmul.f32 %v4727_v63, %v4879_v14  ;;  %v1521_v62 = vmul.f32 %v6553_v29, %v4948_v58  ;;  %v1754_v26 = vld [vmem:[#allocation2 + $0x109] sm:$0xff] }
 0x20e   : > { %v1638_v54 = vadd.f32 %v1622_v51, %v1588_v3  ;;  %v1639_v2 = vadd.f32 %v1623_v34, %v1589_v11  ;;  %v1590_v8 = vadd.f32 %v4887_v16, %v1541_v36  ;;  %v1591_v12 = vadd.f32 %v4895_v44, %v1542_v39  ;;  %v1803_v20 = vld [vmem:[#allocation2 + $0x10a] sm:$0xff]  ;;  %v531_v3 = vpop.f32.mrf.mxu3 }
 0x20f   : > { %v1625_v40 = vmul.f32 %v6555_v31, %v1608_v10  ;;  %v1522_v30 = vmul.f32 %v6553_v29, %v4954_v55  ;;  %3352 = vmatpush.bf16.xpose.msra.mxu1 %v4818_v15  ;;  %v1674_v51 = vmul.f32 %v6556_v35, %v1657_v25  ;;  %v1723_v14 = vmul.f32 %v6557_v18, %v1706_v60  ;;  %v6595_v23 = vld [vmem:[#allocation38_spill] sm:$0xff]  ;;  %v6596_v48 = vld [vmem:[#allocation49_spill] sm:$0xff] }
 0x210   : > { %v1771_v9 = vmul.f32 %v6561_v53, %v1754_v26  ;;  %v1772_v16 = vmul.f32 %v6561_v53, %v1755_v4  ;;  %v1640_v44 = vadd.f32 %v1624_v7, %v1590_v8  ;;  %v1820_v61 = vmul.f32 %v4727_v63, %v1803_v20  ;;  %v4989_v7 = vld [vmem:[%s6247_s2] ss:$0 sm:$0xff] }
 0x211   : > { %v1641_v47 = vadd.f32 %v1625_v40, %v1591_v12  ;;  %v1687_v17 = vadd.f32 %v1671_v45, %v1638_v54  ;;  %v1688_v42 = vadd.f32 %v1672_v38, %v1639_v2  ;;  %v1537_v34 = vadd.f32 %v1521_v62, %v6595_v23  ;;  %6597 = vst [vmem:[#allocation34_spill] sm:$0xff] %v4989_v7  ;;  %v1804_v38 = vld [vmem:[#allocation2 + $0x112] sm:$0xff] }
 0x212   : > { %v1538_v15 = vadd.f32 %v1522_v30, %v6596_v48  ;;  %v1570_v0 = vmul.f32 %v6554_v37, %v4961_v28  ;;  %v1689_v11 = vadd.f32 %v1673_v43, %v1640_v44  ;;  %v1571_v10 = vmul.f32 %v6554_v37, %v4977_v21 }
 0x213   : > { %v1690_v36 = vadd.f32 %v1674_v51, %v1641_v47  ;;  %v1736_v39 = vadd.f32 %v1720_v1, %v1687_v17  ;;  %v532_v45 = vadd.f32 %v4989_v7, %v531_v3  ;;  %v1737_v25 = vadd.f32 %v1721_v57, %v1688_v42  ;;  %v6598_v47 = vld [vmem:[#allocation4_spill] sm:$0xff]  ;;  %v2019_v17 = vld [vmem:[#allocation2 + $0x1a8] sm:$0xff] }
 0x214   : > { %v1586_v60 = vadd.f32 %v1570_v0, %v1537_v34  ;;  %v1620_v54 = vmul.f32 %v6555_v31, %v4839_v24  ;;  %v1738_v2 = vadd.f32 %v1722_v41, %v1689_v11  ;;  %v1587_v1 = vadd.f32 %v1571_v10, %v1538_v15  ;;  %v1921_v41 = vld [vmem:[#allocation2 + $0x186] sm:$0xff]  ;;  %v6600_v34 = vld [vmem:[#allocation6_spill] sm:$0xff] }
 0x215   : > { %v1739_v43 = vadd.f32 %v1723_v14, %v1690_v36  ;;  %v1785_v62 = vadd.f32 %v1769_v27, %v1736_v39  ;;  %v575_v8 = vmax.f32 %v532_v45, 0.0  ;;  %v1786_v12 = vadd.f32 %v1770_v50, %v1737_v25  ;;  %v1923_v24 = vld [vmem:[#allocation2 + $0x1a6] sm:$0xff]  ;;  %v6601_v39 = vld [vmem:[#allocation7_spill] sm:$0xff] }
 0x216   : > { %v1621_v40 = vmul.f32 %v6555_v31, %v4841_v46  ;;  %v4996_v26 = vadd.f32 %v1620_v54, %v1586_v60  ;;  %v1787_v4 = vadd.f32 %v1771_v9, %v1738_v2  ;;  %v1821_v30 = vmul.f32 %v4727_v63, %v1804_v38  ;;  %v1969_v27 = vld [vmem:[#allocation2 + $0x187] sm:$0xff] }
 0x217   : > { %v1788_v20 = vadd.f32 %v1772_v16, %v1739_v43  ;;  %v1834_v57 = vadd.f32 %v1818_v6, %v1785_v62  ;;  %608 = vst.msk [vmem:[#allocation2 + $0x1c8] sm:$0xff] %vm253_vm1, %v575_v8  ;;  %3353 = vmatpush.bf16.xpose.msra.mxu1 %v4906_v19  ;;  %v1835_v51 = vadd.f32 %v1819_v13, %v1786_v12  ;;  %v1971_v63 = vld [vmem:[#allocation2 + $0x1a7] sm:$0xff] }
 0x218   : > { %v1637_v14 = vadd.f32 %v1621_v40, %v1587_v1  ;;  %v1669_v50 = vmul.f32 %v6556_v35, %v4881_v22  ;;  %v1836_v46 = vadd.f32 %v1820_v61, %v1787_v4  ;;  %v1937_v9 = vmul.f32 %v1921_v41, %v6598_v47  ;;  %v2017_v6 = vld [vmem:[#allocation2 + $0x188] sm:$0xff]  ;;  %v533_v61 = vpop.f32.mrf.mxu3 }
 0x219   : > { %v1837_v44 = vadd.f32 %v1821_v30, %v1788_v20  ;;  %v1939_v16 = vmul.f32 %v1923_v24, %v6598_v47  ;;  %v6599_v42 = vld [vmem:[#allocation5_spill] sm:$0xff]  ;;  %v2033_v48 = vmul.f32 %v2017_v6, %v6600_v34  ;;  %v1670_v22 = vmul.f32 %v6556_v35, %v4889_v56 }
 0x21a   : > { %v1985_v23 = vmul.f32 %v1969_v27, %v6599_v42  ;;  %v1987_v19 = vmul.f32 %v1971_v63, %v6599_v42  ;;  %v2065_v13 = vld [vmem:[#allocation2 + $0x189] sm:$0xff]  ;;  %v1855_v3 = vadd.f32 %v4742_v5, %v1836_v46  ;;  %v2035_v36 = vmul.f32 %v2019_v17, %v6600_v34 }
 0x21b   : > { %v2067_v15 = vld [vmem:[#allocation2 + $0x1a9] sm:$0xff]  ;;  %v1856_v11 = vadd.f32 %v4742_v5, %v1837_v44  ;;  %v2081_v10 = vmul.f32 %v2065_v13, %v6601_v39  ;;  %v534_v38 = vadd.f32 %v4989_v7, %v533_v61  ;;  %v1853_v62 = vadd.f32 %v4742_v5, %v1834_v57 }
 0x21c   : > { %v2113_v0 = vld [vmem:[#allocation2 + $0x18a] sm:$0xff]  ;;  %v2001_v25 = vadd.f32 %v1985_v23, %v1937_v9  ;;  %v2003_v60 = vadd.f32 %v1987_v19, %v1939_v16  ;;  %v2083_v54 = vmul.f32 %v2067_v15, %v6601_v39  ;;  %v1871_v2 = vmax.f32 %v1855_v3, 0.0 }
 0x21d   : > { %v5014_v45 = vld [vmem:[#allocation2 + $0x1aa] sm:$0xff]  ;;  %v1872_v43 = vmax.f32 %v1856_v11, 0.0  ;;  %v2129_v56 = vmul.f32 %v2113_v0, %v6563_v33  ;;  %v576_v1 = vmax.f32 %v534_v38, 0.0  ;;  %v1854_v40 = vadd.f32 %v4742_v5, %v1835_v51 }
 0x21e   : > { %v2049_v8 = vadd.f32 %v2033_v48, %v2001_v25  ;;  %v2131_v12 = vmul.f32 %v5014_v45, %v6563_v33  ;;  %v1887_v4 = vpack.c.bf16 %v1871_v2, %v1871_v2  ;;  %v1925_v30 = vld [vmem:[#allocation2 + $0x1c6] sm:$0xff]  ;;  %v2051_v27 = vadd.f32 %v2035_v36, %v2003_v60 }
 0x21f   : > { %v1888_v20 = vpack.c.bf16 %v1872_v43, %v1872_v43  ;;  %v1973_v41 = vld [vmem:[#allocation2 + $0x1c7] sm:$0xff]  ;;  %v1869_v46 = vmax.f32 %v1853_v62, 0.0  ;;  %609 = vst.msk [vmem:[#allocation2 + $0x1d0] sm:$0xff] %vm253_vm1, %v576_v1  ;;  %v1941_v44 = vmul.f32 %v1925_v30, %v6598_v47  ;;  %v2178_v16 = vmul.f32 %v1923_v24, %v6564_v59  ;;  %v6602_v43 = vld [vmem:[#allocation11_spill] sm:$0xff] }
 0x220   : > { %v1989_v9 = vmul.f32 %v1973_v41, %v6599_v42  ;;  %v2097_v57 = vadd.f32 %v2081_v10, %v2049_v8  ;;  %1904 = vst.msk [vmem:[#allocation3 + $0x20] sm:$0xf] %vm1895_vm3, %v1887_v4  ;;  %v2099_v6 = vadd.f32 %v2083_v54, %v2051_v27  ;;  %v2180_v5 = vmul.f32 %v1925_v30, %v6564_v59  ;;  %v536_v48 = vpop.f32.mrf.mxu3  ;;  %v2021_v11 = vld [vmem:[#allocation2 + $0x1c8] sm:$0xff]  ;;  %v6603_v62 = vld [vmem:[#allocation12_spill] sm:$0xff]  ;;  %v6604_v8 = vld [vmem:[#allocation50_spill] sm:$0xff] }
 0x221   : > { %v1870_v51 = vmax.f32 %v1854_v40, 0.0  ;;  %v1885_v23 = vpack.c.bf16 %v1869_v46, %v1869_v46  ;;  %1905 = vst.msk [vmem:[#allocation3 + $0x24] sm:$0xf] %vm1895_vm3, %v1888_v20  ;;  %v1685_v61 = vadd.f32 %v1669_v50, %v4996_v26  ;;  %v1686_v3 = vadd.f32 %v1670_v22, %v1637_v14 }
 0x222   : > { %v2145_v19 = vadd.f32 %v2129_v56, %v2097_v57  ;;  %v2147_v13 = vadd.f32 %v2131_v12, %v2099_v6  ;;  %v537_v24 = vadd.f32 %v4989_v7, %v536_v48  ;;  %v2226_v10 = vmul.f32 %v1971_v63, %v6533_v49  ;;  %v6606_v57 = vld [vmem:[#allocation14_spill] sm:$0xff] }
 0x223   : > { %v1886_v0 = vpack.c.bf16 %v1870_v51, %v1870_v51  ;;  %1902 = vst.msk [vmem:[#allocation3 + $0x18] sm:$0xf] %vm1895_vm3, %v1885_v23  ;;  %v2005_v38 = vadd.f32 %v1989_v9, %v1941_v44  ;;  %v2228_v60 = vmul.f32 %v1973_v41, %v6533_v49  ;;  %v2274_v56 = vmul.f32 %v2019_v17, %v6602_v43  ;;  %v6605_v44 = vld [vmem:[#allocation13_spill] sm:$0xff] }
 0x224   : > { %v2194_v36 = vadd.f32 %v2178_v16, %v2145_v19  ;;  %v2196_v25 = vadd.f32 %v2180_v5, %v2147_v13  ;;  %v577_v54 = vmax.f32 %v537_v24, 0.0  ;;  %v2322_v1 = vmul.f32 %v2067_v15, %v6603_v62  ;;  %v6607_v5 = vld [vmem:[#allocation15_spill] sm:$0xff]  ;;  %v1922_v23 = vld [vmem:[#allocation2 + $0x18e] sm:$0xff] }
 0x225   : > { %1903 = vst.msk [vmem:[#allocation3 + $0x1c] sm:$0xf] %vm1895_vm3, %v1886_v0  ;;  %v2037_v26 = vmul.f32 %v2021_v11, %v6600_v34  ;;  %v2276_v22 = vmul.f32 %v2021_v11, %v6602_v43  ;;  %v1718_v63 = vmul.f32 %v6557_v18, %v6604_v8  ;;  %v1719_v17 = vmul.f32 %v6557_v18, %v4901_v52  ;;  %v5051_v19 = vld [vmem:[#allocation2 + $0x1ae] sm:$0xff] }
 0x226   : > { %v2242_v2 = vadd.f32 %v2226_v10, %v2194_v36  ;;  %v2069_v14 = vld [vmem:[#allocation2 + $0x1c9] sm:$0xff]  ;;  %v2244_v50 = vadd.f32 %v2228_v60, %v2196_v25  ;;  %610 = vst.msk [vmem:[#allocation2 + $0x1e8] sm:$0xff] %vm253_vm1, %v577_v54  ;;  %v2370_v9 = vmul.f32 %v5014_v45, %v6605_v44  ;;  %v2419_v16 = vmul.f32 %v1925_v30, %v6606_v57  ;;  %v6610_v45 = vld [vmem:[#allocation16_spill] sm:$0xff] }
 0x227   : > { %v2085_v12 = vmul.f32 %v2069_v14, %v6601_v39  ;;  %v2324_v4 = vmul.f32 %v2069_v14, %v6603_v62  ;;  %v2053_v20 = vadd.f32 %v2037_v26, %v2005_v38  ;;  %v2117_v27 = vld [vmem:[#allocation2 + $0x1ca] sm:$0xff]  ;;  %v2467_v51 = vmul.f32 %v1973_v41, %v6607_v5 }
 0x228   : > { %v2290_v40 = vadd.f32 %v2274_v56, %v2242_v2  ;;  %v3664_v15 = vld [vmem:[#allocation3 + $0x20] sm:$0xff]  ;;  %v2292_v46 = vadd.f32 %v2276_v22, %v2244_v50  ;;  %v5053_v48 = vld [vmem:[#allocation2 + $0x1ce] sm:$0xff]  ;;  %v5055_v13 = vadd.f32 %v1718_v63, %v1685_v61  ;;  %v5057_v52 = vadd.f32 %v1719_v17, %v1686_v3  ;;  %v538_v0 = vpop.f32.mrf.mxu3 }
 0x229   : > { %v3316_v24 = vsel %vm253_vm1, %v3664_v15, 0  ;;  %v2101_v36 = vadd.f32 %v2085_v12, %v2053_v20  ;;  %v2515_v38 = vmul.f32 %v2021_v11, %v6610_v45  ;;  %v1970_v30 = vld [vmem:[#allocation2 + $0x18f] sm:$0xff]  ;;  %v539_v60 = vadd.f32 %v4989_v7, %v538_v0 }
 0x22a   : > { %v2338_v6 = vadd.f32 %v2322_v1, %v2290_v40  ;;  %6608 = vst [vmem:[#allocation32_spill] sm:$0xff] %v5055_v13  ;;  %v2340_v10 = vadd.f32 %v2324_v4, %v2292_v46  ;;  %v5061_v25 = vld [vmem:[#allocation2 + $0x1af] sm:$0xff]  ;;  %3354 = vmatpush.bf16.xpose.msra.mxu1 %v3316_v24  ;;  %v2133_v61 = vmul.f32 %v2117_v27, %v6563_v33 }
 0x22b   : > { %6609 = vst [vmem:[#allocation35_spill] sm:$0xff] %v5057_v52  ;;  %v5063_v41 = vld [vmem:[#allocation2 + $0x1cf] sm:$0xff]  ;;  %v2372_v3 = vmul.f32 %v2117_v27, %v6605_v44  ;;  %v1938_v56 = vmul.f32 %v1922_v23, %v6598_v47  ;;  %v1940_v1 = vmul.f32 %v5051_v19, %v6598_v47  ;;  %v1986_v11 = vmul.f32 %v1970_v30, %v6599_v42 }
 0x22c   : > { %v2386_v54 = vadd.f32 %v2370_v9, %v2338_v6  ;;  %v3663_v2 = vld [vmem:[#allocation3 + $0x18] sm:$0xff]  ;;  %v1988_v26 = vmul.f32 %v5061_v25, %v6599_v42  ;;  %v578_v50 = vmax.f32 %v539_v60, 0.0  ;;  %v1942_v8 = vmul.f32 %v5053_v48, %v6598_v47  ;;  %v2018_v12 = vld [vmem:[#allocation2 + $0x190] sm:$0xff]  ;;  %v6611_v20 = vld [vmem:[#allocation17_spill] sm:$0xff] }
 0x22d   : > { %v1990_v63 = vmul.f32 %v5063_v41, %v6599_v42  ;;  %v1927_v40 = vld [vmem:[#allocation2 + $0x1e6] sm:$0xff]  ;;  %v2149_v17 = vadd.f32 %v2133_v61, %v2101_v36  ;;  %v2388_v15 = vadd.f32 %v2372_v3, %v2340_v10  ;;  %v2563_v46 = vmul.f32 %v2069_v14, %v6611_v20  ;;  %v6612_v9 = vld [vmem:[#allocation18_spill] sm:$0xff] }
 0x22e   : > { %v2435_v22 = vadd.f32 %v2419_v16, %v2386_v54  ;;  %v1975_v4 = vld [vmem:[#allocation2 + $0x1e7] sm:$0xff]  ;;  %v2611_v6 = vmul.f32 %v2117_v27, %v6612_v9  ;;  %611 = vst.msk [vmem:[#allocation2 + $0x1f0] sm:$0xff] %vm253_vm1, %v578_v50  ;;  %v1943_v23 = vmul.f32 %v1927_v40, %v6598_v47  ;;  %v2182_v0 = vmul.f32 %v1927_v40, %v6564_v59  ;;  %v5085_v30 = vld [vmem:[#allocation2 + $0x1b0] sm:$0xff] }
 0x22f   : > { %v1991_v16 = vmul.f32 %v1975_v4, %v6599_v42  ;;  %v3313_v24 = vsel %vm253_vm1, %v3663_v2, 0  ;;  %v2023_v60 = vld [vmem:[#allocation2 + $0x1e8] sm:$0xff]  ;;  %v2421_v36 = vmul.f32 %v1927_v40, %v6606_v57  ;;  %v2002_v10 = vadd.f32 %v1986_v11, %v1938_v56 }
 0x230   : > { %v2004_v61 = vadd.f32 %v1988_v26, %v1940_v1  ;;  %v2034_v14 = vmul.f32 %v2018_v12, %v6600_v34  ;;  %v2198_v27 = vadd.f32 %v2182_v0, %v2149_v17  ;;  %v2230_v3 = vmul.f32 %v1975_v4, %v6533_v49  ;;  %v5095_v26 = vld [vmem:[#allocation2 + $0x1d0] sm:$0xff] }
 0x231   : > { %v2483_v54 = vadd.f32 %v2467_v51, %v2435_v22  ;;  %v2006_v50 = vadd.f32 %v1990_v63, %v1942_v8  ;;  %v541_v21 = vpop.f32.mrf.mxu3  ;;  %v2007_v28 = vadd.f32 %v1991_v16, %v1943_v23  ;;  %v2437_v55 = vadd.f32 %v2421_v36, %v2388_v15  ;;  %v6613_v63 = vld [vmem:[#allocation20_spill] sm:$0xff]  ;;  %v2066_v17 = vld [vmem:[#allocation2 + $0x191] sm:$0xff]  ;;  %v6614_v16 = vld [vmem:[#allocation21_spill] sm:$0xff] }
 0x232   : > { %v2469_v58 = vmul.f32 %v1975_v4, %v6607_v5  ;;  %v2036_v2 = vmul.f32 %v5085_v30, %v6600_v34  ;;  %v542_v32 = vadd.f32 %v4989_v7, %v541_v21  ;;  %v2039_v56 = vmul.f32 %v2023_v60, %v6600_v34  ;;  %3355 = vmatpush.bf16.xpose.msra.mxu1 %v3313_v24  ;;  %v6615_v21 = vld [vmem:[#allocation22_spill] sm:$0xff] }
 0x233   : > { %v2246_v1 = vadd.f32 %v2230_v3, %v2198_v27  ;;  %v2531_v11 = vadd.f32 %v2515_v38, %v2483_v54  ;;  %v2278_v51 = vmul.f32 %v2023_v60, %v6602_v43  ;;  %v2517_v8 = vmul.f32 %v2023_v60, %v6610_v45 }
 0x234   : > { %v2485_v22 = vadd.f32 %v2469_v58, %v2437_v55  ;;  %v2660_v12 = vmul.f32 %v1927_v40, %v6613_v63  ;;  %v579_v15 = vmax.f32 %v542_v32, 0.0  ;;  %v2708_v0 = vmul.f32 %v1975_v4, %v6614_v16  ;;  %v5106_v55 = vld [vmem:[#allocation2 + $0x1b1] sm:$0xff] }
 0x235   : > { %v2579_v23 = vadd.f32 %v2563_v46, %v2531_v11  ;;  %v2756_v36 = vmul.f32 %v2023_v60, %v6615_v21  ;;  %v2055_v52 = vadd.f32 %v2039_v56, %v2007_v28  ;;  %v2071_v27 = vld [vmem:[#allocation2 + $0x1e9] sm:$0xff]  ;;  %v2038_v24 = vmul.f32 %v5095_v26, %v6600_v34  ;;  %v5113_v28 = vld [vmem:[#allocation2 + $0x1d1] sm:$0xff] }
 0x236   : > { %v5102_v38 = vld [vmem:[#allocation2 + $0x1ee] sm:$0xff]  ;;  %v2050_v3 = vadd.f32 %v2034_v14, %v2002_v10  ;;  %v2052_v58 = vadd.f32 %v2036_v2, %v2004_v61  ;;  %612 = vst.msk [vmem:[#allocation2 + $0x208] sm:$0xff] %vm253_vm1, %v579_v15  ;;  %v2087_v32 = vmul.f32 %v2071_v27, %v6601_v39  ;;  %v2294_v40 = vadd.f32 %v2278_v51, %v2246_v1 }
 0x237   : > { %v2326_v4 = vmul.f32 %v2071_v27, %v6603_v62  ;;  %v5111_v46 = vld [vmem:[#allocation2 + $0x1ef] sm:$0xff]  ;;  %v2082_v60 = vmul.f32 %v2066_v17, %v6601_v39  ;;  %v2533_v56 = vadd.f32 %v2517_v8, %v2485_v22  ;;  %v2565_v10 = vmul.f32 %v2071_v27, %v6611_v20 }
 0x238   : > { %v2119_v54 = vld [vmem:[#allocation2 + $0x1ea] sm:$0xff]  ;;  %v2627_v61 = vadd.f32 %v2611_v6, %v2579_v23  ;;  %v2054_v14 = vadd.f32 %v2038_v24, %v2006_v50  ;;  %v2103_v2 = vadd.f32 %v2087_v32, %v2055_v52  ;;  %v1944_v15 = vmul.f32 %v5102_v38, %v6598_v47  ;;  %v5137_v47 = vld [vmem:[#allocation2 + $0x1b2] sm:$0xff] }
 0x239   : > { %v2342_v11 = vadd.f32 %v2326_v4, %v2294_v40  ;;  %v2084_v1 = vmul.f32 %v5106_v55, %v6601_v39  ;;  %v2581_v51 = vadd.f32 %v2565_v10, %v2533_v56  ;;  %v543_v53 = vpop.f32.mrf.mxu3  ;;  %v1992_v17 = vmul.f32 %v5111_v46, %v6599_v42  ;;  %v5123_v18 = vld [vmem:[#allocation2 + $0x1f0] sm:$0xff] }
 0x23a   : > { %v2676_v13 = vadd.f32 %v2660_v12, %v2627_v61  ;;  %v2086_v6 = vmul.f32 %v5113_v28, %v6601_v39  ;;  %v2135_v52 = vmul.f32 %v2119_v54, %v6563_v33  ;;  %v2374_v50 = vmul.f32 %v2119_v54, %v6605_v44  ;;  %v5131_v23 = vld [vmem:[#allocation2 + $0x1f1] sm:$0xff] }
 0x23b   : > { %v2613_v22 = vmul.f32 %v2119_v54, %v6612_v9  ;;  %v544_v8 = vadd.f32 %v4989_v7, %v543_v53  ;;  %v2804_v24 = vmul.f32 %v2071_v27, %v6553_v29  ;;  %v2852_v32 = vmul.f32 %v2119_v54, %v6554_v37  ;;  %v2114_v42 = vld [vmem:[#allocation2 + $0x192] sm:$0xff] }
 0x23c   : > { %v2724_v12 = vadd.f32 %v2708_v0, %v2676_v13  ;;  %v2008_v40 = vadd.f32 %v1992_v17, %v1944_v15  ;;  %v2151_v4 = vadd.f32 %v2135_v52, %v2103_v2  ;;  %v2390_v56 = vadd.f32 %v2374_v50, %v2342_v11  ;;  %v5141_v27 = vld [vmem:[#allocation2 + $0x1d2] sm:$0xff] }
 0x23d   : > { %v580_v10 = vmax.f32 %v544_v8, 0.0  ;;  %v2040_v61 = vmul.f32 %v5123_v18, %v6600_v34  ;;  %v2168_v9 = vld [vmem:[#allocation2 + $0x206] sm:$0xff]  ;;  %v2629_v20 = vadd.f32 %v2613_v22, %v2581_v51  ;;  %v2088_v53 = vmul.f32 %v5131_v23, %v6601_v39 }
 0x23e   : > { %v2098_v13 = vadd.f32 %v2082_v60, %v2050_v3  ;;  %v2100_v0 = vadd.f32 %v2084_v1, %v2052_v58  ;;  %v2184_v54 = vmul.f32 %v2168_v9, %v6564_v59  ;;  %v2216_v2 = vld [vmem:[#allocation2 + $0x207] sm:$0xff]  ;;  %v2423_v15 = vmul.f32 %v2168_v9, %v6606_v57 }
 0x23f   : > { %v5144_v11 = vld [vmem:[#allocation2 + $0x208] sm:$0xff]  ;;  %v2772_v17 = vadd.f32 %v2756_v36, %v2724_v12  ;;  %613 = vst.msk [vmem:[#allocation2 + $0x210] sm:$0xff] %vm253_vm1, %v580_v10  ;;  %v2056_v52 = vadd.f32 %v2040_v61, %v2008_v40  ;;  %v2662_v51 = vmul.f32 %v2168_v9, %v6613_v63  ;;  %v2102_v50 = vadd.f32 %v2086_v6, %v2054_v14  ;;  %v5158_v14 = vld [vmem:[#allocation2 + $0x1f2] sm:$0xff] }
 0x240   : > { %v2130_v22 = vmul.f32 %v2114_v42, %v6563_v33  ;;  %v2132_v3 = vmul.f32 %v5137_v47, %v6563_v33  ;;  %v2200_v58 = vadd.f32 %v2184_v54, %v2151_v4  ;;  %v2439_v60 = vadd.f32 %v2423_v15, %v2390_v56 }
 0x241   : > { %v2820_v1 = vadd.f32 %v2804_v24, %v2772_v17  ;;  %v2134_v8 = vmul.f32 %v5141_v27, %v6563_v33  ;;  %v2232_v39 = vmul.f32 %v2216_v2, %v6533_v49  ;;  %v2280_v36 = vmul.f32 %v5144_v11, %v6602_v43 }
 0x242   : > { %v2678_v12 = vadd.f32 %v2662_v51, %v2629_v20  ;;  %v2901_v40 = vmul.f32 %v2168_v9, %v6555_v31  ;;  %v2471_v42 = vmul.f32 %v2216_v2, %v6607_v5  ;;  %v2519_v6 = vmul.f32 %v5144_v11, %v6610_v45 }
 0x243   : > { %v2710_v24 = vmul.f32 %v2216_v2, %v6614_v16  ;;  %v2104_v4 = vadd.f32 %v2088_v53, %v2056_v52  ;;  %v2248_v56 = vadd.f32 %v2232_v39, %v2200_v58  ;;  %v2758_v10 = vmul.f32 %v5144_v11, %v6615_v21 }
 0x244   : > { %v2868_v61 = vadd.f32 %v2852_v32, %v2820_v1  ;;  %v2949_v54 = vmul.f32 %v2216_v2, %v6556_v35  ;;  %v2487_v20 = vadd.f32 %v2471_v42, %v2439_v60  ;;  %v2136_v9 = vmul.f32 %v5158_v14, %v6563_v33 }
 0x245   : > { %v2726_v15 = vadd.f32 %v2710_v24, %v2678_v12  ;;  %v2146_v17 = vadd.f32 %v2130_v22, %v2098_v13  ;;  %v2148_v34 = vadd.f32 %v2132_v3, %v2100_v0  ;;  %v2179_v53 = vmul.f32 %v5051_v19, %v6564_v59 }
 0x246   : > { %v2917_v51 = vadd.f32 %v2901_v40, %v2868_v61  ;;  %v5169_v7 = vld [vmem:[#allocation2 + $0x20e] sm:$0xff]  ;;  %v2181_v39 = vmul.f32 %v5053_v48, %v6564_v59  ;;  %v2150_v32 = vadd.f32 %v2134_v8, %v2102_v50  ;;  %v2152_v2 = vadd.f32 %v2136_v9, %v2104_v4 }
 0x247   : > { %v5175_v52 = vld [vmem:[#allocation2 + $0x20f] sm:$0xff]  ;;  %v2183_v58 = vmul.f32 %v5102_v38, %v6564_v59  ;;  %v2185_v13 = vmul.f32 %v5169_v7, %v6564_v59  ;;  %v2195_v22 = vadd.f32 %v2179_v53, %v2146_v17  ;;  %v2227_v3 = vmul.f32 %v5061_v25, %v6533_v49 }
 0x248   : > { %v2197_v0 = vadd.f32 %v2181_v39, %v2148_v34  ;;  %v2229_v19 = vmul.f32 %v5063_v41, %v6533_v49  ;;  %v5185_v60 = vld [vmem:[#allocation2 + $0x210] sm:$0xff]  ;;  %v2231_v50 = vmul.f32 %v5111_v46, %v6533_v49  ;;  %v2233_v8 = vmul.f32 %v5175_v52, %v6533_v49 }
 0x249   : > { %v2199_v1 = vadd.f32 %v2183_v58, %v2150_v32  ;;  %v2201_v12 = vadd.f32 %v2185_v13, %v2152_v2  ;;  %v2243_v40 = vadd.f32 %v2227_v3, %v2195_v22  ;;  %v2275_v34 = vmul.f32 %v5085_v30, %v6602_v43  ;;  %v5199_v17 = vld [vmem:[#allocation2 + $0x209] sm:$0xff]  ;;  %v6616_v58 = vld [vmem:[#allocation27_spill] sm:$0xff] }
 0x24a   : > { %v2245_v42 = vadd.f32 %v2229_v19, %v2197_v0  ;;  %v2277_v25 = vmul.f32 %v5095_v26, %v6602_v43  ;;  %v2279_v61 = vmul.f32 %v5123_v18, %v6602_v43  ;;  %v2281_v9 = vmul.f32 %v5185_v60, %v6602_v43  ;;  %v5207_v0 = vld [vmem:[#allocation2 + $0x211] sm:$0xff] }
 0x24b   : > { %v2247_v24 = vadd.f32 %v2231_v50, %v2199_v1  ;;  %v2249_v4 = vadd.f32 %v2233_v8, %v2201_v12  ;;  %v2291_v53 = vadd.f32 %v2275_v34, %v2243_v40  ;;  %v2323_v32 = vmul.f32 %v5106_v55, %v6603_v62 }
 0x24c   : > { %v2293_v39 = vadd.f32 %v2277_v25, %v2245_v42  ;;  %v2325_v30 = vmul.f32 %v5113_v28, %v6603_v62  ;;  %v2296_v2 = vadd.f32 %v2280_v36, %v2248_v56  ;;  %v2997_v13 = vmul.f32 %v5144_v11, %v6616_v58  ;;  %v5223_v25 = vld [vmem:[#allocation2 + $0x20a] sm:$0xff] }
 0x24d   : > { %v2295_v22 = vadd.f32 %v2279_v61, %v2247_v24  ;;  %v2327_v3 = vmul.f32 %v5131_v23, %v6603_v62  ;;  %v2297_v19 = vadd.f32 %v2281_v9, %v2249_v4  ;;  %v2328_v1 = vmul.f32 %v5199_v17, %v6603_v62  ;;  %v5225_v24 = vld [vmem:[#allocation2 + $0x212] sm:$0xff] }
 0x24e   : > { %v2339_v12 = vadd.f32 %v2323_v32, %v2291_v53  ;;  %v2341_v50 = vadd.f32 %v2325_v30, %v2293_v39  ;;  %v2535_v55 = vadd.f32 %v2519_v6, %v2487_v20  ;;  %v2371_v36 = vmul.f32 %v5137_v47, %v6605_v44  ;;  %6617 = vst [vmem:[#allocation54_spill] sm:$0xff] %v5225_v24 }
 0x24f   : > { %v2343_v8 = vadd.f32 %v2327_v3, %v2295_v22  ;;  %v2373_v11 = vmul.f32 %v5141_v27, %v6605_v44  ;;  %v5217_v56 = vadd.f32 %v2758_v10, %v2726_v15  ;;  %v2965_v40 = vadd.f32 %v2949_v54, %v2917_v51 }
 0x250   : > { %v2329_v42 = vmul.f32 %v5207_v0, %v6603_v62  ;;  %v2375_v34 = vmul.f32 %v5158_v14, %v6605_v44  ;;  %v2387_v6 = vadd.f32 %v2371_v36, %v2339_v12  ;;  %v2420_v47 = vmul.f32 %v5053_v48, %v6606_v57  ;;  %v5410_v62 = vld [vmem:[#allocation2 + $0x24a] sm:$0xff] }
 0x251   : > { %v2389_v20 = vadd.f32 %v2373_v11, %v2341_v50  ;;  %v2422_v10 = vmul.f32 %v5102_v38, %v6606_v57  ;;  %v2344_v15 = vadd.f32 %v2328_v1, %v2296_v2  ;;  %v2424_v4 = vmul.f32 %v5169_v7, %v6606_v57  ;;  %v6618_v50 = vld [vmem:[#allocation17_spill] sm:$0xff] }
 0x252   : > { %v2345_v54 = vadd.f32 %v2329_v42, %v2297_v19  ;;  %v2391_v51 = vadd.f32 %v2375_v34, %v2343_v8  ;;  %v2436_v61 = vadd.f32 %v2420_v47, %v2387_v6  ;;  %v2468_v53 = vmul.f32 %v5063_v41, %v6607_v5  ;;  %v6619_v47 = vld [vmem:[#allocation18_spill] sm:$0xff] }
 0x253   : > { %v2438_v9 = vadd.f32 %v2422_v10, %v2389_v20  ;;  %v2470_v39 = vmul.f32 %v5111_v46, %v6607_v5  ;;  %v2376_v48 = vmul.f32 %v5223_v25, %v6605_v44  ;;  %v2377_v32 = vmul.f32 %v5225_v24, %v6605_v44  ;;  %v5408_v44 = vld [vmem:[#allocation2 + $0x251] sm:$0xff] }
 0x254   : > { %v2440_v30 = vadd.f32 %v2424_v4, %v2391_v51  ;;  %v2472_v2 = vmul.f32 %v5175_v52, %v6607_v5  ;;  %v2484_v22 = vadd.f32 %v2468_v53, %v2436_v61  ;;  %v2516_v19 = vmul.f32 %v5095_v26, %v6610_v45 }
 0x255   : > { %v2486_v3 = vadd.f32 %v2470_v39, %v2438_v9  ;;  %v2518_v41 = vmul.f32 %v5123_v18, %v6610_v45  ;;  %v2520_v12 = vmul.f32 %v5185_v60, %v6610_v45  ;;  %v2564_v8 = vmul.f32 %v5113_v28, %v6618_v50 }
 0x256   : > { %v2488_v1 = vadd.f32 %v2472_v2, %v2440_v30  ;;  %v2567_v36 = vmul.f32 %v5199_v17, %v6618_v50  ;;  %v2532_v11 = vadd.f32 %v2516_v19, %v2484_v22  ;;  %v2566_v34 = vmul.f32 %v5131_v23, %v6618_v50 }
 0x257   : > { %v2534_v42 = vadd.f32 %v2518_v41, %v2486_v3  ;;  %v2568_v26 = vmul.f32 %v5207_v0, %v6618_v50  ;;  %v2612_v10 = vmul.f32 %v5141_v27, %v6619_v47  ;;  %v2614_v51 = vmul.f32 %v5158_v14, %v6619_v47 }
 0x258   : > { %v2536_v6 = vadd.f32 %v2520_v12, %v2488_v1  ;;  %v2583_v20 = vadd.f32 %v2567_v36, %v2535_v55  ;;  %v2580_v28 = vadd.f32 %v2564_v8, %v2532_v11  ;;  %v2661_v61 = vmul.f32 %v5102_v38, %v6613_v63  ;;  %v546_v8 = vpop.f32.mrf.mxu3 }
 0x259   : > { %v2582_v4 = vadd.f32 %v2566_v34, %v2534_v42  ;;  %v2663_v9 = vmul.f32 %v5169_v7, %v6613_v63  ;;  %v5265_v53 = vadd.f32 %v2997_v13, %v2965_v40  ;;  %v5267_v39 = vadd.f32 %v2376_v48, %v2344_v15 }
 0x25a   : > { %v2584_v30 = vadd.f32 %v2568_v26, %v2536_v6  ;;  %v2615_v55 = vmul.f32 %v5223_v25, %v6619_v47  ;;  %v5271_v27 = vadd.f32 %v2377_v32, %v2345_v54  ;;  %v2616_v2 = vmul.f32 %v5225_v24, %v6619_v47  ;;  %v6620_v6 = vld [vmem:[#allocation33_spill] sm:$0xff] }
 0x25b   : > { %v2628_v22 = vadd.f32 %v2612_v10, %v2580_v28  ;;  %v2630_v3 = vadd.f32 %v2614_v51, %v2582_v4  ;;  %v2709_v38 = vmul.f32 %v5111_v46, %v6614_v16  ;;  %v2711_v13 = vmul.f32 %v5175_v52, %v6614_v16  ;;  %v6622_v4 = vld [vmem:[#allocation39_spill] sm:$0xff] }
 0x25c   : > { %v5275_v19 = vadd.f32 %v2615_v55, %v2583_v20  ;;  %v2806_v40 = vmul.f32 %v5199_v17, %v6553_v29  ;;  %v2757_v54 = vmul.f32 %v5123_v18, %v6615_v21  ;;  %v2759_v32 = vmul.f32 %v5185_v60, %v6615_v21  ;;  %v6621_v20 = vld [vmem:[#allocation19_spill] sm:$0xff] }
 0x25d   : > { %v2677_v15 = vadd.f32 %v2661_v61, %v2628_v22  ;;  %v2679_v48 = vadd.f32 %v2663_v9, %v2630_v3  ;;  %v5287_v41 = vadd.f32 %v2616_v2, %v2584_v30  ;;  %v2805_v1 = vmul.f32 %v5131_v23, %v6553_v29  ;;  %v1601_v9 = vld [vmem:[#allocation2 + $0xa6] sm:$0xff]  ;;  %v1602_v30 = vld [vmem:[#allocation2 + $0xae] sm:$0xff] }
 0x25e   : > { %v2807_v46 = vmul.f32 %v5207_v0, %v6553_v29  ;;  %v2853_v12 = vmul.f32 %v5158_v14, %v6554_v37  ;;  %v2854_v18 = vmul.f32 %v5223_v25, %v6554_v37  ;;  %v2855_v42 = vmul.f32 %v5225_v24, %v6554_v37  ;;  %v6624_v2 = vld [vmem:[#allocation40_spill] sm:$0xff]  ;;  %v6625_v3 = vld [vmem:[#allocation34_spill] sm:$0xff] }
 0x25f   : > { %v2725_v36 = vadd.f32 %v2709_v38, %v2677_v15  ;;  %v2727_v11 = vadd.f32 %v2711_v13, %v2679_v48  ;;  %v2822_v34 = vadd.f32 %v2806_v40, %v5217_v56  ;;  %v2902_v23 = vmul.f32 %v5169_v7, %v6555_v31  ;;  %v6623_v7 = vld [vmem:[#allocation32_spill] sm:$0xff]  ;;  %v6626_v15 = vld [vmem:[#allocation35_spill] sm:$0xff]  ;;  %v6627_v48 = vld [vmem:[#allocation41_spill] sm:$0xff] }
 0x260   : > { %v2950_v26 = vmul.f32 %v5175_v52, %v6556_v35  ;;  %v1767_v14 = vmul.f32 %v6621_v20, %v6620_v6  ;;  %v2998_v28 = vmul.f32 %v5185_v60, %v6616_v58  ;;  %v1768_v61 = vmul.f32 %v6621_v20, %v6622_v4  ;;  %v5316_v52 = vld [vmem:[%s6248_s3 + $0x18] ss:$0 sm:$0xff]  ;;  %v1650_v38 = vld [vmem:[#allocation2 + $0xa7] sm:$0xff] }
 0x261   : > { %v2773_v10 = vadd.f32 %v2757_v54, %v2725_v36  ;;  %v2775_v51 = vadd.f32 %v2759_v32, %v2727_v11  ;;  %v3045_v56 = vmul.f32 %v5199_v17, %v6621_v20  ;;  %v1816_v22 = vmul.f32 %v5316_v52, %v6624_v2  ;;  %v1651_v32 = vld [vmem:[#allocation2 + $0xaf] sm:$0xff] }
 0x262   : > { %v1783_v55 = vadd.f32 %v1767_v14, %v6623_v7  ;;  %v547_v60 = vadd.f32 %v6625_v3, %v546_v8  ;;  %v5323_v40 = vmul.f32 %v5207_v0, %v6621_v20  ;;  %v1784_v17 = vadd.f32 %v1768_v61, %v6626_v15  ;;  %v5334_v0 = vld [vmem:[%s6249_s4] ss:$0 sm:$0xff] }
 0x263   : > { %v2821_v13 = vadd.f32 %v2805_v1, %v2773_v10  ;;  %v1817_v54 = vmul.f32 %v5316_v52, %v6627_v48  ;;  %v1618_v6 = vmul.f32 %v6555_v31, %v1601_v9  ;;  %v1619_v14 = vmul.f32 %v6555_v31, %v1602_v30  ;;  %v1700_v10 = vld [vmem:[#allocation2 + $0xb0] sm:$0xff]  ;;  %v6629_v9 = vld [vmem:[#allocation31_spill] sm:$0xff] }
 0x264   : > { %v1832_v36 = vadd.f32 %v1816_v22, %v1783_v55  ;;  %v581_v11 = vmax.f32 %v547_v60, 0.0  ;;  %v2823_v4 = vadd.f32 %v2807_v46, %v2775_v51  ;;  %v1667_v1 = vmul.f32 %v6556_v35, %v1650_v38  ;;  %v6628_v55 = vld [vmem:[#allocation29_spill] sm:$0xff] }
 0x265   : > { %v2869_v8 = vadd.f32 %v2853_v12, %v2821_v13  ;;  %v1833_v7 = vadd.f32 %v1817_v54, %v1784_v17  ;;  %v1634_v2 = vadd.f32 %v1618_v6, %v6628_v55  ;;  %v1635_v22 = vadd.f32 %v1619_v14, %v6629_v9  ;;  %v1699_v12 = vld [vmem:[#allocation2 + $0xa8] sm:$0xff]  ;;  %v548_v54 = vpop.f32.mrf.mxu3 }
 0x266   : > { %v1851_v61 = vadd.f32 %v5334_v0, %v1832_v36  ;;  %614 = vst.msk [vmem:[#allocation2 + $0x228] sm:$0xff] %vm253_vm1, %v581_v11  ;;  %v1668_v46 = vmul.f32 %v6556_v35, %v1651_v32  ;;  %v2870_v51 = vadd.f32 %v2854_v18, %v2822_v34  ;;  %v5343_v60 = vmul.f32 %v5316_v52, %v5223_v25  ;;  %v6631_v32 = vld [vmem:[#allocation55_spill] sm:$0xff]  ;;  %v5350_v34 = vld [vmem:[#allocation2 + $0x246] sm:$0xff]  ;;  %v5362_v9 = vld [vmem:[#allocation2 + $0x24f] sm:$0xff] }
 0x267   : > { %v2918_v30 = vadd.f32 %v2902_v23, %v2869_v8  ;;  %v1852_v38 = vadd.f32 %v5334_v0, %v1833_v7  ;;  %v1683_v15 = vadd.f32 %v1667_v1, %v1634_v2  ;;  %v1717_v48 = vmul.f32 %v6616_v58, %v1700_v10  ;;  %v5357_v7 = vld [vmem:[#allocation2 + $0x24e] sm:$0xff] }
 0x268   : > { %6630 = vst [vmem:[#allocation37_spill] sm:$0xff] %v5343_v60  ;;  %v1867_v13 = vmax.f32 %v1851_v61, 0.0  ;;  %v1684_v17 = vadd.f32 %v1668_v46, %v1635_v22  ;;  %v1716_v6 = vmul.f32 %v6616_v58, %v1699_v12  ;;  %v1765_v18 = vmul.f32 %v6621_v20, %v6631_v32  ;;  %v2698_v2 = vld [vmem:[#allocation2 + $0x247] sm:$0xff] }
 0x269   : > { %v2966_v36 = vadd.f32 %v2950_v26, %v2918_v30  ;;  %v1868_v11 = vmax.f32 %v1852_v38, 0.0  ;;  %v5352_v23 = vadd.f32 %v2855_v42, %v2823_v4  ;;  %v5355_v25 = vadd.f32 %v3045_v56, %v5265_v53  ;;  %v6633_v26 = vld [vmem:[#allocation56_spill] sm:$0xff]  ;;  %v6634_v53 = vld [vmem:[#allocation25_spill] sm:$0xff]  ;;  %v6635_v56 = vld [vmem:[#allocation26_spill] sm:$0xff] }
 0x26a   : > { %v1883_v14 = vpack.c.bf16 %v1867_v13, %v1867_v13  ;;  %v1733_v8 = vadd.f32 %v1717_v48, %v1684_v17  ;;  %v1732_v10 = vadd.f32 %v1716_v6, %v1683_v15  ;;  %v1766_v61 = vmul.f32 %v6621_v20, %v6633_v26  ;;  %v5375_v12 = vld [vmem:[#allocation2 + $0x248] sm:$0xff] }
 0x26b   : > { %6632 = vst [vmem:[#allocation36_spill] sm:$0xff] %v5355_v25  ;;  %v1884_v1 = vpack.c.bf16 %v1868_v11, %v1868_v11  ;;  %v549_v55 = vadd.f32 %v6625_v3, %v548_v54  ;;  %v5364_v22 = vadd.f32 %v2998_v28, %v2966_v36  ;;  %v1814_v42 = vmul.f32 %v5316_v52, %v6634_v53 }
 0x26c   : > { %1900 = vst.msk [vmem:[#allocation3 + $0x10] sm:$0xf] %vm1895_vm3, %v1883_v14  ;;  %v1815_v4 = vmul.f32 %v5316_v52, %v6635_v56  ;;  %v5373_v46 = vmul.f32 %v5350_v34, %v6613_v63  ;;  %v1781_v38 = vadd.f32 %v1765_v18, %v1732_v10  ;;  %v1782_v13 = vadd.f32 %v1766_v61, %v1733_v8  ;;  %v5395_v14 = vld [vmem:[#allocation2 + $0x250] sm:$0xff] }
 0x26d   : > { %1901 = vst.msk [vmem:[#allocation3 + $0x14] sm:$0xf] %vm1895_vm3, %v1884_v1  ;;  %v2409_v3 = vld [vmem:[#allocation2 + $0x226] sm:$0xff]  ;;  %v582_v15 = vmax.f32 %v549_v55, 0.0  ;;  %v5380_v17 = vmul.f32 %v5357_v7, %v6613_v63  ;;  %v5385_v36 = vmul.f32 %v2698_v2, %v6614_v16  ;;  %v5389_v11 = vmul.f32 %v5362_v9, %v6614_v16 }
 0x26e   : > { %v2457_v30 = vld [vmem:[#allocation2 + $0x227] sm:$0xff]  ;;  %v2425_v48 = vmul.f32 %v2409_v3, %v6606_v57  ;;  %v2664_v54 = vmul.f32 %v2409_v3, %v6613_v63  ;;  %v2903_v18 = vmul.f32 %v2409_v3, %v6555_v31  ;;  %v5399_v8 = vmul.f32 %v5375_v12, %v6615_v21 }
 0x26f   : > { %v2505_v28 = vld [vmem:[#allocation2 + $0x228] sm:$0xff]  ;;  %v2473_v6 = vmul.f32 %v2457_v30, %v6607_v5  ;;  %615 = vst.msk [vmem:[#allocation2 + $0x230] sm:$0xff] %vm253_vm1, %v582_v15  ;;  %v2712_v26 = vmul.f32 %v2457_v30, %v6614_v16  ;;  %v2951_v56 = vmul.f32 %v2457_v30, %v6556_v35  ;;  %v1830_v3 = vadd.f32 %v1814_v42, %v1781_v38 }
 0x270   : > { %v2521_v32 = vmul.f32 %v2505_v28, %v6610_v45  ;;  %v2441_v1 = vadd.f32 %v2425_v48, %v5267_v39  ;;  %v2680_v10 = vadd.f32 %v2664_v54, %v5275_v19  ;;  %v2760_v61 = vmul.f32 %v2505_v28, %v6615_v21  ;;  %v5405_v55 = vld [vmem:[#allocation2 + $0x249] sm:$0xff]  ;;  %v5417_v48 = vld [vmem:[#allocation2 + $0x252] sm:$0xff] }
 0x271   : > { %v2919_v53 = vadd.f32 %v2903_v18, %v2870_v51  ;;  %v1831_v15 = vadd.f32 %v1815_v4, %v1782_v13  ;;  %v2999_v39 = vmul.f32 %v2505_v28, %v6616_v58  ;;  %v5415_v19 = vmul.f32 %v5395_v14, %v6615_v21 }
 0x272   : > { %v2489_v43 = vadd.f32 %v2473_v6, %v2441_v1  ;;  %v2728_v49 = vadd.f32 %v2712_v26, %v2680_v10  ;;  %v1849_v51 = vadd.f32 %v5334_v0, %v1830_v3  ;;  %v5423_v4 = vmul.f32 %v5405_v55, %v6553_v29 }
 0x273   : > { %v2967_v54 = vadd.f32 %v2951_v56, %v2919_v53  ;;  %v1850_v42 = vadd.f32 %v5334_v0, %v1831_v15  ;;  %v5427_v28 = vmul.f32 %v5408_v44, %v6553_v29  ;;  %v5431_v6 = vmul.f32 %v5410_v62, %v6554_v37 }
 0x274   : > { %v3662_v30 = vld [vmem:[#allocation3 + $0x10] sm:$0xff]  ;;  %v2537_v38 = vadd.f32 %v2521_v32, %v2489_v43  ;;  %v2776_v13 = vadd.f32 %v2760_v61, %v2728_v49  ;;  %v1865_v18 = vmax.f32 %v1849_v51, 0.0  ;;  %v5435_v10 = vmul.f32 %v5417_v48, %v6554_v37 }
 0x275   : > { %v1866_v1 = vmax.f32 %v1850_v42, 0.0  ;;  %v2905_v26 = vmul.f32 %v5350_v34, %v6555_v31  ;;  %v3310_v43 = vsel %vm253_vm1, %v3662_v30, 0  ;;  %v5440_v49 = vadd.f32 %v2999_v39, %v2967_v54 }
 0x276   : > { %v2410_v32 = vld [vmem:[#allocation2 + $0x22e] sm:$0xff]  ;;  %v5444_v56 = vmul.f32 %v5357_v7, %v6555_v31  ;;  %v2953_v3 = vmul.f32 %v2698_v2, %v6556_v35  ;;  %3356 = vmatpush.bf16.xpose.msra.mxu1 %v3310_v43  ;;  %v1881_v15 = vpack.c.bf16 %v1865_v18, %v1865_v18  ;;  %v5450_v39 = vmul.f32 %v5362_v9, %v6556_v35 }
 0x277   : > { %v2458_v61 = vld [vmem:[#allocation2 + $0x22f] sm:$0xff]  ;;  %v1882_v51 = vpack.c.bf16 %v1866_v1, %v1866_v1  ;;  %v2426_v42 = vmul.f32 %v2410_v32, %v6606_v57  ;;  %v5457_v2 = vmul.f32 %v5375_v12, %v6616_v58  ;;  %v2665_v43 = vmul.f32 %v2410_v32, %v6613_v63 }
 0x278   : > { %v2506_v53 = vld [vmem:[#allocation2 + $0x230] sm:$0xff]  ;;  %v2474_v54 = vmul.f32 %v2458_v61, %v6607_v5  ;;  %1898 = vst.msk [vmem:[#allocation3 + $0x8] sm:$0xf] %vm1895_vm3, %v1881_v15  ;;  %v2713_v57 = vmul.f32 %v2458_v61, %v6614_v16  ;;  %v2952_v16 = vmul.f32 %v2458_v61, %v6556_v35 }
 0x279   : > { %v2553_v59 = vld [vmem:[#allocation2 + $0x229] sm:$0xff]  ;;  %v2554_v34 = vld [vmem:[#allocation2 + $0x231] sm:$0xff]  ;;  %v2522_v30 = vmul.f32 %v2506_v53, %v6610_v45  ;;  %v2442_v18 = vadd.f32 %v2426_v42, %v5271_v27  ;;  %1899 = vst.msk [vmem:[#allocation3 + $0xc] sm:$0xf] %vm1895_vm3, %v1882_v51  ;;  %v2681_v15 = vadd.f32 %v2665_v43, %v5287_v41  ;;  %v2761_v27 = vmul.f32 %v2506_v53, %v6615_v21 }
 0x27a   : > { %v2601_v33 = vld [vmem:[#allocation2 + $0x22a] sm:$0xff]  ;;  %v2569_v7 = vmul.f32 %v2553_v59, %v6618_v50  ;;  %v2602_v60 = vld [vmem:[#allocation2 + $0x232] sm:$0xff]  ;;  %v2570_v1 = vmul.f32 %v2554_v34, %v6618_v50  ;;  %v2808_v12 = vmul.f32 %v2553_v59, %v6553_v29  ;;  %v2809_v42 = vmul.f32 %v2554_v34, %v6553_v29 }
 0x27b   : > { %v2617_v9 = vmul.f32 %v2601_v33, %v6619_v47  ;;  %v2618_v5 = vmul.f32 %v2602_v60, %v6619_v47  ;;  %v2490_v25 = vadd.f32 %v2474_v54, %v2442_v18  ;;  %v2856_v63 = vmul.f32 %v2601_v33, %v6554_v37  ;;  %v1746_v29 = vld [vmem:[#allocation2 + $0x89] sm:$0xff] }
 0x27c   : > { %v2585_v45 = vadd.f32 %v2569_v7, %v2537_v38  ;;  %v2824_v24 = vadd.f32 %v2808_v12, %v2776_v13  ;;  %v2904_v51 = vmul.f32 %v2410_v32, %v6555_v31  ;;  %v2729_v7 = vadd.f32 %v2713_v57, %v2681_v15  ;;  %v1795_v15 = vld [vmem:[#allocation2 + $0x8a] sm:$0xff] }
 0x27d   : > { %v2538_v38 = vadd.f32 %v2522_v30, %v2490_v25  ;;  %v2857_v47 = vmul.f32 %v2602_v60, %v6554_v37  ;;  %v3047_v43 = vmul.f32 %v2553_v59, %v6621_v20  ;;  %v3002_v25 = vmul.f32 %v5395_v14, %v6616_v58 }
 0x27e   : > { %v2633_v50 = vadd.f32 %v2617_v9, %v2585_v45  ;;  %v2872_v18 = vadd.f32 %v2856_v63, %v2824_v24  ;;  %v2920_v41 = vadd.f32 %v2904_v51, %v5352_v23  ;;  %v2777_v13 = vadd.f32 %v2761_v27, %v2729_v7  ;;  %v2891_v27 = vld [vmem:[#allocation2 + $0x266] sm:$0xff] }
 0x27f   : > { %v2586_v45 = vadd.f32 %v2570_v1, %v2538_v38  ;;  %v3000_v9 = vmul.f32 %v2506_v53, %v6616_v58  ;;  %v3048_v61 = vmul.f32 %v2554_v34, %v6621_v20  ;;  %v3095_v59 = vmul.f32 %v5316_v52, %v2601_v33  ;;  %v6637_v38 = vld [vmem:[#allocation30_spill] sm:$0xff] }
 0x280   : > { %v2682_v54 = vadd.f32 %v5373_v46, %v2633_v50  ;;  %v2921_v32 = vadd.f32 %v2905_v26, %v2872_v18  ;;  %v2968_v30 = vadd.f32 %v2952_v16, %v2920_v41  ;;  %v1747_v50 = vld [vmem:[#allocation2 + $0x91] sm:$0xff]  ;;  %v3661_v63 = vld [vmem:[#allocation3 + $0x8] sm:$0xff]  ;;  %v2825_v23 = vadd.f32 %v2809_v42, %v2777_v13 }
 0x281   : > { %v2634_v24 = vadd.f32 %v2618_v5, %v2586_v45  ;;  %v1763_v46 = vmul.f32 %v6621_v20, %v1746_v29  ;;  %v3063_v14 = vadd.f32 %v3047_v43, %v5440_v49  ;;  %v1764_v34 = vmul.f32 %v6621_v20, %v1747_v50  ;;  %v1796_v5 = vld [vmem:[#allocation2 + $0x92] sm:$0xff] }
 0x282   : > { %v2730_v57 = vadd.f32 %v5385_v36, %v2682_v54  ;;  %v2969_v53 = vadd.f32 %v2953_v3, %v2921_v32  ;;  %v3016_v12 = vadd.f32 %v3000_v9, %v2968_v30  ;;  %v3307_v36 = vsel %vm253_vm1, %v3661_v63, 0  ;;  %v6636_v3 = vld [vmem:[#allocation28_spill] sm:$0xff]  ;;  %v2940_v9 = vld [vmem:[#allocation2 + $0x26f] sm:$0xff] }
 0x283   : > { %v2683_v16 = vadd.f32 %v5380_v17, %v2634_v24  ;;  %v2873_v26 = vadd.f32 %v2857_v47, %v2825_v23  ;;  %3357 = vmatpush.bf16.xpose.msra.mxu1 %v3307_v36  ;;  %v1779_v42 = vadd.f32 %v1763_v46, %v6636_v3  ;;  %v1780_v7 = vadd.f32 %v1764_v34, %v6637_v38  ;;  %v2939_v17 = vld [vmem:[#allocation2 + $0x267] sm:$0xff]  ;;  %v2988_v50 = vld [vmem:[#allocation2 + $0x270] sm:$0xff] }
 0x284   : > { %v2778_v1 = vadd.f32 %v5399_v8, %v2730_v57  ;;  %v3064_v29 = vadd.f32 %v3048_v61, %v3016_v12  ;;  %v3096_v8 = vmul.f32 %v5316_v52, %v2602_v60  ;;  %v1812_v47 = vmul.f32 %v5316_v52, %v1795_v15  ;;  %v2987_v60 = vld [vmem:[#allocation2 + $0x268] sm:$0xff] }
 0x285   : > { %v2731_v49 = vadd.f32 %v5389_v11, %v2683_v16  ;;  %v2922_v51 = vadd.f32 %v5444_v56, %v2873_v26  ;;  %v3111_v18 = vadd.f32 %v3095_v59, %v3063_v14  ;;  %v1813_v41 = vmul.f32 %v5316_v52, %v1796_v5  ;;  %v3035_v57 = vld [vmem:[#allocation2 + $0x269] sm:$0xff] }
 0x286   : > { %v2826_v33 = vadd.f32 %v5423_v4, %v2778_v1  ;;  %v2892_v4 = vld [vmem:[#allocation2 + $0x26e] sm:$0xff]  ;;  %v2907_v43 = vmul.f32 %v2891_v27, %v6555_v31  ;;  %v3017_v56 = vadd.f32 %v5457_v2, %v2969_v53  ;;  %v1828_v13 = vadd.f32 %v1812_v47, %v1779_v42 }
 0x287   : > { %v2779_v45 = vadd.f32 %v5415_v19, %v2731_v49  ;;  %v2970_v11 = vadd.f32 %v5450_v39, %v2922_v51  ;;  %v3112_v32 = vadd.f32 %v3096_v8, %v3064_v29  ;;  %v1829_v30 = vadd.f32 %v1813_v41, %v1780_v7  ;;  %v3036_v39 = vld [vmem:[#allocation2 + $0x271] sm:$0xff] }
 0x288   : > { %v2874_v54 = vadd.f32 %v5431_v6, %v2826_v33  ;;  %v2955_v6 = vmul.f32 %v2939_v17, %v6556_v35  ;;  %v1847_v24 = vadd.f32 %v5334_v0, %v1828_v13  ;;  %v2908_v23 = vmul.f32 %v2892_v4, %v6555_v31  ;;  %v3083_v59 = vld [vmem:[#allocation2 + $0x26a] sm:$0xff]  ;;  %v3084_v33 = vld [vmem:[#allocation2 + $0x272] sm:$0xff] }
 0x289   : > { %v2827_v63 = vadd.f32 %v5427_v28, %v2779_v45  ;;  %v3003_v19 = vmul.f32 %v2987_v60, %v6616_v58  ;;  %v1848_v2 = vadd.f32 %v5334_v0, %v1829_v30  ;;  %v2956_v46 = vmul.f32 %v2940_v9, %v6556_v35  ;;  %v6638_v4 = vld [vmem:[#allocation54_spill] sm:$0xff]  ;;  %v6639_v60 = vld [vmem:[#allocation36_spill] sm:$0xff]  ;;  %v6640_v45 = vld [vmem:[#allocation37_spill] sm:$0xff] }
 0x28a   : > { %v2923_v61 = vadd.f32 %v2907_v43, %v2874_v54  ;;  %v3051_v53 = vmul.f32 %v3035_v57, %v6621_v20  ;;  %v3018_v14 = vadd.f32 %v3002_v25, %v2970_v11  ;;  %v1863_v15 = vmax.f32 %v1847_v24, 0.0 }
 0x28b   : > { %v2875_v12 = vadd.f32 %v5435_v10, %v2827_v63  ;;  %v3004_v28 = vmul.f32 %v2988_v50, %v6616_v58  ;;  %v1864_v36 = vmax.f32 %v1848_v2, 0.0  ;;  %v3052_v26 = vmul.f32 %v3036_v39, %v6621_v20  ;;  %v3584_v2 = vld [vmem:[%s6250_s5] sm:$0xf] }
 0x28c   : > { %v2971_v1 = vadd.f32 %v2955_v6, %v2923_v61  ;;  %v3099_v34 = vmul.f32 %v5316_v52, %v3083_v59  ;;  %v1879_v5 = vpack.c.bf16 %v1863_v15, %v1863_v15  ;;  %v3049_v29 = vmul.f32 %v5405_v55, %v6621_v20 }
 0x28d   : > { %v2924_v27 = vadd.f32 %v2908_v23, %v2875_v12  ;;  %v3050_v8 = vmul.f32 %v5408_v44, %v6621_v20  ;;  %v1880_v10 = vpack.c.bf16 %v1864_v36, %v1864_v36  ;;  %v3097_v3 = vmul.f32 %v5316_v52, %v5410_v62 }
 0x28e   : > { %v3019_v16 = vadd.f32 %v3003_v19, %v2971_v1  ;;  %v3098_v42 = vmul.f32 %v5316_v52, %v5417_v48  ;;  %1896 = vst.msk [vmem:[#allocation3] sm:$0xf] %vm1895_vm3, %v1879_v5  ;;  %v3065_v51 = vadd.f32 %v3049_v29, %v3017_v56  ;;  %v3127_v7 = vadd.f32 %v5334_v0, %v3111_v18  ;;  %v5557_v5 = vld [vmem:[#allocation2 + $0x166] sm:$0xff] }
 0x28f   : > { %v2972_v49 = vadd.f32 %v2956_v46, %v2924_v27  ;;  %v3066_v38 = vadd.f32 %v3050_v8, %v3018_v14  ;;  %v3062_v55 = vadd.f32 %v5323_v40, %v5364_v22  ;;  %1897 = vst.msk [vmem:[#allocation3 + $0x4] sm:$0xf] %vm1895_vm3, %v1880_v10  ;;  %v3100_v44 = vmul.f32 %v5316_v52, %v3084_v33  ;;  %v3659_v14 = vld [vmem:[%s6250_s5] sm:$0x30]  ;;  %v5559_v27 = vld [vmem:[#allocation2 + $0x16e] sm:$0xff] }
 0x290   : > { %v3067_v25 = vadd.f32 %v3051_v53, %v3019_v16  ;;  %v3128_v62 = vadd.f32 %v5334_v0, %v3112_v32  ;;  %v3113_v54 = vadd.f32 %v3097_v3, %v3065_v51  ;;  %v3143_v41 = vmax.f32 %v3127_v7, 0.0  ;;  %6642 = vst [vmem:[#allocation43_spill] sm:$0xff] %v5559_v27  ;;  %v5561_v33 = vld [vmem:[#allocation2 + $0x167] sm:$0xff]  ;;  %v5568_v3 = vld [vmem:[#allocation2 + $0x16f] sm:$0xff] }
 0x291   : > { %v3020_v17 = vadd.f32 %v3004_v28, %v2972_v49  ;;  %v3114_v48 = vadd.f32 %v3098_v42, %v3066_v38  ;;  %v3094_v43 = vmul.f32 %v5316_v52, %v6638_v4  ;;  %v3109_v18 = vadd.f32 %v6640_v45, %v6639_v60  ;;  %6643 = vst [vmem:[#allocation44_spill] sm:$0xff] %v5561_v33  ;;  %v6644_v29 = vld [vmem:[#allocation4_spill] sm:$0xff]  ;;  %v6646_v42 = vld [vmem:[#allocation5_spill] sm:$0xff]  ;;  %v5574_v38 = vld [vmem:[#allocation2 + $0x170] sm:$0xff] }
 0x292   : > { %v3115_v47 = vadd.f32 %v3099_v34, %v3067_v25  ;;  %v3144_v40 = vmax.f32 %v3128_v62, 0.0  ;;  %v3129_v56 = vadd.f32 %v5334_v0, %v3113_v54  ;;  %v3159_v9 = vpack.c.bf16 %v3143_v41, %v3143_v41  ;;  %v1961_v34 = vld [vmem:[#allocation2 + $0x107] sm:$0xff]  ;;  %6645 = vst [vmem:[#allocation45_spill] sm:$0xff] %v5568_v3  ;;  %v6650_v62 = vld [vmem:[#allocation6_spill] sm:$0xff] }
 0x293   : > { %v3068_v22 = vadd.f32 %v3052_v26, %v3020_v17  ;;  %v3130_v13 = vadd.f32 %v5334_v0, %v3114_v48  ;;  %v3110_v57 = vadd.f32 %v3094_v43, %v3062_v55  ;;  %v3125_v59 = vadd.f32 %v5334_v0, %v3109_v18  ;;  %v1913_v26 = vld [vmem:[#allocation2 + $0x106] sm:$0xff]  ;;  %6648 = vst [vmem:[#allocation47_spill] sm:$0xff] %v5574_v38  ;;  %v5585_v54 = vld [vmem:[#allocation2 + $0x171] sm:$0xff] }
 0x294   : > { %v3131_v11 = vadd.f32 %v5334_v0, %v3115_v47  ;;  %v3160_v30 = vpack.c.bf16 %v3144_v40, %v3144_v40  ;;  %v3145_v6 = vmax.f32 %v3129_v56, 0.0  ;;  %3175 = vst.msk [vmem:[#allocation3 + $0x68] sm:$0xf] %vm1895_vm3, %v3159_v9  ;;  %v1929_v8 = vmul.f32 %v1913_v26, %v6644_v29  ;;  %v5572_v51 = vld [vmem:[#allocation2 + $0x168] sm:$0xff]  ;;  %v6652_v48 = vld [vmem:[#allocation7_spill] sm:$0xff] }
 0x295   : > { %v3116_v61 = vadd.f32 %v3100_v44, %v3068_v22  ;;  %v3146_v50 = vmax.f32 %v3130_v13, 0.0  ;;  %v3126_v46 = vadd.f32 %v5334_v0, %v3110_v57  ;;  %v3141_v12 = vmax.f32 %v3125_v59, 0.0  ;;  %6647 = vst [vmem:[#allocation46_spill] sm:$0xff] %v5572_v51  ;;  %v5581_v44 = vld [vmem:[#allocation2 + $0x169] sm:$0xff]  ;;  %v5595_v56 = vld [vmem:[#allocation2 + $0x172] sm:$0xff] }
 0x296   : > { %v3147_v32 = vmax.f32 %v3131_v11, 0.0  ;;  %3176 = vst.msk [vmem:[#allocation3 + $0x6c] sm:$0xf] %vm1895_vm3, %v3160_v30  ;;  %v3660_v24 = vld [vmem:[#allocation3] sm:$0xff]  ;;  %v3161_v19 = vpack.c.bf16 %v3145_v6, %v3145_v6  ;;  %v1935_v10 = vmul.f32 %v5557_v5, %v6644_v29  ;;  %v1936_v25 = vmul.f32 %v5559_v27, %v6644_v29  ;;  %v2009_v4 = vld [vmem:[#allocation2 + $0x108] sm:$0xff] }
 0x297   : > { %v3132_v23 = vadd.f32 %v5334_v0, %v3116_v61  ;;  %v3162_v39 = vpack.c.bf16 %v3146_v50, %v3146_v50  ;;  %v3304_v1 = vsel %vm253_vm1, %v3660_v24, 0  ;;  %v3142_v15 = vmax.f32 %v3126_v46, 0.0  ;;  %6649 = vst [vmem:[#allocation51_spill] sm:$0xff] %v5581_v44  ;;  %v5591_v18 = vld [vmem:[#allocation2 + $0x16a] sm:$0xff] }
 0x298   : > { %v3163_v63 = vpack.c.bf16 %v3147_v32, %v3147_v32  ;;  %3177 = vst.msk [vmem:[#allocation3 + $0x70] sm:$0xf] %vm1895_vm3, %v3161_v19  ;;  %3358 = vmatpush.bf16.xpose.msra.mxu1 %v3304_v1  ;;  %v3157_v36 = vpack.c.bf16 %v3141_v12, %v3141_v12  ;;  %v5553_v0 = vor.u32 %v3659_v14, %v3584_v2  ;;  %v5593_v11 = vld [vmem:[#allocation2 + $0x186] sm:$0xff]  ;;  %v5597_v13 = vld [vmem:[#allocation2 + $0x18e] sm:$0xff] }
 0x299   : > { %v3148_v53 = vmax.f32 %v3132_v23, 0.0  ;;  %3178 = vst.msk [vmem:[#allocation3 + $0x74] sm:$0xf] %vm1895_vm3, %v3162_v39  ;;  %v3158_v16 = vpack.c.bf16 %v3142_v15, %v3142_v15  ;;  %v1983_v49 = vmul.f32 %v5561_v33, %v6646_v42  ;;  %v1977_v7 = vmul.f32 %v1961_v34, %v6646_v42  ;;  %v6658_v23 = vld [vmem:[#allocation9_spill] sm:$0xff]  ;;  %v5617_v12 = vld [vmem:[#allocation2 + $0x190] sm:$0xff] }
 0x29a   : > { %3179 = vst.msk [vmem:[#allocation3 + $0x78] sm:$0xf] %vm1895_vm3, %v3163_v63  ;;  %v1984_v55 = vmul.f32 %v5568_v3, %v6646_v42  ;;  %v2031_v17 = vmul.f32 %v5572_v51, %v6650_v62  ;;  %v2079_v41 = vmul.f32 %v5581_v44, %v6652_v48  ;;  %v2032_v45 = vmul.f32 %v5574_v38, %v6650_v62  ;;  %v6657_v63 = vld [vmem:[#allocation8_spill] sm:$0xff]  ;;  %v5609_v59 = vld [vmem:[#allocation2 + $0x18f] sm:$0xff] }
 0x29b   : > { %v3164_v28 = vpack.c.bf16 %v3148_v53, %v3148_v53  ;;  %6641 = vst [vmem:[#allocation42_spill] sm:$0xff] %v5553_v0  ;;  %v1999_v47 = vadd.f32 %v1983_v49, %v1935_v10  ;;  %v1993_v9 = vadd.f32 %v1977_v7, %v1929_v8  ;;  %v2080_v30 = vmul.f32 %v5585_v54, %v6652_v48  ;;  %v5607_v39 = vld [vmem:[#allocation2 + $0x187] sm:$0xff]  ;;  %v5621_v15 = vld [vmem:[#allocation2 + $0x191] sm:$0xff] }
 0x29c   : > { %3173 = vst.msk [vmem:[#allocation3 + $0x60] sm:$0xf] %vm1895_vm3, %v3157_v36  ;;  %v2000_v60 = vadd.f32 %v1984_v55, %v1936_v25  ;;  %v2025_v61 = vmul.f32 %v2009_v4, %v6650_v62  ;;  %v2127_v24 = vmul.f32 %v5591_v18, %v6657_v63  ;;  %v2176_v19 = vmul.f32 %v5593_v11, %v6658_v23  ;;  %v5611_v2 = vld [vmem:[#allocation2 + $0x188] sm:$0xff]  ;;  %v5628_v34 = vld [vmem:[#allocation2 + $0x192] sm:$0xff] }
 0x29d   : > { %3180 = vst.msk [vmem:[#allocation3 + $0x7c] sm:$0xf] %vm1895_vm3, %v3164_v28  ;;  %v3673_v43 = vld [vmem:[#allocation3 + $0x68] sm:$0xff]  ;;  %v2047_v22 = vadd.f32 %v2031_v17, %v1999_v47  ;;  %v2128_v1 = vmul.f32 %v5595_v56, %v6657_v63  ;;  %v2177_v53 = vmul.f32 %v5597_v13, %v6658_v23  ;;  %v6667_v49 = vld [vmem:[#allocation10_spill] sm:$0xff]  ;;  %v6670_v4 = vld [vmem:[#allocation11_spill] sm:$0xff] }
 0x29e   : > { %3174 = vst.msk [vmem:[#allocation3 + $0x64] sm:$0xf] %vm1895_vm3, %v3158_v16  ;;  %v2048_v32 = vadd.f32 %v2032_v45, %v2000_v60  ;;  %v5619_v14 = vld [vmem:[#allocation2 + $0x189] sm:$0xff]  ;;  %v5624_v28 = vsel %vm253_vm1, %v3673_v43, 0  ;;  %v5630_v8 = vadd.f32 %v2025_v61, %v1993_v9  ;;  %v2224_v7 = vmul.f32 %v5607_v39, %v6667_v49  ;;  %v6671_v45 = vld [vmem:[#allocation12_spill] sm:$0xff] }
 0x29f   : > { %3650 = vmatmul.msk.bf16.vlgmr.msra.gmra.mxu1 %vm253_vm1, %v5553_v0  ;;  %6651 = vst [vmem:[#allocation52_spill] sm:$0xff] %v5585_v54  ;;  %v2095_v50 = vadd.f32 %v2079_v41, %v2047_v22  ;;  %v5626_v26 = vld [vmem:[#allocation2 + $0x18a] sm:$0xff]  ;;  %v2225_v55 = vmul.f32 %v5609_v59, %v6667_v49  ;;  %v2272_v43 = vmul.f32 %v5611_v2, %v6670_v4 }
 0x2a0   : > { %6653 = vst [vmem:[#allocation53_spill] sm:$0xff] %v5591_v18  ;;  %v3674_v57 = vld [vmem:[#allocation3 + $0x70] sm:$0xff]  ;;  %v2096_v46 = vadd.f32 %v2080_v30, %v2048_v32  ;;  %v5637_v47 = vld [vmem:[#allocation2 + $0x1a6] sm:$0xff]  ;;  %v2273_v60 = vmul.f32 %v5617_v12, %v6670_v4  ;;  %v2321_v30 = vmul.f32 %v5621_v15, %v6671_v45 }
 0x2a1   : > { %6654 = vst [vmem:[#allocation48_spill] sm:$0xff] %v5593_v11  ;;  %v2143_v16 = vadd.f32 %v2127_v24, %v2095_v50  ;;  %v3346_v10 = vsel %vm253_vm1, %v3674_v57, 0  ;;  %v5639_v17 = vld [vmem:[#allocation2 + $0x1ae] sm:$0xff] }
 0x2a2   : > { %6655 = vst [vmem:[#allocation38_spill] sm:$0xff] %v5595_v56  ;;  %v2144_v25 = vadd.f32 %v2128_v1, %v2096_v46  ;;  %v5647_v22 = vld [vmem:[#allocation2 + $0x1a7] sm:$0xff]  ;;  %v5649_v9 = vld [vmem:[#allocation2 + $0x1af] sm:$0xff] }
 0x2a3   : > { %6656 = vst [vmem:[#allocation49_spill] sm:$0xff] %v5597_v13  ;;  %v2192_v41 = vadd.f32 %v2176_v19, %v2143_v16  ;;  %v5651_v57 = vld [vmem:[#allocation2 + $0x1a8] sm:$0xff]  ;;  %v5659_v24 = vld [vmem:[#allocation2 + $0x1b0] sm:$0xff] }
 0x2a4   : > { %v3675_v40 = vld [vmem:[#allocation3 + $0x78] sm:$0xff]  ;;  %6659 = vst [vmem:[#allocation50_spill] sm:$0xff] %v5607_v39  ;;  %v2193_v32 = vadd.f32 %v2177_v53, %v2144_v25  ;;  %v6675_v61 = vld [vmem:[#allocation13_spill] sm:$0xff]  ;;  %v6679_v53 = vld [vmem:[#allocation14_spill] sm:$0xff] }
 0x2a5   : > { %v3349_v6 = vsel %vm253_vm1, %v3675_v40, 0  ;;  %6660 = vst [vmem:[#allocation27_spill] sm:$0xff] %v5609_v59  ;;  %v3672_v36 = vld [vmem:[#allocation3 + $0x60] sm:$0xff]  ;;  %v2320_v40 = vmul.f32 %v5619_v14, %v6671_v45  ;;  %v2369_v50 = vmul.f32 %v5628_v34, %v6675_v61  ;;  %v5661_v19 = vld [vmem:[#allocation2 + $0x1a9] sm:$0xff]  ;;  %v5663_v46 = vld [vmem:[#allocation2 + $0x1b1] sm:$0xff]  ;;  %v2240_v16 = vadd.f32 %v2224_v7, %v2192_v41 }
 0x2a6   : > { %6661 = vst [vmem:[#allocation33_spill] sm:$0xff] %v5611_v2  ;;  %3365 = vmatpush.bf16.xpose.msra.mxu2 %v3349_v6  ;;  %v2368_v6 = vmul.f32 %v5626_v26, %v6675_v61  ;;  %v5666_v1 = vsel %vm253_vm1, %v3672_v36, 0  ;;  %v2417_v25 = vmul.f32 %v5637_v47, %v6679_v53  ;;  %v2418_v0 = vmul.f32 %v5639_v17, %v6679_v53  ;;  %v6684_v7 = vld [vmem:[#allocation16_spill] sm:$0xff]  ;;  %v5692_v59 = vld [vmem:[#allocation2 + $0x1cf] sm:$0xff] }
 0x2a7   : > { %6662 = vst [vmem:[#allocation39_spill] sm:$0xff] %v5617_v12  ;;  %v6683_v12 = vld [vmem:[#allocation15_spill] sm:$0xff]  ;;  %v5686_v41 = vmul.f32 %v5651_v57, %v6684_v7  ;;  %v2288_v39 = vadd.f32 %v2272_v43, %v2240_v16  ;;  %v5710_v13 = vld [vmem:[#allocation2 + $0x1c9] sm:$0xff] }
 0x2a8   : > { %6663 = vst [vmem:[#allocation32_spill] sm:$0xff] %v5619_v14  ;;  %v2241_v14 = vadd.f32 %v2225_v55, %v2193_v32  ;;  %v2465_v2 = vmul.f32 %v5647_v22, %v6683_v12  ;;  %v5682_v36 = vmul.f32 %v5649_v9, %v6683_v12  ;;  %v5696_v55 = vmul.f32 %v5659_v24, %v6684_v7  ;;  %v6688_v32 = vld [vmem:[#allocation17_spill] sm:$0xff]  ;;  %v5708_v12 = vld [vmem:[#allocation2 + $0x1d0] sm:$0xff]  ;;  %v6693_v7 = vld [vmem:[#allocation20_spill] sm:$0xff] }
 0x2a9   : > { %6664 = vst [vmem:[#allocation40_spill] sm:$0xff] %v5621_v15  ;;  %v5674_v15 = vld [vmem:[#allocation2 + $0x1b2] sm:$0xff]  ;;  %v5726_v11 = vld [vmem:[#allocation2 + $0x1ca] sm:$0xff]  ;;  %v2336_v53 = vadd.f32 %v2320_v40, %v2288_v39  ;;  %v5748_v40 = vmul.f32 %v5708_v12, %v6615_v21 }
 0x2aa   : > { %6665 = vst [vmem:[#allocation34_spill] sm:$0xff] %v5626_v26  ;;  %v5672_v26 = vld [vmem:[#allocation2 + $0x1aa] sm:$0xff]  ;;  %v2289_v43 = vadd.f32 %v2273_v60, %v2241_v14 }
 0x2ab   : > { %6666 = vst [vmem:[#allocation35_spill] sm:$0xff] %v5628_v34  ;;  %v5676_v34 = vld [vmem:[#allocation2 + $0x1c6] sm:$0xff]  ;;  %v6692_v16 = vld [vmem:[#allocation18_spill] sm:$0xff]  ;;  %v2384_v18 = vadd.f32 %v2368_v6, %v2336_v53 }
 0x2ac   : > { %6668 = vst [vmem:[#allocation41_spill] sm:$0xff] %v5637_v47  ;;  %v5688_v47 = vld [vmem:[#allocation2 + $0x1ce] sm:$0xff]  ;;  %v2337_v56 = vadd.f32 %v2321_v30, %v2289_v43 }
 0x2ad   : > { %6669 = vst [vmem:[#allocation29_spill] sm:$0xff] %v5639_v17  ;;  %v5690_v17 = vld [vmem:[#allocation2 + $0x1c7] sm:$0xff]  ;;  %v5730_v14 = vmul.f32 %v5688_v47, %v6693_v7  ;;  %v2980_v51 = vld [vmem:[#allocation2 + $0x1f0] sm:$0xff] }
 0x2ae   : > { %6672 = vst [vmem:[#allocation31_spill] sm:$0xff] %v5647_v22  ;;  %v5700_v22 = vmul.f32 %v5661_v19, %v6688_v32  ;;  %3366 = vmatpush.bf16.xpose.msra.mxu2 %v3346_v10  ;;  %v6696_v10 = vld [vmem:[#allocation21_spill] sm:$0xff]  ;;  %v2385_v54 = vadd.f32 %v2369_v50, %v2337_v56 }
 0x2af   : > { %6673 = vst [vmem:[#allocation55_spill] sm:$0xff] %v5649_v9  ;;  %v5704_v9 = vmul.f32 %v5663_v46, %v6688_v32  ;;  %v5724_v32 = vld [vmem:[#allocation2 + $0x1d1] sm:$0xff]  ;;  %v5734_v60 = vmul.f32 %v5690_v17, %v6696_v10  ;;  %v1963_v6 = vld [vmem:[#allocation2 + $0x127] sm:$0xff] }
 0x2b0   : > { %6674 = vst [vmem:[#allocation56_spill] sm:$0xff] %v5651_v57  ;;  %v5706_v57 = vld [vmem:[#allocation2 + $0x1c8] sm:$0xff] }
 0x2b1   : > { %6676 = vst [vmem:[#allocation25_spill] sm:$0xff] %v5659_v24  ;;  %v5714_v24 = vmul.f32 %v5672_v26, %v6692_v16  ;;  %v5744_v39 = vmul.f32 %v5706_v57, %v6615_v21  ;;  %v2884_v30 = vld [vmem:[#allocation2 + $0x1ee] sm:$0xff]  ;;  %v1915_v21 = vld [vmem:[#allocation2 + $0x126] sm:$0xff] }
 0x2b2   : > { %6677 = vst [vmem:[#allocation26_spill] sm:$0xff] %v5661_v19  ;;  %v5718_v19 = vmul.f32 %v5674_v15, %v6692_v16  ;;  %v1914_v16 = vld [vmem:[#allocation2 + $0x10e] sm:$0xff]  ;;  %v1931_v56 = vmul.f32 %v1915_v21, %v6644_v29  ;;  %v2170_v27 = vmul.f32 %v1915_v21, %v6658_v23  ;;  %v5794_v21 = vmul.f32 %v2980_v51, %v6616_v58 }
 0x2b3   : > { %6678 = vst [vmem:[#allocation28_spill] sm:$0xff] %v5663_v46  ;;  %v5722_v46 = vmul.f32 %v5676_v34, %v6693_v7  ;;  %v1962_v7 = vld [vmem:[#allocation2 + $0x10f] sm:$0xff]  ;;  %v1930_v43 = vmul.f32 %v1914_v16, %v6644_v29  ;;  %v2931_v16 = vld [vmem:[#allocation2 + $0x1e7] sm:$0xff] }
 0x2b4   : > { %6680 = vst [vmem:[#allocation30_spill] sm:$0xff] %v5672_v26  ;;  %v5740_v26 = vld [vmem:[#allocation2 + $0x1d2] sm:$0xff]  ;;  %v2979_v38 = vld [vmem:[#allocation2 + $0x1e8] sm:$0xff] }
 0x2b5   : > { %6681 = vst [vmem:[#allocation54_spill] sm:$0xff] %v5674_v15  ;;  %v5738_v15 = vmul.f32 %v5692_v59, %v6696_v10  ;;  %v2057_v10 = vld [vmem:[#allocation2 + $0x109] sm:$0xff]  ;;  %v2106_v51 = vld [vmem:[#allocation2 + $0x112] sm:$0xff] }
 0x2b6   : > { %6682 = vst [vmem:[#allocation36_spill] sm:$0xff] %v5676_v34  ;;  %v2883_v34 = vld [vmem:[#allocation2 + $0x1e6] sm:$0xff]  ;;  %v2073_v53 = vmul.f32 %v2057_v10, %v6652_v48  ;;  %3367 = vmatpush.bf16.xpose.msra.mxu2 %v5624_v28  ;;  %v3076_v28 = vld [vmem:[#allocation2 + $0x1f2] sm:$0xff] }
 0x2b7   : > { %6685 = vst [vmem:[#allocation37_spill] sm:$0xff] %v5688_v47  ;;  %v6698_v47 = vld [vmem:[#allocation23_spill] sm:$0xff]  ;;  %v5770_v44 = vmul.f32 %v2883_v34, %v6555_v31  ;;  %v3027_v34 = vld [vmem:[#allocation2 + $0x1e9] sm:$0xff] }
 0x2b8   : > { %6686 = vst [vmem:[#allocation4_spill] sm:$0xff] %v5690_v17  ;;  %v5752_v17 = vmul.f32 %v5710_v13, %v6698_v47  ;;  %v5756_v61 = vmul.f32 %v5724_v32, %v6698_v47  ;;  %v2433_v47 = vadd.f32 %v2417_v25, %v2384_v18  ;;  %v2089_v3 = vadd.f32 %v2073_v53, %v5630_v8  ;;  %v2058_v25 = vld [vmem:[#allocation2 + $0x111] sm:$0xff] }
 0x2b9   : > { %6687 = vst [vmem:[#allocation5_spill] sm:$0xff] %v5692_v59  ;;  %v2010_v59 = vld [vmem:[#allocation2 + $0x110] sm:$0xff]  ;;  %v5777_v18 = vmul.f32 %v2884_v30, %v6555_v31  ;;  %v5791_v30 = vmul.f32 %v2979_v38, %v6616_v58 }
 0x2ba   : > { %6689 = vst [vmem:[#allocation6_spill] sm:$0xff] %v5706_v57  ;;  %v1978_v57 = vmul.f32 %v1962_v7, %v6646_v42  ;;  %v2932_v7 = vld [vmem:[#allocation2 + $0x1ef] sm:$0xff]  ;;  %v2026_v50 = vmul.f32 %v2010_v59, %v6650_v62  ;;  %v2481_v10 = vadd.f32 %v2465_v2, %v2433_v47 }
 0x2bb   : > { %6690 = vst [vmem:[#allocation7_spill] sm:$0xff] %v5708_v12  ;;  %v5762_v12 = vmul.f32 %v5726_v11, %v6554_v37  ;;  %v5787_v59 = vmul.f32 %v2932_v7, %v6556_v35  ;;  %v3028_v2 = vld [vmem:[#allocation2 + $0x1f1] sm:$0xff] }
 0x2bc   : > { %6691 = vst [vmem:[#allocation8_spill] sm:$0xff] %v5710_v13  ;;  %v5766_v13 = vmul.f32 %v5740_v26, %v6554_v37  ;;  %v1994_v37 = vadd.f32 %v1978_v57, %v1930_v43  ;;  %v3075_v8 = vld [vmem:[#allocation2 + $0x1ea] sm:$0xff]  ;;  %v2529_v57 = vadd.f32 %v5686_v41, %v2481_v10  ;;  %v5798_v43 = vmul.f32 %v3027_v34, %v6621_v20 }
 0x2bd   : > { %6694 = vst [vmem:[#allocation9_spill] sm:$0xff] %v5724_v32  ;;  %v2105_v32 = vld [vmem:[#allocation2 + $0x10a] sm:$0xff]  ;;  %v5803_v41 = vmul.f32 %v3028_v2, %v6621_v20  ;;  %v5806_v38 = vmul.f32 %v5316_v52, %v3075_v8 }
 0x2be   : > { %6695 = vst [vmem:[#allocation10_spill] sm:$0xff] %v5726_v11  ;;  %v2434_v11 = vadd.f32 %v2418_v0, %v2385_v54  ;;  %v2121_v33 = vmul.f32 %v2105_v32, %v6657_v63  ;;  %v5784_v54 = vmul.f32 %v2931_v16, %v6556_v35  ;;  %v2042_v47 = vadd.f32 %v2026_v50, %v1994_v37  ;;  %v2011_v32 = vld [vmem:[#allocation2 + $0x128] sm:$0xff] }
 0x2bf   : > { %6697 = vst [vmem:[#allocation11_spill] sm:$0xff] %v5740_v26  ;;  %v1979_v26 = vmul.f32 %v1963_v6, %v6646_v42  ;;  %v2074_v16 = vmul.f32 %v2058_v25, %v6652_v48  ;;  %v2577_v37 = vadd.f32 %v5700_v22, %v2529_v57  ;;  %v1964_v50 = vld [vmem:[#allocation2 + $0x12f] sm:$0xff]  ;;  %3368 = vmatpush.bf16.xpose.msra.mxu2 %v5666_v1 }
 0x2c0   : > { %v2482_v0 = vadd.f32 %v5682_v36, %v2434_v11  ;;  %v2137_v11 = vadd.f32 %v2121_v33, %v2089_v3  ;;  %v5810_v3 = vmul.f32 %v5316_v52, %v3076_v28  ;;  %v1980_v34 = vmul.f32 %v1964_v50, %v6646_v42  ;;  %v2012_v25 = vld [vmem:[#allocation2 + $0x130] sm:$0xff] }
 0x2c1   : > { %v1995_v53 = vadd.f32 %v1979_v26, %v1931_v56  ;;  %v2027_v26 = vmul.f32 %v2011_v32, %v6650_v62  ;;  %v2090_v56 = vadd.f32 %v2074_v16, %v2042_v47  ;;  %v2625_v22 = vadd.f32 %v5714_v24, %v2577_v37  ;;  %v2060_v52 = vld [vmem:[#allocation2 + $0x131] sm:$0xff] }
 0x2c2   : > { %v2530_v36 = vadd.f32 %v5696_v55, %v2482_v0  ;;  %v2186_v7 = vadd.f32 %v2170_v27, %v2137_v11  ;;  %v1916_v55 = vld [vmem:[#allocation2 + $0x12e] sm:$0xff]  ;;  %v2218_v27 = vmul.f32 %v1963_v6, %v6667_v49  ;;  %v2122_v47 = vmul.f32 %v2106_v51, %v6657_v63 }
 0x2c3   : > { %v1932_v10 = vmul.f32 %v1916_v55, %v6644_v29  ;;  %v2059_v0 = vld [vmem:[#allocation2 + $0x129] sm:$0xff]  ;;  %v2043_v2 = vadd.f32 %v2027_v26, %v1995_v53  ;;  %v2674_v24 = vadd.f32 %v5722_v46, %v2625_v22  ;;  %v5823_v11 = vld [vmem:[#allocation2 + $0x132] sm:$0xff]  ;;  %v2028_v6 = vmul.f32 %v2012_v25, %v6650_v62 }
 0x2c4   : > { %v2578_v33 = vadd.f32 %v5704_v9, %v2530_v36  ;;  %v2075_v8 = vmul.f32 %v2059_v0, %v6652_v48  ;;  %v5819_v57 = vld [vmem:[#allocation2 + $0x12a] sm:$0xff]  ;;  %6700 = vst [vmem:[#allocation57_spill] sm:$0xff] %v5823_v11  ;;  %v2171_v36 = vmul.f32 %v1916_v55, %v6658_v23  ;;  %v2234_v16 = vadd.f32 %v2218_v27, %v2186_v7 }
 0x2c5   : > { %6699 = vst [vmem:[#allocation12_spill] sm:$0xff] %v5819_v57  ;;  %v1996_v28 = vadd.f32 %v1980_v34, %v1932_v10  ;;  %v2138_v37 = vadd.f32 %v2122_v47, %v2090_v56  ;;  %v2076_v51 = vmul.f32 %v2060_v52, %v6652_v48  ;;  %v2123_v46 = vmul.f32 %v5819_v57, %v6657_v63  ;;  %v5851_v27 = vld [vmem:[#allocation2 + $0x147] sm:$0xff] }
 0x2c6   : > { %v2626_v9 = vadd.f32 %v5718_v19, %v2578_v33  ;;  %v2091_v53 = vadd.f32 %v2075_v8, %v2043_v2  ;;  %v2722_v33 = vadd.f32 %v5734_v60, %v2674_v24  ;;  %v2266_v26 = vmul.f32 %v2011_v32, %v6670_v4  ;;  %v5847_v32 = vld [vmem:[#allocation2 + $0x146] sm:$0xff]  ;;  %v5866_v8 = vld [vmem:[#allocation2 + $0x14f] sm:$0xff] }
 0x2c7   : > { %v2044_v7 = vadd.f32 %v2028_v6, %v1996_v28  ;;  %v5837_v1 = vmul.f32 %v5823_v11, %v6657_v63  ;;  %v2219_v56 = vmul.f32 %v1964_v50, %v6667_v49  ;;  %v5842_v60 = vmul.f32 %v2012_v25, %v6670_v4  ;;  %v5870_v24 = vld [vmem:[#allocation2 + $0x148] sm:$0xff] }
 0x2c8   : > { %v2675_v19 = vadd.f32 %v5730_v14, %v2626_v9  ;;  %v2187_v14 = vadd.f32 %v2171_v36, %v2138_v37  ;;  %v2770_v22 = vadd.f32 %v5744_v39, %v2722_v33  ;;  %v5844_v10 = vadd.f32 %v2266_v26, %v2234_v16  ;;  %6705 = vst [vmem:[#allocation62_spill] sm:$0xff] %v5870_v24  ;;  %v5877_v28 = vld [vmem:[#allocation2 + $0x149] sm:$0xff] }
 0x2c9   : > { %6701 = vst [vmem:[#allocation58_spill] sm:$0xff] %v5842_v60  ;;  %v5853_v9 = vadd.f32 %v2123_v46, %v2091_v53  ;;  %v5856_v2 = vmul.f32 %v2059_v0, %v6671_v45  ;;  %v5859_v39 = vmul.f32 %v2060_v52, %v6671_v45  ;;  %v1933_v25 = vmul.f32 %v5847_v32, %v6644_v29  ;;  %v5872_v0 = vld [vmem:[#allocation2 + $0x150] sm:$0xff] }
 0x2ca   : > { %v2723_v55 = vadd.f32 %v5738_v15, %v2675_v19  ;;  %6702 = vst [vmem:[#allocation59_spill] sm:$0xff] %v5844_v10  ;;  %v5849_v15 = vld [vmem:[#allocation2 + $0x14e] sm:$0xff]  ;;  %v2818_v50 = vadd.f32 %v5752_v17, %v2770_v22  ;;  %v1981_v47 = vmul.f32 %v5851_v27, %v6646_v42  ;;  %v1982_v17 = vmul.f32 %v5866_v8, %v6646_v42  ;;  %v6710_v22 = vld [vmem:[#allocation44_spill] sm:$0xff] }
 0x2cb   : > { %6703 = vst [vmem:[#allocation60_spill] sm:$0xff] %v5856_v2  ;;  %v5879_v36 = vadd.f32 %v2076_v51, %v2044_v7  ;;  %v5881_v16 = vadd.f32 %v2219_v56, %v2187_v14  ;;  %v2029_v6 = vmul.f32 %v5870_v24, %v6650_v62  ;;  %v5886_v53 = vld [vmem:[#allocation2 + $0x151] sm:$0xff]  ;;  %v2030_v51 = vmul.f32 %v5872_v0, %v6650_v62 }
 0x2cc   : > { %v2771_v34 = vadd.f32 %v5748_v40, %v2723_v55  ;;  %6704 = vst [vmem:[#allocation61_spill] sm:$0xff] %v5859_v39  ;;  %v1934_v40 = vmul.f32 %v5849_v15, %v6644_v29  ;;  %v2866_v29 = vadd.f32 %v5762_v12, %v2818_v50  ;;  %v1997_v19 = vadd.f32 %v1981_v47, %v1933_v25  ;;  %v5890_v37 = vld [vmem:[#allocation2 + $0x14a] sm:$0xff]  ;;  %v5895_v46 = vld [vmem:[#allocation2 + $0x152] sm:$0xff] }
 0x2cd   : > { %6706 = vst [vmem:[#allocation63_spill] sm:$0xff] %v5881_v16  ;;  %v2174_v12 = vmul.f32 %v5557_v5, %v6658_v23  ;;  %v6709_v7 = vld [vmem:[#allocation43_spill] sm:$0xff]  ;;  %v2222_v56 = vmul.f32 %v6710_v22, %v6667_v49  ;;  %v2078_v62 = vmul.f32 %v5886_v53, %v6652_v48  ;;  %v2125_v50 = vmul.f32 %v5890_v37, %v6657_v63  ;;  %v6711_v47 = vld [vmem:[#allocation45_spill] sm:$0xff] }
 0x2ce   : > { %v2819_v52 = vadd.f32 %v5756_v61, %v2771_v34  ;;  %v2077_v61 = vmul.f32 %v5877_v28, %v6652_v48  ;;  %6707 = vst [vmem:[#allocation64_spill] sm:$0xff] %v5890_v37  ;;  %v1998_v33 = vadd.f32 %v1982_v17, %v1934_v40  ;;  %v2915_v26 = vadd.f32 %v5770_v44, %v2866_v29  ;;  %v6713_v48 = vld [vmem:[#allocation47_spill] sm:$0xff] }
 0x2cf   : > { %6708 = vst [vmem:[#allocation65_spill] sm:$0xff] %v5895_v46  ;;  %v2045_v55 = vadd.f32 %v2029_v6, %v1997_v19  ;;  %v2175_v14 = vmul.f32 %v6709_v7, %v6658_v23  ;;  %v2126_v44 = vmul.f32 %v5895_v46, %v6657_v63  ;;  %v2271_v6 = vmul.f32 %v6713_v48, %v6670_v4  ;;  %v6715_v63 = vld [vmem:[#allocation52_spill] sm:$0xff] }
 0x2d0   : > { %v2867_v42 = vadd.f32 %v5766_v13, %v2819_v52  ;;  %v2046_v34 = vadd.f32 %v2030_v51, %v1998_v33  ;;  %v2963_v25 = vadd.f32 %v5784_v54, %v2915_v26  ;;  %v2223_v52 = vmul.f32 %v6711_v47, %v6667_v49  ;;  %v6714_v54 = vld [vmem:[#allocation51_spill] sm:$0xff] }
 0x2d1   : > { %v2093_v40 = vadd.f32 %v2077_v61, %v2045_v55  ;;  %v2318_v61 = vmul.f32 %v6714_v54, %v6671_v45  ;;  %v2319_v51 = vmul.f32 %v6715_v63, %v6671_v45  ;;  %v6737_v54 = vld [vmem:[#allocation29_spill] sm:$0xff] }
 0x2d2   : > { %v2916_v13 = vadd.f32 %v5777_v18, %v2867_v42  ;;  %v2094_v29 = vadd.f32 %v2078_v62, %v2046_v34  ;;  %v6712_v18 = vld [vmem:[#allocation46_spill] sm:$0xff]  ;;  %v3011_v42 = vadd.f32 %v5791_v30, %v2963_v25 }
 0x2d3   : > { %v2270_v19 = vmul.f32 %v6712_v18, %v6670_v4  ;;  %v2141_v33 = vadd.f32 %v2125_v50, %v2093_v40  ;;  %v6718_v62 = vld [vmem:[#allocation38_spill] sm:$0xff]  ;;  %v6720_v50 = vld [vmem:[#allocation48_spill] sm:$0xff]  ;;  %v6721_v40 = vld [vmem:[#allocation49_spill] sm:$0xff] }
 0x2d4   : > { %v2964_v17 = vadd.f32 %v5787_v59, %v2916_v13  ;;  %v2142_v55 = vadd.f32 %v2126_v44, %v2094_v29  ;;  %v6716_v59 = vld [vmem:[#allocation13_spill] sm:$0xff]  ;;  %v3059_v57 = vadd.f32 %v5798_v43, %v3011_v42  ;;  %v6719_v30 = vld [vmem:[#allocation14_spill] sm:$0xff]  ;;  %v6724_v29 = vld [vmem:[#allocation27_spill] sm:$0xff] }
 0x2d5   : > { %v6717_v13 = vld [vmem:[#allocation53_spill] sm:$0xff]  ;;  %v2367_v11 = vmul.f32 %v6718_v62, %v6716_v59  ;;  %v2190_v39 = vadd.f32 %v2174_v12, %v2141_v33  ;;  %v2415_v25 = vmul.f32 %v6720_v50, %v6719_v30  ;;  %v2416_v2 = vmul.f32 %v6721_v40, %v6719_v30  ;;  %v6723_v44 = vld [vmem:[#allocation50_spill] sm:$0xff]  ;;  %v6725_v43 = vld [vmem:[#allocation16_spill] sm:$0xff] }
 0x2d6   : > { %v3012_v26 = vadd.f32 %v5794_v21, %v2964_v17  ;;  %v2366_v34 = vmul.f32 %v6717_v13, %v6716_v59  ;;  %v2191_v60 = vadd.f32 %v2175_v14, %v2142_v55  ;;  %v6722_v21 = vld [vmem:[#allocation15_spill] sm:$0xff]  ;;  %v3107_v62 = vadd.f32 %v5806_v38, %v3059_v57  ;;  %v6726_v12 = vld [vmem:[#allocation33_spill] sm:$0xff]  ;;  %v6729_v14 = vld [vmem:[#allocation32_spill] sm:$0xff] }
 0x2d7   : > { %v2463_v17 = vmul.f32 %v6723_v44, %v6722_v21  ;;  %v2464_v16 = vmul.f32 %v6724_v29, %v6722_v21  ;;  %v2238_v13 = vadd.f32 %v2222_v56, %v2190_v39  ;;  %v2511_v42 = vmul.f32 %v6726_v12, %v6725_v43  ;;  %v6727_v33 = vld [vmem:[#allocation39_spill] sm:$0xff]  ;;  %v6730_v55 = vld [vmem:[#allocation40_spill] sm:$0xff]  ;;  %v6732_v56 = vld [vmem:[#allocation18_spill] sm:$0xff] }
 0x2d8   : > { %v3060_v10 = vadd.f32 %v5803_v41, %v3012_v26  ;;  %v2512_v50 = vmul.f32 %v6727_v33, %v6725_v43  ;;  %v2239_v63 = vadd.f32 %v2223_v52, %v2191_v60  ;;  %v6728_v41 = vld [vmem:[#allocation17_spill] sm:$0xff]  ;;  %v5952_v38 = vld [vmem:[%s6249_s4] ss:$0 sm:$0xff]  ;;  %v6733_v29 = vld [vmem:[#allocation34_spill] sm:$0xff] }
 0x2d9   : > { %v2559_v26 = vmul.f32 %v6729_v14, %v6728_v41  ;;  %v2560_v44 = vmul.f32 %v6730_v55, %v6728_v41  ;;  %6731 = vst [vmem:[#allocation43_spill] sm:$0xff] %v5952_v38  ;;  %v3123_v57 = vadd.f32 %v5952_v38, %v3107_v62  ;;  %v2286_v39 = vadd.f32 %v2270_v19, %v2238_v13  ;;  %v6735_v14 = vld [vmem:[#allocation20_spill] sm:$0xff]  ;;  %v6736_v12 = vld [vmem:[#allocation41_spill] sm:$0xff]  ;;  %v6739_v13 = vld [vmem:[#allocation31_spill] sm:$0xff] }
 0x2da   : > { %v3108_v40 = vadd.f32 %v5810_v3, %v3060_v10  ;;  %v2607_v33 = vmul.f32 %v6733_v29, %v6732_v56  ;;  %v6734_v3 = vld [vmem:[#allocation35_spill] sm:$0xff]  ;;  %v2287_v52 = vadd.f32 %v2271_v6, %v2239_v63  ;;  %v5962_v55 = vmul.f32 %v6736_v12, %v6735_v14  ;;  %v6738_v19 = vld [vmem:[#allocation21_spill] sm:$0xff]  ;;  %v6742_v63 = vld [vmem:[#allocation22_spill] sm:$0xff] }
 0x2db   : > { %v2608_v60 = vmul.f32 %v6734_v3, %v6732_v56  ;;  %v5966_v41 = vmul.f32 %v6737_v54, %v6735_v14  ;;  %v3139_v48 = vmax.f32 %v3123_v57, 0.0  ;;  %v2334_v62 = vadd.f32 %v2318_v61, %v2286_v39  ;;  %v6741_v29 = vld [vmem:[#allocation55_spill] sm:$0xff]  ;;  %v6745_v56 = vld [vmem:[#allocation25_spill] sm:$0xff]  ;;  %v6747_v14 = vld [vmem:[#allocation26_spill] sm:$0xff] }
 0x2dc   : > { %v3124_v10 = vadd.f32 %v5952_v38, %v3108_v40  ;;  %v5970_v18 = vmul.f32 %v6739_v13, %v6738_v19  ;;  %v5974_v3 = vmul.f32 %v6741_v29, %v6738_v19  ;;  %v2335_v6 = vadd.f32 %v2319_v51, %v2287_v52  ;;  %v6743_v38 = vld [vmem:[#allocation56_spill] sm:$0xff]  ;;  %v6746_v39 = vld [vmem:[#allocation23_spill] sm:$0xff]  ;;  %v6750_v19 = vld [vmem:[#allocation30_spill] sm:$0xff] }
 0x2dd   : > { %v5978_v12 = vmul.f32 %v6743_v38, %v6742_v63  ;;  %v5982_v54 = vmul.f32 %v6745_v56, %v6742_v63  ;;  %v3155_v57 = vpack.c.bf16 %v3139_v48, %v3139_v48  ;;  %v2382_v61 = vadd.f32 %v2366_v34, %v2334_v62  ;;  %v6749_v52 = vld [vmem:[#allocation24_spill] sm:$0xff] }
 0x2de   : > { %6740 = vst [vmem:[#allocation44_spill] sm:$0xff] %v5970_v18  ;;  %v3140_v40 = vmax.f32 %v3124_v10, 0.0  ;;  %v5986_v13 = vmul.f32 %v6747_v14, %v6746_v39  ;;  %v6748_v18 = vld [vmem:[#allocation28_spill] sm:$0xff]  ;;  %v2383_v51 = vadd.f32 %v2367_v11, %v2335_v6  ;;  %v5994_v38 = vmul.f32 %v6750_v19, %v6749_v52 }
 0x2df   : > { %6744 = vst [vmem:[#allocation45_spill] sm:$0xff] %v5978_v12  ;;  %v5990_v29 = vmul.f32 %v6748_v18, %v6746_v39  ;;  %v6751_v12 = vld [vmem:[#allocation54_spill] sm:$0xff]  ;;  %v2431_v48 = vadd.f32 %v2415_v25, %v2382_v61  ;;  %v6752_v34 = vld [vmem:[#allocation36_spill] sm:$0xff]  ;;  %v6753_v18 = vld [vmem:[#allocation37_spill] sm:$0xff] }
 0x2e0   : > { %v3156_v10 = vpack.c.bf16 %v3140_v40, %v3140_v40  ;;  %v5998_v56 = vmul.f32 %v6751_v12, %v6749_v52  ;;  %3171 = vst.msk [vmem:[#allocation3 + $0x58] sm:$0xf] %vm1895_vm3, %v3155_v57  ;;  %v6003_v62 = vmul.f32 %v6752_v34, %v6555_v31  ;;  %v6007_v14 = vmul.f32 %v6753_v18, %v6555_v31  ;;  %v6754_v11 = vld [vmem:[#allocation4_spill] sm:$0xff]  ;;  %v6755_v12 = vld [vmem:[#allocation5_spill] sm:$0xff]  ;;  %v6757_v25 = vld [vmem:[#allocation6_spill] sm:$0xff] }
 0x2e1   : > { %v6011_v40 = vmul.f32 %v6754_v11, %v6556_v35  ;;  %v2432_v6 = vadd.f32 %v2416_v2, %v2383_v51  ;;  %v6016_v19 = vmul.f32 %v6755_v12, %v6556_v35  ;;  %v6020_v57 = vmul.f32 %v6757_v25, %v6616_v58  ;;  %v6759_v61 = vld [vmem:[#allocation7_spill] sm:$0xff]  ;;  %v6760_v51 = vld [vmem:[#allocation8_spill] sm:$0xff]  ;;  %v6761_v25 = vld [vmem:[#allocation9_spill] sm:$0xff] }
 0x2e2   : > { %3172 = vst.msk [vmem:[#allocation3 + $0x5c] sm:$0xf] %vm1895_vm3, %v3156_v10  ;;  %v6024_v34 = vmul.f32 %v6759_v61, %v6616_v58  ;;  %v2479_v18 = vadd.f32 %v2463_v17, %v2431_v48  ;;  %v2140_v11 = vadd.f32 %v5837_v1, %v5879_v36  ;;  %v2172_v10 = vmul.f32 %v5847_v32, %v6658_v23 }
 0x2e3   : > { %6756 = vst [vmem:[#allocation13_spill] sm:$0xff] %v6016_v19  ;;  %v2173_v2 = vmul.f32 %v5849_v15, %v6658_v23  ;;  %v2480_v12 = vadd.f32 %v2464_v16, %v2432_v6  ;;  %v6034_v19 = vmul.f32 %v6760_v51, %v6621_v20  ;;  %v2220_v17 = vmul.f32 %v5851_v27, %v6667_v49  ;;  %v6048_v16 = vld [vmem:[%s6248_s3 + $0x18] ss:$0 sm:$0xff]  ;;  %v6763_v6 = vld [vmem:[#allocation10_spill] sm:$0xff] }
 0x2e4   : > { %6758 = vst [vmem:[#allocation14_spill] sm:$0xff] %v6020_v57  ;;  %v6038_v57 = vmul.f32 %v6761_v25, %v6621_v20  ;;  %v2527_v48 = vadd.f32 %v2511_v42, %v2479_v18  ;;  %v2188_v1 = vadd.f32 %v2172_v10, %v5853_v9  ;;  %v2221_v61 = vmul.f32 %v5866_v8, %v6667_v49  ;;  %v6764_v10 = vld [vmem:[#allocation11_spill] sm:$0xff] }
 0x2e5   : > { %v2189_v36 = vadd.f32 %v2173_v2, %v2140_v11  ;;  %v2528_v23 = vadd.f32 %v2512_v50, %v2480_v12  ;;  %6762 = vst [vmem:[#allocation15_spill] sm:$0xff] %v6048_v16  ;;  %v6052_v51 = vmul.f32 %v6048_v16, %v6763_v6  ;;  %v2268_v25 = vmul.f32 %v5870_v24, %v6670_v4 }
 0x2e6   : > { %v2269_v9 = vmul.f32 %v5872_v0, %v6670_v4  ;;  %v2575_v42 = vadd.f32 %v2559_v26, %v2527_v48  ;;  %v2236_v18 = vadd.f32 %v2220_v17, %v2188_v1  ;;  %v2316_v49 = vmul.f32 %v5877_v28, %v6671_v45 }
 0x2e7   : > { %v2237_v11 = vadd.f32 %v2221_v61, %v2189_v36  ;;  %v2576_v50 = vadd.f32 %v2560_v44, %v2528_v23  ;;  %v6062_v2 = vmul.f32 %v6048_v16, %v6764_v10  ;;  %v2317_v12 = vmul.f32 %v5886_v53, %v6671_v45 }
 0x2e8   : > { %v2364_v6 = vmul.f32 %v5890_v37, %v6716_v59  ;;  %v2623_v24 = vadd.f32 %v2607_v33, %v2575_v42  ;;  %v2284_v4 = vadd.f32 %v2268_v25, %v2236_v18  ;;  %v2365_v17 = vmul.f32 %v5895_v46, %v6716_v59  ;;  %v6767_v18 = vld [vmem:[#allocation44_spill] sm:$0xff] }
 0x2e9   : > { %v3671_v20 = vld [vmem:[#allocation3 + $0x58] sm:$0xff]  ;;  %v2285_v26 = vadd.f32 %v2269_v9, %v2237_v11  ;;  %v2624_v48 = vadd.f32 %v2608_v60, %v2576_v50  ;;  %v2413_v44 = vmul.f32 %v5557_v5, %v6719_v30  ;;  %v2414_v1 = vmul.f32 %v6709_v7, %v6719_v30  ;;  %v6765_v5 = vld [vmem:[#allocation46_spill] sm:$0xff]  ;;  %v6768_v50 = vld [vmem:[#allocation17_spill] sm:$0xff] }
 0x2ea   : > { %v2461_v45 = vmul.f32 %v6710_v22, %v6722_v21  ;;  %v3337_v36 = vsel %vm253_vm1, %v3671_v20, 0  ;;  %v2672_v61 = vadd.f32 %v5962_v55, %v2623_v24  ;;  %v2332_v33 = vadd.f32 %v2316_v49, %v2284_v4  ;;  %v6766_v7 = vld [vmem:[#allocation47_spill] sm:$0xff] }
 0x2eb   : > { %v2333_v23 = vadd.f32 %v2317_v12, %v2285_v26  ;;  %3369 = vmatpush.bf16.xpose.msra.mxu2 %v3337_v36  ;;  %v2673_v25 = vadd.f32 %v5966_v41, %v2624_v48  ;;  %v2462_v60 = vmul.f32 %v6711_v47, %v6722_v21  ;;  %v2509_v9 = vmul.f32 %v6765_v5, %v6725_v43  ;;  %v6769_v24 = vld [vmem:[#allocation51_spill] sm:$0xff]  ;;  %v6770_v41 = vld [vmem:[#allocation52_spill] sm:$0xff]  ;;  %v6771_v12 = vld [vmem:[#allocation18_spill] sm:$0xff] }
 0x2ec   : > { %v2510_v42 = vmul.f32 %v6766_v7, %v6725_v43  ;;  %v2720_v22 = vadd.f32 %v6767_v18, %v2672_v61  ;;  %v2380_v11 = vadd.f32 %v2364_v6, %v2332_v33  ;;  %v2557_v55 = vmul.f32 %v6769_v24, %v6768_v50  ;;  %v6772_v47 = vld [vmem:[#allocation53_spill] sm:$0xff]  ;;  %v6773_v26 = vld [vmem:[#allocation63_spill] sm:$0xff]  ;;  %v6774_v48 = vld [vmem:[#allocation58_spill] sm:$0xff] }
 0x2ed   : > { %v2381_v20 = vadd.f32 %v2365_v17, %v2333_v23  ;;  %v2721_v49 = vadd.f32 %v5974_v3, %v2673_v25  ;;  %v2558_v10 = vmul.f32 %v6770_v41, %v6768_v50  ;;  %v2605_v4 = vmul.f32 %v6772_v47, %v6771_v12  ;;  %v6775_v5 = vld [vmem:[#allocation45_spill] sm:$0xff]  ;;  %v6776_v6 = vld [vmem:[#allocation38_spill] sm:$0xff]  ;;  %v6777_v23 = vld [vmem:[#allocation20_spill] sm:$0xff] }
 0x2ee   : > { %v2283_v36 = vadd.f32 %v6774_v48, %v6773_v26  ;;  %v2768_v7 = vadd.f32 %v6775_v5, %v2720_v22  ;;  %v2429_v16 = vadd.f32 %v2413_v44, %v2380_v11  ;;  %v2606_v17 = vmul.f32 %v6776_v6, %v6771_v12  ;;  %v6778_v3 = vld [vmem:[#allocation48_spill] sm:$0xff]  ;;  %v6779_v18 = vld [vmem:[#allocation21_spill] sm:$0xff]  ;;  %v6780_v24 = vld [vmem:[#allocation50_spill] sm:$0xff] }
 0x2ef   : > { %v2430_v61 = vadd.f32 %v2414_v1, %v2381_v20  ;;  %v2769_v33 = vadd.f32 %v5982_v54, %v2721_v49  ;;  %v2654_v25 = vmul.f32 %v6778_v3, %v6777_v23  ;;  %v2702_v41 = vmul.f32 %v6780_v24, %v6779_v18  ;;  %v6781_v47 = vld [vmem:[#allocation33_spill] sm:$0xff]  ;;  %v6782_v44 = vld [vmem:[#allocation59_spill] sm:$0xff]  ;;  %v6783_v1 = vld [vmem:[#allocation60_spill] sm:$0xff] }
 0x2f0   : > { %v2750_v46 = vmul.f32 %v6781_v47, %v6742_v63  ;;  %v2816_v26 = vadd.f32 %v5986_v13, %v2768_v7  ;;  %v2477_v48 = vadd.f32 %v2461_v45, %v2429_v16  ;;  %v2330_v11 = vadd.f32 %v6783_v1, %v6782_v44  ;;  %v6784_v54 = vld [vmem:[#allocation49_spill] sm:$0xff]  ;;  %v6785_v5 = vld [vmem:[#allocation27_spill] sm:$0xff]  ;;  %v6789_v7 = vld [vmem:[#allocation40_spill] sm:$0xff] }
 0x2f1   : > { %v2478_v22 = vadd.f32 %v2462_v60, %v2430_v61  ;;  %v2817_v20 = vadd.f32 %v5990_v29, %v2769_v33  ;;  %v2655_v49 = vmul.f32 %v6784_v54, %v6777_v23  ;;  %v2703_v6 = vmul.f32 %v6785_v5, %v6779_v18  ;;  %v6786_v3 = vld [vmem:[#allocation61_spill] sm:$0xff]  ;;  %v6787_v13 = vld [vmem:[#allocation39_spill] sm:$0xff]  ;;  %v6788_v60 = vld [vmem:[#allocation32_spill] sm:$0xff] }
 0x2f2   : > { %v2331_v24 = vadd.f32 %v6786_v3, %v2283_v36  ;;  %v2864_v37 = vadd.f32 %v5994_v38, %v2816_v26  ;;  %v2525_v47 = vadd.f32 %v2509_v9, %v2477_v48  ;;  %v2751_v16 = vmul.f32 %v6787_v13, %v6742_v63  ;;  %v6790_v33 = vld [vmem:[#allocation34_spill] sm:$0xff]  ;;  %v6791_v9 = vld [vmem:[#allocation35_spill] sm:$0xff] }
 0x2f3   : > { %v2526_v12 = vadd.f32 %v2510_v42, %v2478_v22  ;;  %v2865_v45 = vadd.f32 %v5998_v56, %v2817_v20  ;;  %v2798_v29 = vmul.f32 %v6788_v60, %v6746_v39  ;;  %v2799_v61 = vmul.f32 %v6789_v7, %v6746_v39  ;;  %v6792_v56 = vld [vmem:[#allocation41_spill] sm:$0xff]  ;;  %v6794_v54 = vld [vmem:[#allocation31_spill] sm:$0xff] }
 0x2f4   : > { %v2846_v44 = vmul.f32 %v6790_v33, %v6749_v52  ;;  %v2913_v36 = vadd.f32 %v6003_v62, %v2864_v37  ;;  %v2573_v1 = vadd.f32 %v2557_v55, %v2525_v47  ;;  %v2847_v42 = vmul.f32 %v6791_v9, %v6749_v52  ;;  %v6793_v22 = vld [vmem:[#allocation29_spill] sm:$0xff]  ;;  %v6795_v55 = vld [vmem:[#allocation55_spill] sm:$0xff]  ;;  %v6800_v9 = vld [vmem:[#allocation14_spill] sm:$0xff] }
 0x2f5   : > { %v2574_v38 = vadd.f32 %v2558_v10, %v2526_v12  ;;  %v2914_v26 = vadd.f32 %v6007_v14, %v2865_v45  ;;  %v2895_v48 = vmul.f32 %v6792_v56, %v6555_v31  ;;  %v2896_v20 = vmul.f32 %v6793_v22, %v6555_v31  ;;  %v6796_v12 = vld [vmem:[#allocation13_spill] sm:$0xff]  ;;  %v6797_v14 = vld [vmem:[#allocation56_spill] sm:$0xff] }
 0x2f6   : > { %v6134_v5 = vmul.f32 %v6794_v54, %v6556_v35  ;;  %v2961_v3 = vadd.f32 %v6011_v40, %v2913_v36  ;;  %v2621_v37 = vadd.f32 %v2605_v4, %v2573_v1  ;;  %v2944_v10 = vmul.f32 %v6795_v55, %v6556_v35  ;;  %v6798_v45 = vld [vmem:[#allocation12_spill] sm:$0xff]  ;;  %v6799_v7 = vld [vmem:[#allocation57_spill] sm:$0xff] }
 0x2f7   : > { %v2622_v62 = vadd.f32 %v2606_v17, %v2574_v38  ;;  %v2962_v47 = vadd.f32 %v6796_v12, %v2914_v26  ;;  %v6142_v13 = vmul.f32 %v6797_v14, %v6616_v58  ;;  %v2362_v60 = vmul.f32 %v6798_v45, %v6716_v59 }
 0x2f8   : > { %v2363_v33 = vmul.f32 %v6799_v7, %v6716_v59  ;;  %v3009_v56 = vadd.f32 %v6800_v9, %v2961_v3  ;;  %v2670_v40 = vadd.f32 %v2654_v25, %v2621_v37  ;;  %v2411_v17 = vmul.f32 %v5847_v32, %v6719_v30  ;;  %v2637_v7 = vld [vmem:[#allocation2 + $0x16e] sm:$0xff] }
 0x2f9   : > { %v2671_v4 = vadd.f32 %v2655_v49, %v2622_v62  ;;  %v3010_v36 = vadd.f32 %v6024_v34, %v2962_v47  ;;  %v2378_v1 = vadd.f32 %v2362_v60, %v2330_v11  ;;  %v2412_v26 = vmul.f32 %v5849_v15, %v6719_v30  ;;  %v6801_v15 = vld [vmem:[#allocation62_spill] sm:$0xff] }
 0x2fa   : > { %v2379_v38 = vadd.f32 %v2363_v33, %v2331_v24  ;;  %v3057_v22 = vadd.f32 %v6034_v19, %v3009_v56  ;;  %v2718_v54 = vadd.f32 %v2702_v41, %v2670_v40  ;;  %v2459_v59 = vmul.f32 %v5851_v27, %v6722_v21  ;;  %v6803_v60 = vld [vmem:[#allocation18_spill] sm:$0xff] }
 0x2fb   : > { %v2719_v55 = vadd.f32 %v2703_v6, %v2671_v4  ;;  %v3058_v25 = vadd.f32 %v6038_v57, %v3010_v36  ;;  %v2427_v49 = vadd.f32 %v2411_v17, %v2378_v1  ;;  %v2460_v32 = vmul.f32 %v5866_v8, %v6722_v21  ;;  %v6802_v57 = vld [vmem:[#allocation43_spill] sm:$0xff] }
 0x2fc   : > { %v2428_v3 = vadd.f32 %v2412_v26, %v2379_v38  ;;  %v3105_v34 = vadd.f32 %v6052_v51, %v3057_v22  ;;  %v2766_v11 = vadd.f32 %v2750_v46, %v2718_v54  ;;  %v2507_v30 = vmul.f32 %v6801_v15, %v6725_v43  ;;  %v2732_v38 = vld [vmem:[#allocation2 + $0x168] sm:$0xff] }
 0x2fd   : > { %v2767_v24 = vadd.f32 %v2751_v16, %v2719_v55  ;;  %v3106_v19 = vadd.f32 %v6062_v2, %v3058_v25  ;;  %v2475_v41 = vadd.f32 %v2459_v59, %v2427_v49  ;;  %v2508_v27 = vmul.f32 %v5872_v0, %v6725_v43  ;;  %v2636_v2 = vld [vmem:[#allocation2 + $0x166] sm:$0xff]  ;;  %v2733_v25 = vld [vmem:[#allocation2 + $0x170] sm:$0xff] }
 0x2fe   : > { %v2476_v6 = vadd.f32 %v2460_v32, %v2428_v3  ;;  %v3121_v37 = vadd.f32 %v6802_v57, %v3105_v34  ;;  %v2814_v62 = vadd.f32 %v2798_v29, %v2766_v11  ;;  %v2555_v8 = vmul.f32 %v5877_v28, %v6768_v50  ;;  %v6804_v0 = vld [vmem:[#allocation64_spill] sm:$0xff]  ;;  %v6805_v28 = vld [vmem:[#allocation65_spill] sm:$0xff] }
 0x2ff   : > { %v2815_v12 = vadd.f32 %v2799_v61, %v2767_v24  ;;  %v3122_v46 = vadd.f32 %v6802_v57, %v3106_v19  ;;  %v2523_v21 = vadd.f32 %v2507_v30, %v2475_v41  ;;  %v2556_v16 = vmul.f32 %v5886_v53, %v6768_v50  ;;  %v2684_v53 = vld [vmem:[#allocation2 + $0x167] sm:$0xff]  ;;  %v2685_v50 = vld [vmem:[#allocation2 + $0x16f] sm:$0xff] }
 0x300   : > { %v2524_v51 = vadd.f32 %v2508_v27, %v2476_v6  ;;  %v3137_v47 = vmax.f32 %v3121_v37, 0.0  ;;  %v2862_v14 = vadd.f32 %v2846_v44, %v2814_v62  ;;  %v2603_v43 = vmul.f32 %v6804_v0, %v6803_v60  ;;  %v6806_v54 = vld [vmem:[#allocation25_spill] sm:$0xff]  ;;  %v2781_v30 = vld [vmem:[#allocation2 + $0x171] sm:$0xff] }
 0x301   : > { %v2863_v45 = vadd.f32 %v2847_v42, %v2815_v12  ;;  %v3138_v29 = vmax.f32 %v3122_v46, 0.0  ;;  %v2571_v61 = vadd.f32 %v2555_v8, %v2523_v21  ;;  %v2604_v9 = vmul.f32 %v6805_v28, %v6803_v60  ;;  %v2780_v49 = vld [vmem:[#allocation2 + $0x169] sm:$0xff]  ;;  %v2829_v62 = vld [vmem:[#allocation2 + $0x172] sm:$0xff] }
 0x302   : > { %v2572_v33 = vadd.f32 %v2556_v16, %v2524_v51  ;;  %v3153_v56 = vpack.c.bf16 %v3137_v47, %v3137_v47  ;;  %v2911_v40 = vadd.f32 %v2895_v48, %v2862_v14  ;;  %v2652_v17 = vmul.f32 %v2636_v2, %v6777_v23  ;;  %v6807_v48 = vld [vmem:[#allocation19_spill] sm:$0xff]  ;;  %v2828_v37 = vld [vmem:[#allocation2 + $0x16a] sm:$0xff] }
 0x303   : > { %v2912_v4 = vadd.f32 %v2896_v20, %v2863_v45  ;;  %v3154_v36 = vpack.c.bf16 %v3138_v29, %v3138_v29  ;;  %v2619_v44 = vadd.f32 %v2603_v43, %v2571_v61  ;;  %v2653_v1 = vmul.f32 %v2637_v7, %v6777_v23  ;;  %v6808_v20 = vld [vmem:[#allocation26_spill] sm:$0xff]  ;;  %v6811_v46 = vld [vmem:[#allocation15_spill] sm:$0xff]  ;;  %v2877_v16 = vld [vmem:[#allocation2 + $0x186] sm:$0xff] }
 0x304   : > { %v2620_v42 = vadd.f32 %v2604_v9, %v2572_v33  ;;  %3169 = vst.msk [vmem:[#allocation3 + $0x50] sm:$0xf] %vm1895_vm3, %v3153_v56  ;;  %v2959_v26 = vadd.f32 %v6134_v5, %v2911_v40  ;;  %v2992_v55 = vmul.f32 %v6806_v54, %v6616_v58  ;;  %v3039_v59 = vmul.f32 %v6808_v20, %v6807_v48  ;;  %v6812_v21 = vld [vmem:[#allocation54_spill] sm:$0xff]  ;;  %v2925_v40 = vld [vmem:[#allocation2 + $0x187] sm:$0xff] }
 0x305   : > { %v2960_v22 = vadd.f32 %v2944_v10, %v2912_v4  ;;  %3170 = vst.msk [vmem:[#allocation3 + $0x54] sm:$0xf] %vm1895_vm3, %v3154_v36  ;;  %v2668_v3 = vadd.f32 %v2652_v17, %v2619_v44  ;;  %v2700_v23 = vmul.f32 %v2684_v53, %v6779_v18  ;;  %v2701_v34 = vmul.f32 %v2685_v50, %v6779_v18  ;;  %v6809_v10 = vld [vmem:[#allocation28_spill] sm:$0xff]  ;;  %v6810_v18 = vld [vmem:[#allocation30_spill] sm:$0xff]  ;;  %v2973_v53 = vld [vmem:[#allocation2 + $0x188] sm:$0xff] }
 0x306   : > { %v2669_v32 = vadd.f32 %v2653_v1, %v2620_v42  ;;  %v3007_v11 = vadd.f32 %v6142_v13, %v2959_v26  ;;  %v3040_v24 = vmul.f32 %v6809_v10, %v6807_v48  ;;  %v2748_v15 = vmul.f32 %v2732_v38, %v6742_v63  ;;  %v2878_v2 = vld [vmem:[#allocation2 + $0x18e] sm:$0xff] }
 0x307   : > { %v3008_v5 = vadd.f32 %v2992_v55, %v2960_v22  ;;  %v2716_v19 = vadd.f32 %v2700_v23, %v2668_v3  ;;  %v2749_v6 = vmul.f32 %v2733_v25, %v6742_v63  ;;  %v2796_v27 = vmul.f32 %v2780_v49, %v6746_v39  ;;  %v2926_v4 = vld [vmem:[#allocation2 + $0x18f] sm:$0xff] }
 0x308   : > { %v2717_v41 = vadd.f32 %v2701_v34, %v2669_v32  ;;  %v3055_v12 = vadd.f32 %v3039_v59, %v3007_v11  ;;  %v3087_v13 = vmul.f32 %v6811_v46, %v6810_v18  ;;  %v3088_v51 = vmul.f32 %v6811_v46, %v6812_v21  ;;  %v2974_v44 = vld [vmem:[#allocation2 + $0x190] sm:$0xff] }
 0x309   : > { %v3056_v8 = vadd.f32 %v3040_v24, %v3008_v5  ;;  %v2764_v47 = vadd.f32 %v2748_v15, %v2716_v19  ;;  %v2797_v45 = vmul.f32 %v2781_v30, %v6746_v39  ;;  %v2844_v0 = vmul.f32 %v2828_v37, %v6749_v52  ;;  %v3021_v42 = vld [vmem:[#allocation2 + $0x189] sm:$0xff]  ;;  %v3022_v20 = vld [vmem:[#allocation2 + $0x191] sm:$0xff] }
 0x30a   : > { %v2765_v14 = vadd.f32 %v2749_v6, %v2717_v41  ;;  %v3103_v60 = vadd.f32 %v3087_v13, %v3055_v12  ;;  %v2845_v43 = vmul.f32 %v2829_v62, %v6749_v52  ;;  %v2893_v61 = vmul.f32 %v2877_v16, %v6555_v31  ;;  %v3069_v32 = vld [vmem:[#allocation2 + $0x18a] sm:$0xff]  ;;  %v3070_v23 = vld [vmem:[#allocation2 + $0x192] sm:$0xff] }
 0x30b   : > { %v3104_v63 = vadd.f32 %v3088_v51, %v3056_v8  ;;  %v2812_v7 = vadd.f32 %v2796_v27, %v2764_v47  ;;  %v2894_v33 = vmul.f32 %v2878_v2, %v6555_v31  ;;  %v2941_v31 = vmul.f32 %v2925_v40, %v6556_v35  ;;  %v6813_v47 = vld [vmem:[#allocation42_spill] sm:$0xff] }
 0x30c   : > { %v2813_v29 = vadd.f32 %v2797_v45, %v2765_v14  ;;  %v3670_v28 = vld [vmem:[#allocation3 + $0x50] sm:$0xff]  ;;  %v3119_v9 = vadd.f32 %v6802_v57, %v3103_v60  ;;  %v2942_v26 = vmul.f32 %v2926_v4, %v6556_v35  ;;  %v2989_v55 = vmul.f32 %v2973_v53, %v6616_v58 }
 0x30d   : > { %v3120_v56 = vadd.f32 %v6802_v57, %v3104_v63  ;;  %v2860_v39 = vadd.f32 %v2844_v0, %v2812_v7  ;;  %v3334_v50 = vsel %vm253_vm1, %v3670_v28, 0  ;;  %v2990_v49 = vmul.f32 %v2974_v44, %v6616_v58 }
 0x30e   : > { %v2861_v17 = vadd.f32 %v2845_v43, %v2813_v29  ;;  %v3135_v36 = vmax.f32 %v3119_v9, 0.0  ;;  %3370 = vmatpush.bf16.xpose.msra.mxu2 %v3334_v50  ;;  %v3037_v3 = vmul.f32 %v3021_v42, %v6807_v48  ;;  %v3038_v35 = vmul.f32 %v3022_v20, %v6807_v48 }
 0x30f   : > { %v3136_v52 = vmax.f32 %v3120_v56, 0.0  ;;  %v2909_v1 = vadd.f32 %v2893_v61, %v2860_v39  ;;  %v3085_v24 = vmul.f32 %v6811_v46, %v3069_v32  ;;  %v3086_v15 = vmul.f32 %v6811_v46, %v3070_v23 }
 0x310   : > { %v2910_v38 = vadd.f32 %v2894_v33, %v2861_v17  ;;  %v3151_v22 = vpack.c.bf16 %v3135_v36, %v3135_v36 }
 0x311   : > { %v3152_v54 = vpack.c.bf16 %v3136_v52, %v3136_v52  ;;  %v2957_v59 = vadd.f32 %v2941_v31, %v2909_v1 }
 0x312   : > { %v2958_v25 = vadd.f32 %v2942_v26, %v2910_v38  ;;  %3167 = vst.msk [vmem:[#allocation3 + $0x48] sm:$0xf] %vm1895_vm3, %v3151_v22 }
 0x313   : > { %3168 = vst.msk [vmem:[#allocation3 + $0x4c] sm:$0xf] %vm1895_vm3, %v3152_v54  ;;  %v3005_v34 = vadd.f32 %v2989_v55, %v2957_v59 }
 0x314   : > { %v3006_v11 = vadd.f32 %v2990_v49, %v2958_v25 }
 0x315   : > { %v3053_v5 = vadd.f32 %v3037_v3, %v3005_v34 }
 0x316   : > { %v3054_v10 = vadd.f32 %v3038_v35, %v3006_v11 }
 0x317   : > { %v3101_v30 = vadd.f32 %v3085_v24, %v3053_v5 }
 0x318   : > { %v3102_v58 = vadd.f32 %v3086_v15, %v3054_v10 }
 0x319   : > { %v3117_v19 = vadd.f32 %v6802_v57, %v3101_v30 }
 0x31a   : > { %v3118_v41 = vadd.f32 %v6802_v57, %v3102_v58  ;;  %v3669_v6 = vld [vmem:[#allocation3 + $0x48] sm:$0xff] }
 0x31b   : > { %v3133_v27 = vmax.f32 %v3117_v19, 0.0  ;;  %v3331_v62 = vsel %vm253_vm1, %v3669_v6, 0 }
 0x31c   : > { %v3134_v37 = vmax.f32 %v3118_v41, 0.0  ;;  %3371 = vmatpush.bf16.xpose.msra.mxu2 %v3331_v62  ;;  %v3360_v8 = vpop.f32.mrf.mxu1 }
 0x31d   : > { %v3149_v12 = vpack.c.bf16 %v3133_v27, %v3133_v27  ;;  %v3652_v46 = vmul.f32 -1.442695, %v3360_v8 }
 0x31e   : > { %v3150_v48 = vpack.c.bf16 %v3134_v37, %v3134_v37 }
 0x31f   : > { %3165 = vst.msk [vmem:[#allocation3 + $0x40] sm:$0xf] %vm1895_vm3, %v3149_v12  ;;  %3689 = vpow2.f32 %v3652_v46 }
 0x320   : > { %3166 = vst.msk [vmem:[#allocation3 + $0x44] sm:$0xf] %vm1895_vm3, %v3150_v48 }
 0x324   : > { %v3362_v57 = vpop.f32.mrf.mxu1 }
 0x325   : > { %v3690_v21 = vpop.eup %3689  ;;  %v3418_v51 = vsel %vm3417_vm4, %v3362_v57, -inf }
 0x326   : > { %v3385_v16 = vadd.f32 1.0, %v3690_v21  ;;  %v3419_v2 = vrot.slane %v3418_v51, 4 }
 0x327   : > { %v3668_v18 = vld [vmem:[#allocation3 + $0x40] sm:$0xff] }
 0x328   : > { %v3328_v13 = vsel %vm253_vm1, %v3668_v18, 0  ;;  %3691 = vrcp.f32 %v3385_v16  ;;  %v3420_v14 = vmax.f32 %v3418_v51, %v3419_v2  ;;  %vm3392_vm5 = vweird.f32 %v3385_v16 }
 0x329   : > { %3372 = vmatpush.bf16.xpose.msra.mxu2 %v3328_v13  ;;  %v3398_v7 = vand.u32 2147483648, %v3385_v16  ;;  %v3396_v61 = vand.u32 2147483647, %v3385_v16 }
 0x32a   : > { %v3421_v45 = vrot.slane %v3420_v14, 2 }
 0x32b   : > { %v3399_v56 = vor.u32 1.1754944e-38, %v3398_v7  ;;  %vm3397_vm8 = vcmp.eq.f32.partialorder %v3396_v61, 8.507059e+37 }
 0x32c   : > { %v3422_v60 = vmax.f32 %v3420_v14, %v3421_v45 }
 0x32e   : > { %v3692_v63 = vpop.eup %3691  ;;  %v3423_v43 = vrot.slane %v3422_v60, 1 }
 0x32f   : > { %v3388_v0 = vmul.f32 %v3692_v63, %v3385_v16  ;;  %vm3393_vm6 = vweird.f32 %v3692_v63 }
 0x330   : > { %3651 = vmatmul.msk.bf16.vlgmr.msra.gmra.mxu2 %vm253_vm1, %v6813_v47  ;;  %v3424_v33 = vmax.f32 %v3422_v60, %v3423_v43  ;;  %vm3394_vm7 = vmor %vm3392_vm5, %vm3393_vm6 }
 0x331   : > { %v3389_v29 = vsub.f32 1.0, %v3388_v0 }
 0x332   : > { %v3432_v9 = vsub.f32 %v3362_v57, %v3424_v33 }
 0x333   : > { %v3390_v28 = vmul.f32 %v3692_v63, %v3389_v29 }
 0x334   : > { %v3434_v4 = vmul.f32 1.442695, %v3432_v9 }
 0x335   : > { %v3391_v40 = vadd.f32 %v3692_v63, %v3390_v28 }
 0x336   : > { %3693 = vpow2.f32 %v3434_v4 }
 0x337   : > { %v3395_v39 = vsel %vm3394_vm7, %v3692_v63, %v3391_v40 }
 0x338   : > { %v3400_v17 = vsel %vm3397_vm8, %v3399_v56, %v3395_v39 }
 0x339   : > { %v3490_v53 = vsel %vm3489_vm9, %v3400_v17, %v3360_v8 }
 0x33a   : > { %3494 = vst [vmem:[%s6229_s14] sm:$0xff] %v3490_v53 }
 0x33c   : > { %v3694_v50 = vpop.eup %3693 }
 0x33d   : > { %v3440_v36 = vrot.slane %v3694_v50, 1 }
 0x33f   : > { %v3445_v52 = vsel %vm3444_vm10, %v3440_v36, 0.0 }
 0x340   : > { %v3446_v44 = vrot.slane %v3445_v52, 4 }
 0x342   : > { %v3447_v42 = vadd.f32 %v3446_v44, %v3445_v52 }
 0x344   : > { %v3448_v1 = vrot.slane %v3447_v42, 2 }
 0x346   : > { %v3449_v38 = vadd.f32 %v3448_v1, %v3447_v42 }
 0x348   : > { %v3450_v31 = vrot.slane %v3449_v38, 1 }
 0x34a   : > { %v3451_v26 = vadd.f32 %v3450_v31, %v3449_v38 }
 0x34c   : > { %3695 = vrcp.f32 %v3451_v26  ;;  %v3470_v55 = vand.u32 2147483648, %v3451_v26  ;;  %vm3464_vm11 = vweird.f32 %v3451_v26  ;;  %v3468_v59 = vand.u32 2147483647, %v3451_v26 }
 0x34e   : > { %v3471_v49 = vor.u32 1.1754944e-38, %v3470_v55  ;;  %vm3469_vm14 = vcmp.eq.f32.partialorder %v3468_v59, 8.507059e+37 }
 0x352   : > { %v3696_v22 = vpop.eup %3695 }
 0x353   : > { %v3460_v54 = vmul.f32 %v3696_v22, %v3451_v26  ;;  %vm3465_vm12 = vweird.f32 %v3696_v22 }
 0x354   : > { %vm3466_vm13 = vmor %vm3464_vm11, %vm3465_vm12 }
 0x355   : > { %v3461_v20 = vsub.f32 1.0, %v3460_v54 }
 0x357   : > { %v3462_v25 = vmul.f32 %v3696_v22, %v3461_v20 }
 0x359   : > { %v3463_v3 = vadd.f32 %v3696_v22, %v3462_v25 }
 0x35b   : > { %v3467_v32 = vsel %vm3466_vm13, %v3696_v22, %v3463_v3 }
 0x35c   : > { %v3472_v23 = vsel %vm3469_vm14, %v3471_v49, %v3467_v32 }
 0x35d   : > { %v3487_v34 = vmul.f32 %v3694_v50, %v3472_v23 }
 0x35f   : > { %v3492_v11 = vsel %vm3489_vm9, %v3362_v57, %v3487_v34 }
 0x360   : > { %3496 = vst [vmem:[%s6229_s14 + $0x10] sm:$0xf] %v3492_v11 }
 0x3b3   : > { %v3374_v35 = vpop.f32.mrf.mxu2 }
 0x3b4   : > { %v3653_v5 = vmul.f32 -1.442695, %v3374_v35 }
 0x3b6   : > { %3697 = vpow2.f32 %v3653_v5 }
 0x3bb   : > { %v3376_v10 = vpop.f32.mrf.mxu2 }
 0x3bc   : > { %v3698_v24 = vpop.eup %3697  ;;  %v3425_v15 = vsel %vm3417_vm4, %v3376_v10, -inf }
 0x3bd   : > { %v3386_v30 = vadd.f32 1.0, %v3698_v24  ;;  %v3426_v58 = vrot.slane %v3425_v15, 4 }
 0x3bf   : > { %3699 = vrcp.f32 %v3386_v30  ;;  %v3427_v19 = vmax.f32 %v3425_v15, %v3426_v58  ;;  %v3413_v8 = vand.u32 2147483648, %v3386_v30  ;;  %v3411_v46 = vand.u32 2147483647, %v3386_v30 }
 0x3c0   : > { %vm3407_vm0 = vweird.f32 %v3386_v30 }
 0x3c1   : > { %v3428_v41 = vrot.slane %v3427_v19, 2  ;;  %v3414_v51 = vor.u32 1.1754944e-38, %v3413_v8  ;;  %vm3412_vm2 = vcmp.eq.f32.partialorder %v3411_v46, 8.507059e+37 }
 0x3c3   : > { %v3429_v6 = vmax.f32 %v3427_v19, %v3428_v41 }
 0x3c5   : > { %v3700_v27 = vpop.eup %3699  ;;  %v3430_v62 = vrot.slane %v3429_v6, 1 }
 0x3c6   : > { %v3403_v37 = vmul.f32 %v3700_v27, %v3386_v30  ;;  %vm3408_vm15 = vweird.f32 %v3700_v27 }
 0x3c7   : > { %v3431_v48 = vmax.f32 %v3429_v6, %v3430_v62  ;;  %vm3409_vm1 = vmor %vm3407_vm0, %vm3408_vm15 }
 0x3c8   : > { %v3404_v12 = vsub.f32 1.0, %v3403_v37 }
 0x3c9   : > { %v3433_v13 = vsub.f32 %v3376_v10, %v3431_v48 }
 0x3ca   : > { %v3405_v18 = vmul.f32 %v3700_v27, %v3404_v12 }
 0x3cb   : > { %v3436_v21 = vmul.f32 1.442695, %v3433_v13 }
 0x3cc   : > { %v3406_v57 = vadd.f32 %v3700_v27, %v3405_v18 }
 0x3cd   : > { %3701 = vpow2.f32 %v3436_v21 }
 0x3ce   : > { %v3410_v16 = vsel %vm3409_vm1, %v3700_v27, %v3406_v57 }
 0x3cf   : > { %v3415_v2 = vsel %vm3412_vm2, %v3414_v51, %v3410_v16 }
 0x3d0   : > { %v3491_v47 = vsel %vm3489_vm9, %v3415_v2, %v3374_v35 }
 0x3d1   : > { %3495 = vst [vmem:[%s6229_s14 + $0x8] sm:$0xff] %v3491_v47 }
 0x3d3   : > { %v3702_v14 = vpop.eup %3701 }
 0x3d4   : > { %v3441_v45 = vrot.slane %v3702_v14, 1 }
 0x3d6   : > { %v3452_v60 = vsel %vm3444_vm10, %v3441_v45, 0.0 }
 0x3d7   : > { %v3453_v63 = vrot.slane %v3452_v60, 4 }
 0x3d9   : > { %v3454_v0 = vadd.f32 %v3453_v63, %v3452_v60 }
 0x3db   : > { %v3455_v43 = vrot.slane %v3454_v0, 2 }
 0x3dd   : > { %v3456_v7 = vadd.f32 %v3455_v43, %v3454_v0 }
 0x3df   : > { %v3457_v29 = vrot.slane %v3456_v7, 1 }
 0x3e1   : > { %v3458_v61 = vadd.f32 %v3457_v29, %v3456_v7 }
 0x3e3   : > { %3703 = vrcp.f32 %v3458_v61  ;;  %v3484_v56 = vand.u32 2147483648, %v3458_v61  ;;  %v3482_v4 = vand.u32 2147483647, %v3458_v61  ;;  %vm3478_vm4 = vweird.f32 %v3458_v61 }
 0x3e5   : > { %v3485_v17 = vor.u32 1.1754944e-38, %v3484_v56  ;;  %vm3483_vm6 = vcmp.eq.f32.partialorder %v3482_v4, 8.507059e+37 }
 0x3e9   : > { %v3704_v33 = vpop.eup %3703 }
 0x3ea   : > { %v3474_v28 = vmul.f32 %v3704_v33, %v3458_v61  ;;  %vm3479_vm3 = vweird.f32 %v3704_v33 }
 0x3eb   : > { %vm3480_vm5 = vmor %vm3478_vm4, %vm3479_vm3 }
 0x3ec   : > { %v3475_v9 = vsub.f32 1.0, %v3474_v28 }
 0x3ee   : > { %v3476_v40 = vmul.f32 %v3704_v33, %v3475_v9 }
 0x3f0   : > { %v3477_v39 = vadd.f32 %v3704_v33, %v3476_v40 }
 0x3f2   : > { %v3481_v53 = vsel %vm3480_vm5, %v3704_v33, %v3477_v39 }
 0x3f3   : > { %v3486_v50 = vsel %vm3483_vm6, %v3485_v17, %v3481_v53 }
 0x3f4   : > { %v3488_v36 = vmul.f32 %v3702_v14, %v3486_v50 }
 0x3f6   : > { %v3493_v52 = vsel %vm3489_vm9, %v3376_v10, %v3488_v36 }
 0x3f7   : > { %3497 = vst [vmem:[%s6229_s14 + $0x18] sm:$0xf] %v3493_v52 }
 0x3f8 PF: > { %s16_s21 = sadd.s32 1, %s3717_s21  }
 0x3f9   : > { %p13_p4 = scmp.ge.s32.totalorder %s16_s21, 4  }
 0x3fb   :  { %15 = sbr.rel (!%p13_p4) target bundleno = 1 (0x1), region = 84 }

</bundles_post_ra>
